<compile_context>
chip_gen: v7x
topology: tpu7x:2x2x1
jax: 0.10.0
libtpu: 0.0.40
codegen_flags: <defaults>
</compile_context>

<pallas_src>
import jax
import jax.numpy as jnp
from jax.experimental import pallas as pl
from jax.experimental.pallas import tpu as pltpu

HIDDEN = 32
H_EXT = 40        # hidden (32) + ones row (1), padded to a multiple of 8
BIG_TILE = 16384  # max points per grid step (lane-dense batch axis)
GRANULE = 512     # tile-size rounding granule (multiple of 128)


def _radiance_kernel(
    xin_ref,     # (8, T)  f32: rows 0:3 = x^T, 3:6 = dirs^T, 6 = 1.0, 7 = 0
    w_in_ref,    # (80, 8) bf16: [x-branch (W1^T,b1) + ones row | dirs-branch (W3d^T,b3)]
    w2_ref,      # (40, 40) bf16: W2^T with b2 column + ones-propagation row
    w_head_ref,  # (48, 40) bf16: W3h^T + ones row | (Ws^T, bs) row at 40
    w4_ref,      # (8, 40)  bf16: (W4^T, b4) in rows 0:3
    out_ref,     # (4, T)  f32: rows 0:3 = rgb^T, row 3 = sigma^T
):
    xin = xin_ref[...].astype(jnp.bfloat16)                                   # (8, T)

    # fused input matmul (biases folded via the constant-1 input row):
    #   rows  0:32 = (x @ W1 + b1)^T,   row 32 = 1,          rows 33:40 = 0
    #   rows 40:72 = (dirs @ W3d + b3)^T,                     rows 72:80 = 0
    a = jnp.dot(w_in_ref[...], xin, preferred_element_type=jnp.float32)       # (80, T)
    h = jnp.maximum(a[0:H_EXT, :], 0.0).astype(jnp.bfloat16)                  # (40, T)
    d3e = a[H_EXT:2 * H_EXT, :]                                               # (40, T) f32

    # trunk layer 2 (b2 folded; ones row propagates in row 32)
    h2 = jnp.dot(w2_ref[...], h, preferred_element_type=jnp.float32)          # (40, T)
    h2 = jnp.maximum(h2, 0.0).astype(jnp.bfloat16)

    # fused heads: rows 0:32 = (h @ W3h)^T, row 32 = 1, row 40 = (h @ Ws + bs)^T
    heads = jnp.dot(w_head_ref[...], h2, preferred_element_type=jnp.float32)  # (48, T)

    # color branch (b3 already folded into d3e, ones row survives relu)
    g = jnp.maximum(heads[0:H_EXT, :] + d3e, 0.0).astype(jnp.bfloat16)        # (40, T)
    rgb_lin = jnp.dot(w4_ref[...], g, preferred_element_type=jnp.float32)     # (8, T)

    # two direct lane-dense slice stores (no concat temp)
    out_ref[0:3, :] = jax.nn.sigmoid(rgb_lin[0:3, :])
    out_ref[3:4, :] = jax.nn.softplus(heads[H_EXT:H_EXT + 1, :])


def _const_spec(shape):
    # weights: one full (untiled) block, same for every grid step
    return pl.BlockSpec(shape, lambda i: tuple(0 for _ in shape))


def _pack_params(params):
    """Repack logical (row-major) params into fused, transposed, bias-folded bf16 forms."""
    (w1, b1, w2, b2, ws, bs, w3h, w3d, b3, w4, b4) = params
    H = HIDDEN

    # input weight: block-diag x/dirs branches + bias column (col 6) + ones row (row 32)
    w_in = jnp.zeros((2 * H_EXT, 8), jnp.float32)
    w_in = w_in.at[0:H, 0:3].set(w1.T)
    w_in = w_in.at[0:H, 6].set(b1.reshape(-1))
    w_in = w_in.at[H, 6].set(1.0)                       # ones-row generator
    w_in = w_in.at[H_EXT:H_EXT + H, 3:6].set(w3d.T)
    w_in = w_in.at[H_EXT:H_EXT + H, 6].set(b3.reshape(-1))

    # layer-2 weight with b2 column and ones-propagation row
    w2p = jnp.zeros((H_EXT, H_EXT), jnp.float32)
    w2p = w2p.at[0:H, 0:H].set(w2.T)
    w2p = w2p.at[0:H, H].set(b2.reshape(-1))
    w2p = w2p.at[H, H].set(1.0)

    # heads: color branch rows 0:32, ones row 32, sigma row 40 (with bs folded)
    w_head = jnp.zeros((48, H_EXT), jnp.float32)
    w_head = w_head.at[0:H, 0:H].set(w3h.T)
    w_head = w_head.at[H, H].set(1.0)
    w_head = w_head.at[H_EXT, 0:H].set(ws[:, 0])
    w_head = w_head.at[H_EXT, H].set(bs[0, 0])

    # color output weight with b4 column
    w4p = jnp.zeros((8, H_EXT), jnp.float32)
    w4p = w4p.at[0:3, 0:H].set(w4.T)
    w4p = w4p.at[0:3, H].set(b4.reshape(-1))

    bf = jnp.bfloat16
    return (w_in.astype(bf), w2p.astype(bf), w_head.astype(bf), w4p.astype(bf))


def _choose_tile(n):
    """Adaptive tile: large enough to amortize per-step overhead, small enough
    that small batches keep a >=2-step grid (v7x core sharding) without huge padding."""
    half = -(-n // 2)                       # ceil(N/2)
    t = -(-half // GRANULE) * GRANULE       # round up to GRANULE (multiple of 128)
    return int(min(BIG_TILE, max(GRANULE, t)))


@jax.jit
def radiance_field_forward(x, dirs, params):
    """x: [N,3] f32, dirs: [N,3] f32 -> (rgb [N,3], sigma [N,1], extra dict)."""
    N = x.shape[0]
    tile_n = _choose_tile(N)
    n_tiles = pl.cdiv(N, tile_n)
    n_pad = n_tiles * tile_n

    # layout plumbing (wrapper side): packed, feature-major, zero-padded input slab.
    # TODO(synk): expose a feature-major (8, N) entry point so callers can avoid
    # this transpose/pad pass at large N (it is an extra HBM pass over the data).
    xin = jnp.zeros((8, n_pad), jnp.float32)
    xin = xin.at[0:3, :N].set(x.T)
    xin = xin.at[3:6, :N].set(dirs.T)
    xin = xin.at[6, :].set(1.0)             # constant-1 row used to fold biases

    (w_in, w2p, w_head, w4p) = _pack_params(params)

    out = pl.pallas_call(
        _radiance_kernel,
        out_shape=jax.ShapeDtypeStruct((4, n_pad), jnp.float32),
        grid_spec=pltpu.PrefetchScalarGridSpec(
            num_scalar_prefetch=0,
            grid=(n_tiles,),
            in_specs=[
                pl.BlockSpec((8, tile_n), lambda i: (0, i)),   # packed x/dirs/ones
                _const_spec(w_in.shape),
                _const_spec(w2p.shape),
                _const_spec(w_head.shape),
                _const_spec(w4p.shape),
            ],
            out_specs=pl.BlockSpec((4, tile_n), lambda i: (0, i)),
        ),
        compiler_params=pltpu.CompilerParams(
            dimension_semantics=("parallel",),
            vmem_limit_bytes=48 * 1024 * 1024,   # headroom for big tiles; < 64 MiB v7x physical
        ),
    )(xin, w_in, w2p, w_head, w4p)

    rgb = out[0:3, :N].T
    sigma = out[3:4, :N].T
    return rgb, sigma, {}


def init_params(key):
    """Deterministic small-weight init (logical, row-major parameter shapes)."""
    ks = jax.random.split(key, 6)
    s = 0.1
    w1 = s * jax.random.normal(ks[0], (3, HIDDEN), jnp.float32)
    b1 = jnp.zeros((1, HIDDEN), jnp.float32)
    w2 = s * jax.random.normal(ks[1], (HIDDEN, HIDDEN), jnp.float32)
    b2 = jnp.zeros((1, HIDDEN), jnp.float32)
    ws = s * jax.random.normal(ks[2], (HIDDEN, 1), jnp.float32)
    bs = jnp.zeros((1, 1), jnp.float32)
    w3h = s * jax.random.normal(ks[3], (HIDDEN, HIDDEN), jnp.float32)
    w3d = s * jax.random.normal(ks[4], (3, HIDDEN), jnp.float32)
    b3 = jnp.zeros((1, HIDDEN), jnp.float32)
    w4 = s * jax.random.normal(ks[5], (HIDDEN, 3), jnp.float32)
    b4 = jnp.zeros((1, 3), jnp.float32)
    return (w1, b1, w2, b2, ws, bs, w3h, w3d, b3, w4, b4)


def _reference_forward(x, dirs, params):
    (w1, b1, w2, b2, ws, bs, w3h, w3d, b3, w4, b4) = params
    h = jnp.maximum(x @ w1 + b1, 0.0)
    h = jnp.maximum(h @ w2 + b2, 0.0)
    sigma = jax.nn.softplus(h @ ws + bs)
    g = jnp.maximum(h @ w3h + dirs @ w3d + b3, 0.0)
    rgb = jax.nn.sigmoid(g @ w4 + b4)
    return rgb, sigma


if __name__ == "__main__":
    key = jax.random.PRNGKey(0)
    kx, kd, kp = jax.random.split(key, 3)

    # deliberately NOT a multiple of the tile size (exercises the padded last
    # tile); the adaptive tile (2560) yields a 2-step grid so v7x uses both TCs.
    N = 5000
    x = jax.random.normal(kx, (N, 3), jnp.float32)
    dirs = jax.random.normal(kd, (N, 3), jnp.float32)
    dirs = dirs / jnp.linalg.norm(dirs, axis=-1, keepdims=True)

    params = init_params(kp)

    rgb, sigma, extra = radiance_field_forward(x, dirs, params)
    jax.block_until_ready((rgb, sigma))

    rgb_ref, sigma_ref = _reference_forward(x, dirs, params)
    assert rgb.shape == (N, 3) and sigma.shape == (N, 1)
    # bf16 matmul operands in the kernel vs. f32 reference -> relaxed tolerance
    assert jnp.allclose(rgb, rgb_ref, atol=2e-2)
    assert jnp.allclose(sigma, sigma_ref, atol=2e-2)

    # TODO(synk): query_density / update_fading_step / print_fading are training-time
    # hooks on the abstract base class; only the forward pass is kernelized here.
    print("KERNEL_OK")
</pallas_src>

<mosaic_0001>
module attributes {stable_mosaic.version = 11 : i64} {
  func.func @_radiance_kernel(%arg0: i32, %arg1: memref<8x2560xf32, #tpu.memory_space<vmem>>, %arg2: memref<80x8xbf16, #tpu.memory_space<vmem>>, %arg3: memref<40x40xbf16, #tpu.memory_space<vmem>>, %arg4: memref<48x40xbf16, #tpu.memory_space<vmem>>, %arg5: memref<8x40xbf16, #tpu.memory_space<vmem>>, %arg6: memref<4x2560xf32, #tpu.memory_space<vmem>>) attributes {dimension_semantics = [#tpu.dimension_semantics<parallel>], iteration_bounds = array<i64: 2>, scalar_prefetch = 0 : i64, scratch_operands = 0 : i64, tpu.core_type = #tpu.core_type<tc>, window_params = [{transform_indices = @transform_0, window_bounds = array<i64: 8, 2560>}, {pipeline_mode = #tpu.pipeline_mode<synchronous>, transform_indices = @transform_1, window_bounds = array<i64: 80, 8>}, {pipeline_mode = #tpu.pipeline_mode<synchronous>, transform_indices = @transform_2, window_bounds = array<i64: 40, 40>}, {pipeline_mode = #tpu.pipeline_mode<synchronous>, transform_indices = @transform_3, window_bounds = array<i64: 48, 40>}, {pipeline_mode = #tpu.pipeline_mode<synchronous>, transform_indices = @transform_4, window_bounds = array<i64: 8, 40>}, {transform_indices = @transform_5, window_bounds = array<i64: 4, 2560>}]} {
    %c0 = arith.constant 0 : index
    %c0_0 = arith.constant 0 : index
    %0 = vector.load %arg1[%c0, %c0_0] : memref<8x2560xf32, #tpu.memory_space<vmem>>, vector<8x2560xf32>
    %1 = arith.truncf %0 : vector<8x2560xf32> to vector<8x2560xbf16>
    %c0_1 = arith.constant 0 : index
    %c0_2 = arith.constant 0 : index
    %2 = vector.load %arg2[%c0_1, %c0_2] : memref<80x8xbf16, #tpu.memory_space<vmem>>, vector<80x8xbf16>
    %cst = arith.constant dense<0.000000e+00> : vector<80x2560xf32>
    %3 = tpu.matmul %2, %1, %cst {dimension_numbers = #tpu.dot_dimension_numbers<[1], [0], [0], [1], [0, 0, 1, 1], [], []>} : vector<80x8xbf16>, vector<8x2560xbf16>, vector<80x2560xf32> -> vector<80x2560xf32>
    %4 = vector.extract_strided_slice %3 {offsets = [0, 0], sizes = [40, 2560], strides = [1, 1]} : vector<80x2560xf32> to vector<40x2560xf32>
    %cst_3 = arith.constant 0.000000e+00 : f32
    %5 = vector.broadcast %cst_3 : f32 to vector<40x2560xf32>
    %6 = arith.maximumf %4, %5 : vector<40x2560xf32>
    %7 = arith.truncf %6 : vector<40x2560xf32> to vector<40x2560xbf16>
    %8 = vector.extract_strided_slice %3 {offsets = [40, 0], sizes = [40, 2560], strides = [1, 1]} : vector<80x2560xf32> to vector<40x2560xf32>
    %c0_4 = arith.constant 0 : index
    %c0_5 = arith.constant 0 : index
    %9 = vector.load %arg3[%c0_4, %c0_5] : memref<40x40xbf16, #tpu.memory_space<vmem>>, vector<40x40xbf16>
    %cst_6 = arith.constant dense<0.000000e+00> : vector<40x2560xf32>
    %10 = tpu.matmul %9, %7, %cst_6 {dimension_numbers = #tpu.dot_dimension_numbers<[1], [0], [0], [1], [0, 0, 1, 1], [], []>} : vector<40x40xbf16>, vector<40x2560xbf16>, vector<40x2560xf32> -> vector<40x2560xf32>
    %cst_7 = arith.constant 0.000000e+00 : f32
    %11 = vector.broadcast %cst_7 : f32 to vector<40x2560xf32>
    %12 = arith.maximumf %10, %11 : vector<40x2560xf32>
    %13 = arith.truncf %12 : vector<40x2560xf32> to vector<40x2560xbf16>
    %c0_8 = arith.constant 0 : index
    %c0_9 = arith.constant 0 : index
    %14 = vector.load %arg4[%c0_8, %c0_9] : memref<48x40xbf16, #tpu.memory_space<vmem>>, vector<48x40xbf16>
    %cst_10 = arith.constant dense<0.000000e+00> : vector<48x2560xf32>
    %15 = tpu.matmul %14, %13, %cst_10 {dimension_numbers = #tpu.dot_dimension_numbers<[1], [0], [0], [1], [0, 0, 1, 1], [], []>} : vector<48x40xbf16>, vector<40x2560xbf16>, vector<48x2560xf32> -> vector<48x2560xf32>
    %16 = vector.extract_strided_slice %15 {offsets = [0, 0], sizes = [40, 2560], strides = [1, 1]} : vector<48x2560xf32> to vector<40x2560xf32>
    %17 = arith.addf %16, %8 : vector<40x2560xf32>
    %cst_11 = arith.constant 0.000000e+00 : f32
    %18 = vector.broadcast %cst_11 : f32 to vector<40x2560xf32>
    %19 = arith.maximumf %17, %18 : vector<40x2560xf32>
    %20 = arith.truncf %19 : vector<40x2560xf32> to vector<40x2560xbf16>
    %c0_12 = arith.constant 0 : index
    %c0_13 = arith.constant 0 : index
    %21 = vector.load %arg5[%c0_12, %c0_13] : memref<8x40xbf16, #tpu.memory_space<vmem>>, vector<8x40xbf16>
    %cst_14 = arith.constant dense<0.000000e+00> : vector<8x2560xf32>
    %22 = tpu.matmul %21, %20, %cst_14 {dimension_numbers = #tpu.dot_dimension_numbers<[1], [0], [0], [1], [0, 0, 1, 1], [], []>} : vector<8x40xbf16>, vector<40x2560xbf16>, vector<8x2560xf32> -> vector<8x2560xf32>
    %23 = vector.extract_strided_slice %22 {offsets = [0, 0], sizes = [3, 2560], strides = [1, 1]} : vector<8x2560xf32> to vector<3x2560xf32>
    %24 = arith.negf %23 : vector<3x2560xf32>
    %25 = math.exp %24 : vector<3x2560xf32>
    %cst_15 = arith.constant 1.000000e+00 : f32
    %26 = vector.broadcast %cst_15 : f32 to vector<3x2560xf32>
    %27 = arith.addf %26, %25 : vector<3x2560xf32>
    %28 = arith.divf %26, %27 : vector<3x2560xf32>
    %c0_16 = arith.constant 0 : index
    %c0_17 = arith.constant 0 : index
    %29 = vector.load %arg6[%c0_16, %c0_17] : memref<4x2560xf32, #tpu.memory_space<vmem>>, vector<3x2560xf32>
    tpu.vector_store %arg6[%c0_16, %c0_17], %28 {strides = array<i32>} : memref<4x2560xf32, #tpu.memory_space<vmem>>, vector<3x2560xf32>,
    %30 = vector.extract_strided_slice %15 {offsets = [40, 0], sizes = [1, 2560], strides = [1, 1]} : vector<48x2560xf32> to vector<1x2560xf32>
    %cst_18 = arith.constant 0.000000e+00 : f32
    %31 = vector.broadcast %cst_18 : f32 to vector<1x2560xf32>
    %32 = arith.maximumf %30, %31 : vector<1x2560xf32>
    %33 = vector.broadcast %cst_18 : f32 to vector<1x2560xf32>
    %34 = arith.subf %30, %33 : vector<1x2560xf32>
    %35 = arith.cmpf one, %34, %34 : vector<1x2560xf32>
    %36 = vector.broadcast %cst_18 : f32 to vector<1x2560xf32>
    %37 = arith.addf %30, %36 : vector<1x2560xf32>
    %38 = math.absf %34 : vector<1x2560xf32>
    %cst_19 = arith.constant 0.000000e+00 : f32
    %39 = vector.broadcast %cst_19 : f32 to vector<1x2560xf32>
    %40 = arith.subf %39, %38 : vector<1x2560xf32>
    %41 = math.exp %40 : vector<1x2560xf32>
    %42 = math.log1p %41 : vector<1x2560xf32>
    %43 = arith.addf %32, %42 : vector<1x2560xf32>
    %44 = arith.select %35, %37, %43 : vector<1x2560xi1>, vector<1x2560xf32>
    %c3 = arith.constant 3 : index
    %c0_20 = arith.constant 0 : index
    %45 = vector.load %arg6[%c3, %c0_20] : memref<4x2560xf32, #tpu.memory_space<vmem>>, vector<1x2560xf32>
    tpu.vector_store %arg6[%c3, %c0_20], %44 {strides = array<i32>} : memref<4x2560xf32, #tpu.memory_space<vmem>>, vector<1x2560xf32>,
    return
  }
  func.func @transform_0(%arg0: i32) -> (i32, i32) {
    %c0_i32 = arith.constant 0 : i32
    %c0_i32_0 = arith.constant 0 : i32
    return %c0_i32, %arg0 : i32, i32
  }
  func.func @transform_1(%arg0: i32) -> (i32, i32) {
    %c0_i32 = arith.constant 0 : i32
    %c0_i32_0 = arith.constant 0 : i32
    %c0_i32_1 = arith.constant 0 : i32
    return %c0_i32, %c0_i32_0 : i32, i32
  }
  func.func @transform_2(%arg0: i32) -> (i32, i32) {
    %c0_i32 = arith.constant 0 : i32
    %c0_i32_0 = arith.constant 0 : i32
    %c0_i32_1 = arith.constant 0 : i32
    return %c0_i32, %c0_i32_0 : i32, i32
  }
  func.func @transform_3(%arg0: i32) -> (i32, i32) {
    %c0_i32 = arith.constant 0 : i32
    %c0_i32_0 = arith.constant 0 : i32
    %c0_i32_1 = arith.constant 0 : i32
    return %c0_i32, %c0_i32_0 : i32, i32
  }
  func.func @transform_4(%arg0: i32) -> (i32, i32) {
    %c0_i32 = arith.constant 0 : i32
    %c0_i32_0 = arith.constant 0 : i32
    %c0_i32_1 = arith.constant 0 : i32
    return %c0_i32, %c0_i32_0 : i32, i32
  }
  func.func @transform_5(%arg0: i32) -> (i32, i32) {
    %c0_i32 = arith.constant 0 : i32
    %c0_i32_0 = arith.constant 0 : i32
    return %c0_i32, %arg0 : i32, i32
  }
}

</mosaic_0001>

<bundles_post_ra>
// kernel: radiance_field_forward.1
= control target key start
LH: loop header
LB: loop body
LE: loop exit
PB: predicated region body
PF: predicated region fallthrough
CT: control target
= control target key end

     0   :  { %s4849_s18 = smov 0   ;;  %s6125_s0 = inlined_call_operand.vmem [shape: f32[8,5120], index: 0, kind: input, shape index: {}]   ;;  %s6126_s1 = inlined_call_operand.vmem [shape: bf16[80,8], index: 1, kind: input, shape index: {}]   ;;  %s6127_s2 = inlined_call_operand.vmem [shape: bf16[40,40], index: 2, kind: input, shape index: {}]   ;;  %s6128_s3 = inlined_call_operand.vmem [shape: bf16[48,40], index: 3, kind: input, shape index: {}]   ;;  %s6129_s4 = inlined_call_operand.vmem [shape: bf16[8,40], index: 4, kind: input, shape index: {}]   ;;  %s6130_s5 = inlined_call_operand.vmem [shape: f32[4,5120], index: 5, kind: output, shape index: {}]  }
   0x1 LB: > { %s4424_s19 = sadd.s32 4294967295, %s4815_s18   ;;  %p4428_p0 = scmp.ge.s32.totalorder %s4815_s18, 1  ;;  %s4815_s18 = sphi %s4849_s18, %s15_s18  }
   0x2   : > { %p188_p1 = scmp.lt.s32.totalorder %s4815_s18, 3 }
   0x4   : > { %p189_p2 = pnand %p4428_p0, %p188_p1 }
   0x6   : > { %192 = sbr.rel (%p189_p2) target bundleno = 1147 (0x47b), region = 40 }
   0xd   : > { %s216_s20 = smul.u32 20, %s4424_s19  ;;  %v6131_v0 = vmov 0   ;;  %vm320_vm0 = vcmask 1043456   ;;  %v4881_v16 = vld [vmem:[%s6126_s1] sm:$0xff]   ;;  %vm304_vm1 = vcmask 64512   ;;  %v4900_v26 = vld [vmem:[%s6126_s1 + $0x8] sm:$0xff]  }
   0xe   : > { %413 = vmatprep.mubr.bf16.mxu0 %v6131_v0  ;;  %496 = vmatprep.mubr.bf16.mxu1 %v6131_v0  ;;  %v4912_v27 = vld [vmem:[%s6126_s1 + $0x10] sm:$0xff]   ;;  %v4923_v28 = vld [vmem:[%s6126_s1 + $0x18] sm:$0xff]   ;;  %v4934_v29 = vld [vmem:[%s6126_s1 + $0x20] sm:$0xff]   ;;  %vm1389_vm2 = vcmask 326656  }
   0xf   : > { %p217_p3 = scmp.lt.s32.totalorder %s216_s20, 39 }
  0x11   : > { %s6295_s20 = smov (!%p217_p3, %s216_s20), 39 }
  0x12   : > { %s4429_s21 = sshll.u32 %s6295_s20, 3  ;;  %s4430_s26 = sshll.u32 %s6295_s20, 2 }
  0x13   : > { %s4865_s24 = scalar_lea.vmem %s6125_s0, %s4429_s21  ;;  %s5823_s28 = scalar_lea.vmem %s6130_s5, %s4430_s26 }
  0x14   : > { %v230_v1 = vld [vmem:[%s4865_s24 + $0x8] sm:$0xff]  ;;  %v232_v2 = vld [vmem:[%s4865_s24 + $0x18] sm:$0xff]  ;;  %v229_v3 = vld [vmem:[%s4865_s24] sm:$0xff] }
  0x15   : > { %v250_v4 = vpack.c.bf16 %v230_v1, %v230_v1  ;;  %v252_v5 = vpack.c.bf16 %v232_v2, %v232_v2  ;;  %v249_v6 = vpack.c.bf16 %v229_v3, %v229_v3  ;;  %v231_v7 = vld [vmem:[%s4865_s24 + $0x10] sm:$0xff]  ;;  %v234_v8 = vld [vmem:[%s4865_s24 + $0x28] sm:$0xff]  ;;  %v236_v9 = vld [vmem:[%s4865_s24 + $0x38] sm:$0xff] }
  0x16   : > { %v251_v10 = vpack.c.bf16 %v231_v7, %v231_v7  ;;  %v254_v11 = vpack.c.bf16 %v234_v8, %v234_v8  ;;  %v256_v12 = vpack.c.bf16 %v236_v9, %v236_v9  ;;  %v233_v13 = vld [vmem:[%s4865_s24 + $0x20] sm:$0xff]  ;;  %v235_v14 = vld [vmem:[%s4865_s24 + $0x30] sm:$0xff]  ;;  %v238_v19 = vld [vmem:[%s4865_s24 + $0x48] sm:$0xff] }
  0x17   : > { %4436 = vmatprep.subr.msk.bf16.mxu0 %vm320_vm0, %v250_v4  ;;  %4442 = vmatprep.subr.msk.bf16.mxu1 %vm320_vm0, %v252_v5  ;;  %v322_v15 = vsel %vm320_vm0, %v249_v6, 0  ;;  %v253_v17 = vpack.c.bf16 %v233_v13, %v233_v13  ;;  %v255_v18 = vpack.c.bf16 %v235_v14, %v235_v14  ;;  %v240_v21 = vld [vmem:[%s4865_s24 + $0x58] sm:$0xff]  ;;  %v258_v24 = vpack.c.bf16 %v238_v19, %v238_v19  ;;  %v237_v30 = vld [vmem:[%s4865_s24 + $0x40] sm:$0xff]  ;;  %v239_v31 = vld [vmem:[%s4865_s24 + $0x50] sm:$0xff] }
  0x18   : > { %382 = vmatpush1.bf16.msra.mxu0 %v322_v15  ;;  %v328_v20 = vsel %vm320_vm0, %v251_v10, 0  ;;  %v260_v25 = vpack.c.bf16 %v240_v21, %v240_v21  ;;  %v257_v32 = vpack.c.bf16 %v237_v30, %v237_v30  ;;  %v259_v33 = vpack.c.bf16 %v239_v31, %v239_v31  ;;  %v242_v34 = vld [vmem:[%s4865_s24 + $0x68] sm:$0xff]  ;;  %v244_v35 = vld [vmem:[%s4865_s24 + $0x78] sm:$0xff]  ;;  %v241_v40 = vld [vmem:[%s4865_s24 + $0x60] sm:$0xff] }
  0x19   : > { %465 = vmatpush1.bf16.msra.mxu1 %v328_v20  ;;  %4448 = vmatprep.subr.msk.bf16.mxu0 %vm320_vm0, %v254_v11  ;;  %v334_v22 = vsel %vm320_vm0, %v253_v17, 0  ;;  %v340_v23 = vsel %vm320_vm0, %v255_v18, 0  ;;  %v262_v37 = vpack.c.bf16 %v242_v34, %v242_v34  ;;  %v264_v39 = vpack.c.bf16 %v244_v35, %v244_v35  ;;  %v243_v41 = vld [vmem:[%s4865_s24 + $0x70] sm:$0xff]  ;;  %v246_v44 = vld [vmem:[%s4865_s24 + $0x88] sm:$0xff]  ;;  %v248_v45 = vld [vmem:[%s4865_s24 + $0x98] sm:$0xff] }
  0x1a   : > { %4454 = vmatprep.subr.msk.bf16.mxu1 %vm320_vm0, %v256_v12  ;;  %v346_v36 = vsel %vm320_vm0, %v257_v32, 0  ;;  %v352_v38 = vsel %vm320_vm0, %v259_v33, 0  ;;  %v261_v42 = vpack.c.bf16 %v241_v40, %v241_v40  ;;  %v263_v43 = vpack.c.bf16 %v243_v41, %v243_v41  ;;  %v245_v50 = vld [vmem:[%s4865_s24 + $0x80] sm:$0xff]  ;;  %v247_v51 = vld [vmem:[%s4865_s24 + $0x90] sm:$0xff] }
  0x1b   : > { %4437 = vmatmul.mubr.msk.bf16.vlgmr.msra.gmra.mrb[0].mxu0 %vm304_vm1, %v4881_v16  ;;  %v266_v47 = vpack.c.bf16 %v246_v44, %v246_v44  ;;  %v268_v49 = vpack.c.bf16 %v248_v45, %v248_v45  ;;  %v265_v52 = vpack.c.bf16 %v245_v50, %v245_v50  ;;  %v267_v53 = vpack.c.bf16 %v247_v51, %v247_v51  ;;  %v5096_v51 = vld [vmem:[%s6127_s2] sm:$0xff]  }
  0x1c   : > { %4443 = vmatmul.mubr.msk.bf16.vlgmr.msra.gmra.mrb[0].mxu1 %vm304_vm1, %v4881_v16  ;;  %423 = vmatprep.mubr.bf16.mxu0 %v6131_v0  ;;  %v358_v46 = vsel %vm320_vm0, %v261_v42, 0  ;;  %v364_v48 = vsel %vm320_vm0, %v263_v43, 0 }
  0x1d   : > { %506 = vmatprep.mubr.bf16.mxu1 %v6131_v0  ;;  %548 = vmatpush1.bf16.msra.mxu0 %v334_v22  ;;  %v370_v54 = vsel %vm320_vm0, %v265_v52, 0  ;;  %v376_v55 = vsel %vm320_vm0, %v267_v53, 0 }
  0x1e   : > { %631 = vmatpush1.bf16.msra.mxu1 %v340_v23  ;;  %4460 = vmatprep.subr.msk.bf16.mxu0 %vm320_vm0, %v258_v24 }
  0x1f   : > { %4466 = vmatprep.subr.msk.bf16.mxu1 %vm320_vm0, %v260_v25 }
  0x23   : > { %4438 = vmatmul.mubr.msk.bf16.gmra.mrb[4].mxu0 %vm304_vm1, %v4900_v26 }
  0x24   : > { %4444 = vmatmul.mubr.msk.bf16.gmra.mrb[4].mxu1 %vm304_vm1, %v4900_v26  ;;  %433 = vmatprep.mubr.bf16.mxu0 %v6131_v0 }
  0x25   : > { %516 = vmatprep.mubr.bf16.mxu1 %v6131_v0 }
  0x2b   : > { %4439 = vmatmul.mubr.msk.bf16.gmra.mrb[8].mxu0 %vm304_vm1, %v4912_v27 }
  0x2c   : > { %4445 = vmatmul.mubr.msk.bf16.gmra.mrb[8].mxu1 %vm304_vm1, %v4912_v27  ;;  %443 = vmatprep.mubr.bf16.mxu0 %v6131_v0 }
  0x2d   : > { %526 = vmatprep.mubr.bf16.mxu1 %v6131_v0 }
  0x33   : > { %4440 = vmatmul.mubr.msk.bf16.gmra.mrb[12].mxu0 %vm304_vm1, %v4923_v28 }
  0x34   : > { %4446 = vmatmul.mubr.msk.bf16.gmra.mrb[12].mxu1 %vm304_vm1, %v4923_v28  ;;  %453 = vmatprep.mubr.bf16.mxu0 %v6131_v0 }
  0x35   : > { %536 = vmatprep.mubr.bf16.mxu1 %v6131_v0 }
  0x3b   : > { %4441 = vmatmul.mubr.msk.bf16.gmra.mrb[16].mxu0 %vm304_vm1, %v4934_v29 }
  0x3c   : > { %4447 = vmatmul.mubr.msk.bf16.gmra.mrb[16].mxu1 %vm304_vm1, %v4934_v29  ;;  %579 = vmatprep.mubr.bf16.mxu0 %v6131_v0 }
  0x3d   : > { %662 = vmatprep.mubr.bf16.mxu1 %v6131_v0 }
  0x43   : > { %4449 = vmatmul.mubr.msk.bf16.vlgmr.msra.gmra.mrb[20].mxu0 %vm304_vm1, %v4881_v16 }
  0x44   : > { %4455 = vmatmul.mubr.msk.bf16.vlgmr.msra.gmra.mrb[20].mxu1 %vm304_vm1, %v4881_v16  ;;  %589 = vmatprep.mubr.bf16.mxu0 %v6131_v0 }
  0x45   : > { %672 = vmatprep.mubr.bf16.mxu1 %v6131_v0  ;;  %714 = vmatpush1.bf16.msra.mxu0 %v346_v36 }
  0x46   : > { %797 = vmatpush1.bf16.msra.mxu1 %v352_v38  ;;  %4472 = vmatprep.subr.msk.bf16.mxu0 %vm320_vm0, %v262_v37 }
  0x47   : > { %4478 = vmatprep.subr.msk.bf16.mxu1 %vm320_vm0, %v264_v39 }
  0x4b   : > { %4450 = vmatmul.mubr.msk.bf16.gmra.mrb[24].mxu0 %vm304_vm1, %v4900_v26 }
  0x4c   : > { %4456 = vmatmul.mubr.msk.bf16.gmra.mrb[24].mxu1 %vm304_vm1, %v4900_v26  ;;  %599 = vmatprep.mubr.bf16.mxu0 %v6131_v0 }
  0x4d   : > { %682 = vmatprep.mubr.bf16.mxu1 %v6131_v0 }
  0x53   : > { %4451 = vmatmul.mubr.msk.bf16.gmra.mrb[28].mxu0 %vm304_vm1, %v4912_v27 }
  0x54   : > { %4457 = vmatmul.mubr.msk.bf16.gmra.mrb[28].mxu1 %vm304_vm1, %v4912_v27  ;;  %609 = vmatprep.mubr.bf16.mxu0 %v6131_v0 }
  0x55   : > { %692 = vmatprep.mubr.bf16.mxu1 %v6131_v0 }
  0x5b   : > { %4452 = vmatmul.mubr.msk.bf16.gmra.mrb[32].mxu0 %vm304_vm1, %v4923_v28 }
  0x5c   : > { %4458 = vmatmul.mubr.msk.bf16.gmra.mrb[32].mxu1 %vm304_vm1, %v4923_v28  ;;  %619 = vmatprep.mubr.bf16.mxu0 %v6131_v0 }
  0x5d   : > { %702 = vmatprep.mubr.bf16.mxu1 %v6131_v0 }
  0x63   : > { %4453 = vmatmul.mubr.msk.bf16.gmra.mrb[36].mxu0 %vm304_vm1, %v4934_v29 }
  0x64   : > { %4459 = vmatmul.mubr.msk.bf16.gmra.mrb[36].mxu1 %vm304_vm1, %v4934_v29  ;;  %745 = vmatprep.mubr.bf16.mxu0 %v6131_v0 }
  0x65   : > { %828 = vmatprep.mubr.bf16.mxu1 %v6131_v0 }
  0x6b   : > { %4461 = vmatmul.mubr.msk.bf16.vlgmr.msra.gmra.mrb[40].mxu0 %vm304_vm1, %v4881_v16 }
  0x6c   : > { %4467 = vmatmul.mubr.msk.bf16.vlgmr.msra.gmra.mrb[40].mxu1 %vm304_vm1, %v4881_v16  ;;  %755 = vmatprep.mubr.bf16.mxu0 %v6131_v0 }
  0x6d   : > { %838 = vmatprep.mubr.bf16.mxu1 %v6131_v0  ;;  %880 = vmatpush1.bf16.msra.mxu0 %v358_v46 }
  0x6e   : > { %963 = vmatpush1.bf16.msra.mxu1 %v364_v48  ;;  %4484 = vmatprep.subr.msk.bf16.mxu0 %vm320_vm0, %v266_v47 }
  0x6f   : > { %4490 = vmatprep.subr.msk.bf16.mxu1 %vm320_vm0, %v268_v49 }
  0x73   : > { %4462 = vmatmul.mubr.msk.bf16.gmra.mrb[44].mxu0 %vm304_vm1, %v4900_v26 }
  0x74   : > { %4468 = vmatmul.mubr.msk.bf16.gmra.mrb[44].mxu1 %vm304_vm1, %v4900_v26  ;;  %765 = vmatprep.mubr.bf16.mxu0 %v6131_v0 }
  0x75   : > { %848 = vmatprep.mubr.bf16.mxu1 %v6131_v0 }
  0x7b   : > { %4463 = vmatmul.mubr.msk.bf16.gmra.mrb[48].mxu0 %vm304_vm1, %v4912_v27 }
  0x7c   : > { %4469 = vmatmul.mubr.msk.bf16.gmra.mrb[48].mxu1 %vm304_vm1, %v4912_v27  ;;  %775 = vmatprep.mubr.bf16.mxu0 %v6131_v0 }
  0x7d   : > { %858 = vmatprep.mubr.bf16.mxu1 %v6131_v0 }
  0x83   : > { %4464 = vmatmul.mubr.msk.bf16.gmra.mrb[52].mxu0 %vm304_vm1, %v4923_v28 }
  0x84   : > { %4470 = vmatmul.mubr.msk.bf16.gmra.mrb[52].mxu1 %vm304_vm1, %v4923_v28  ;;  %785 = vmatprep.mubr.bf16.mxu0 %v6131_v0 }
  0x85   : > { %868 = vmatprep.mubr.bf16.mxu1 %v6131_v0 }
  0x8b   : > { %4465 = vmatmul.mubr.msk.bf16.gmra.mrb[56].mxu0 %vm304_vm1, %v4934_v29 }
  0x8c   : > { %4471 = vmatmul.mubr.msk.bf16.gmra.mrb[56].mxu1 %vm304_vm1, %v4934_v29  ;;  %911 = vmatprep.mubr.bf16.mxu0 %v6131_v0 }
  0x8d   : > { %994 = vmatprep.mubr.bf16.mxu1 %v6131_v0 }
  0x93   : > { %4473 = vmatmul.mubr.msk.bf16.vlgmr.msra.gmra.mrb[60].mxu0 %vm304_vm1, %v4881_v16 }
  0x94   : > { %4479 = vmatmul.mubr.msk.bf16.vlgmr.msra.gmra.mrb[60].mxu1 %vm304_vm1, %v4881_v16  ;;  %921 = vmatprep.mubr.bf16.mxu0 %v6131_v0 }
  0x95   : > { %1004 = vmatprep.mubr.bf16.mxu1 %v6131_v0  ;;  %1046 = vmatpush1.bf16.msra.mxu0 %v370_v54 }
  0x96   : > { %1129 = vmatpush1.bf16.msra.mxu1 %v376_v55 }
  0x9b   : > { %4474 = vmatmul.mubr.msk.bf16.gmra.mrb[64].mxu0 %vm304_vm1, %v4900_v26 }
  0x9c   : > { %4480 = vmatmul.mubr.msk.bf16.gmra.mrb[64].mxu1 %vm304_vm1, %v4900_v26  ;;  %931 = vmatprep.mubr.bf16.mxu0 %v6131_v0 }
  0x9d   : > { %1014 = vmatprep.mubr.bf16.mxu1 %v6131_v0 }
  0xa3   : > { %4475 = vmatmul.mubr.msk.bf16.gmra.mrb[68].mxu0 %vm304_vm1, %v4912_v27 }
  0xa4   : > { %4481 = vmatmul.mubr.msk.bf16.gmra.mrb[68].mxu1 %vm304_vm1, %v4912_v27  ;;  %941 = vmatprep.mubr.bf16.mxu0 %v6131_v0 }
  0xa5   : > { %1024 = vmatprep.mubr.bf16.mxu1 %v6131_v0 }
  0xab   : > { %4476 = vmatmul.mubr.msk.bf16.gmra.mrb[72].mxu0 %vm304_vm1, %v4923_v28 }
  0xac   : > { %4482 = vmatmul.mubr.msk.bf16.gmra.mrb[72].mxu1 %vm304_vm1, %v4923_v28  ;;  %951 = vmatprep.mubr.bf16.mxu0 %v6131_v0 }
  0xad   : > { %1034 = vmatprep.mubr.bf16.mxu1 %v6131_v0 }
  0xb3   : > { %4477 = vmatmul.mubr.msk.bf16.gmra.mrb[76].mxu0 %vm304_vm1, %v4934_v29 }
  0xb4   : > { %4483 = vmatmul.mubr.msk.bf16.gmra.mrb[76].mxu1 %vm304_vm1, %v4934_v29  ;;  %1077 = vmatprep.mubr.bf16.mxu0 %v6131_v0 }
  0xb5   : > { %1160 = vmatprep.mubr.bf16.mxu1 %v6131_v0 }
  0xbb   : > { %4485 = vmatmul.mubr.msk.bf16.vlgmr.msra.gmra.mrb[80].mxu0 %vm304_vm1, %v4881_v16 }
  0xbc   : > { %4491 = vmatmul.mubr.msk.bf16.vlgmr.msra.gmra.mrb[80].mxu1 %vm304_vm1, %v4881_v16  ;;  %1087 = vmatprep.mubr.bf16.mxu0 %v6131_v0 }
  0xbd   : > { %1170 = vmatprep.mubr.bf16.mxu1 %v6131_v0 }
  0xc3   : > { %4486 = vmatmul.mubr.msk.bf16.gmra.mrb[84].mxu0 %vm304_vm1, %v4900_v26 }
  0xc4   : > { %4492 = vmatmul.mubr.msk.bf16.gmra.mrb[84].mxu1 %vm304_vm1, %v4900_v26  ;;  %1097 = vmatprep.mubr.bf16.mxu0 %v6131_v0 }
  0xc5   : > { %1180 = vmatprep.mubr.bf16.mxu1 %v6131_v0 }
  0xcb   : > { %4487 = vmatmul.mubr.msk.bf16.gmra.mrb[88].mxu0 %vm304_vm1, %v4912_v27 }
  0xcc   : > { %4493 = vmatmul.mubr.msk.bf16.gmra.mrb[88].mxu1 %vm304_vm1, %v4912_v27  ;;  %1107 = vmatprep.mubr.bf16.mxu0 %v6131_v0 }
  0xcd   : > { %1190 = vmatprep.mubr.bf16.mxu1 %v6131_v0 }
  0xd3   : > { %4488 = vmatmul.mubr.msk.bf16.gmra.mrb[92].mxu0 %vm304_vm1, %v4923_v28 }
  0xd4   : > { %4494 = vmatmul.mubr.msk.bf16.gmra.mrb[92].mxu1 %vm304_vm1, %v4923_v28  ;;  %1117 = vmatprep.mubr.bf16.mxu0 %v6131_v0 }
  0xd5   : > { %1200 = vmatprep.mubr.bf16.mxu1 %v6131_v0 }
  0xdb   : > { %4489 = vmatmul.mubr.msk.bf16.gmra.mrb[96].mxu0 %vm304_vm1, %v4934_v29 }
  0xdc   : > { %4495 = vmatmul.mubr.msk.bf16.gmra.mrb[96].mxu1 %vm304_vm1, %v4934_v29  ;;  %1491 = vmatprep.mubr.bf16.mxu0 %v6131_v0 }
  0xdd   : > { %1552 = vmatprep.mubr.bf16.mxu1 %v6131_v0 }
  0xee   : > { %v415_v56 = vpop.f32.mrb[0].mxu0 }
  0xef   : > { %v498_v57 = vpop.f32.mrb[0].mxu1  ;;  %v417_v58 = vpop.f32.mrb[1].mxu0  ;;  %v1211_v61 = vmax.f32 %v415_v56, 0.0 }
  0xf0   : > { %v500_v59 = vpop.f32.mrb[1].mxu1  ;;  %v419_v60 = vpop.f32.mrb[2].mxu0  ;;  %v1213_v2 = vmax.f32 %v498_v57, 0.0  ;;  %v1212_v3 = vmax.f32 %v417_v58, 0.0 }
  0xf1   : > { %v1231_v62 = vmax.f32 %v419_v60, 0.0  ;;  %v502_v63 = vpop.f32.mrb[2].mxu1  ;;  %v421_v1 = vpop.f32.mrb[3].mxu0  ;;  %v1214_v7 = vmax.f32 %v500_v59, 0.0  ;;  %v5124_v60 = vld [vmem:[%s6127_s2 + $0x8] sm:$0xff]  }
  0xf2   : > { %v1233_v4 = vmax.f32 %v502_v63, 0.0  ;;  %v1232_v5 = vmax.f32 %v421_v1, 0.0  ;;  %v504_v6 = vpop.f32.mrb[3].mxu1 }
  0xf3   : > { %v1311_v8 = vpack.c.bf16 %v1231_v62, %v1211_v61  ;;  %v1234_v9 = vmax.f32 %v504_v6, 0.0  ;;  %v5151_v6 = vld [vmem:[%s6127_s2 + $0x10] ss:$0 sps:$4 sm:$0xff]  }
  0xf4   : > { %v1313_v10 = vpack.c.bf16 %v1233_v4, %v1213_v2  ;;  %v1312_v11 = vpack.c.bf16 %v1232_v5, %v1212_v3 }
  0xf5   : > { %v1314_v12 = vpack.c.bf16 %v1234_v9, %v1214_v7 }
  0xf6   : > { %v425_v13 = vpop.f32.mrb[4].mxu0  ;;  %1459 = vmatprep.subr.bf16.mxu0 %v1312_v11 }
  0xf7   : > { %v508_v14 = vpop.f32.mrb[4].mxu1  ;;  %1520 = vmatprep.subr.bf16.mxu1 %v1314_v12  ;;  %v427_v15 = vpop.f32.mrb[5].mxu0  ;;  %1460 = vmatpush1.bf16.msra.mxu0 %v1311_v8  ;;  %v1251_v18 = vmax.f32 %v425_v13, 0.0 }
  0xf8   : > { %v510_v16 = vpop.f32.mrb[5].mxu1  ;;  %1521 = vmatpush1.bf16.msra.mxu1 %v1313_v10  ;;  %v429_v17 = vpop.f32.mrb[6].mxu0  ;;  %v1253_v22 = vmax.f32 %v508_v14, 0.0  ;;  %v1252_v23 = vmax.f32 %v427_v15, 0.0 }
  0xf9   : > { %v1271_v19 = vmax.f32 %v429_v17, 0.0  ;;  %v512_v20 = vpop.f32.mrb[6].mxu1  ;;  %v431_v21 = vpop.f32.mrb[7].mxu0  ;;  %v1254_v27 = vmax.f32 %v510_v16, 0.0 }
  0xfa   : > { %v1273_v24 = vmax.f32 %v512_v20, 0.0  ;;  %v1272_v25 = vmax.f32 %v431_v21, 0.0  ;;  %v514_v26 = vpop.f32.mrb[7].mxu1 }
  0xfb   : > { %v1331_v28 = vpack.c.bf16 %v1271_v19, %v1251_v18  ;;  %v1274_v29 = vmax.f32 %v514_v26, 0.0 }
  0xfc   : > { %v1333_v30 = vpack.c.bf16 %v1273_v24, %v1253_v22  ;;  %v1332_v31 = vpack.c.bf16 %v1272_v25, %v1252_v23 }
  0xfd   : > { %v1334_v32 = vpack.c.bf16 %v1274_v29, %v1254_v27 }
  0xfe   : > { %v435_v33 = vpop.f32.mrb[8].mxu0  ;;  %1461 = vmatprep.subr.bf16.mxu0 %v1332_v31 }
  0xff   : > { %v1291_v34 = vmax.f32 %v435_v33, 0.0  ;;  %v518_v35 = vpop.f32.mrb[8].mxu1  ;;  %1522 = vmatprep.subr.bf16.mxu1 %v1334_v32  ;;  %v437_v36 = vpop.f32.mrb[9].mxu0  ;;  %1462 = vmatpush1.bf16.msra.mxu0 %v1331_v28 }
 0x100   : > { %v1293_v37 = vmax.f32 %v518_v35, 0.0  ;;  %v1292_v38 = vmax.f32 %v437_v36, 0.0  ;;  %v520_v39 = vpop.f32.mrb[9].mxu1  ;;  %1523 = vmatpush1.bf16.msra.mxu1 %v1333_v30  ;;  %v5082_v40 = vpop.f32.mrb[10].mxu0 }
 0x101   : > { %v1351_v41 = vpack.c.bf16 %v1291_v34, %v1291_v34  ;;  %v1294_v42 = vmax.f32 %v520_v39, 0.0  ;;  %v5084_v43 = vpop.f32.mrb[10].mxu1  ;;  %v5086_v44 = vpop.f32.mrb[11].mxu0 }
 0x102   : > { %v1353_v45 = vpack.c.bf16 %v1293_v37, %v1293_v37  ;;  %v1352_v46 = vpack.c.bf16 %v1292_v38, %v1292_v38  ;;  %v5088_v47 = vpop.f32.mrb[11].mxu1 }
 0x103   : > { %v1400_v48 = vsel %vm320_vm0, %v1351_v41, 0  ;;  %v1354_v49 = vpack.c.bf16 %v1294_v42, %v1294_v42 }
 0x104   : > { %v1406_v50 = vsel %vm320_vm0, %v1353_v45, 0  ;;  %4499 = vmatprep.subr.msk.bf16.mxu0 %vm320_vm0, %v1352_v46 }
 0x105   : > { %4503 = vmatprep.subr.msk.bf16.mxu1 %vm320_vm0, %v1354_v49  ;;  %1464 = vmatpush1.bf16.msra.mxu0 %v1400_v48 }
 0x106   : > { %1525 = vmatpush1.bf16.msra.mxu1 %v1406_v50  ;;  %v5099_v52 = vpop.f32.mrb[12].mxu0 }
 0x107   : > { %v5101_v53 = vpop.f32.mrb[12].mxu1  ;;  %v5103_v54 = vpop.f32.mrb[13].mxu0 }
 0x108   : > { %v5105_v55 = vpop.f32.mrb[13].mxu1  ;;  %v5107_v56 = vpop.f32.mrb[14].mxu0  ;;  %4500 = vmatmul.mubr.msk.bf16.vlgmr.msra.gmra.mrb[100].mxu0 %vm1389_vm2, %v5096_v51 }
 0x109   : > { %v5111_v57 = vpop.f32.mrb[14].mxu1  ;;  %4504 = vmatmul.mubr.msk.bf16.vlgmr.msra.gmra.mrb[100].mxu1 %vm1389_vm2, %v5096_v51  ;;  %v5115_v58 = vpop.f32.mrb[15].mxu0  ;;  %1501 = vmatprep.mubr.bf16.mxu0 %v6131_v0 }
 0x10a   : > { %v5118_v59 = vpop.f32.mrb[15].mxu1  ;;  %1562 = vmatprep.mubr.bf16.mxu1 %v6131_v0 }
 0x10e   : > { %v5126_v61 = vpop.f32.mrb[16].mxu0 }
 0x10f   : > { %v5128_v62 = vpop.f32.mrb[16].mxu1  ;;  %v5130_v63 = vpop.f32.mrb[17].mxu0 }
 0x110   : > { %v5132_v1 = vpop.f32.mrb[17].mxu1  ;;  %v5134_v2 = vpop.f32.mrb[18].mxu0  ;;  %4501 = vmatmul.mubr.msk.bf16.gmra.mrb[104].mxu0 %vm1389_vm2, %v5124_v60 }
 0x111   : > { %v5138_v3 = vpop.f32.mrb[18].mxu1  ;;  %4505 = vmatmul.mubr.msk.bf16.gmra.mrb[104].mxu1 %vm1389_vm2, %v5124_v60  ;;  %v5142_v4 = vpop.f32.mrb[19].mxu0  ;;  %1511 = vmatprep.mubr.bf16.mxu0 %v6131_v0 }
 0x112   : > { %v5145_v5 = vpop.f32.mrb[19].mxu1  ;;  %1572 = vmatprep.mubr.bf16.mxu1 %v6131_v0 }
 0x116   : > { %v581_v7 = vpop.f32.mrb[20].mxu0 }
 0x117   : > { %v664_v8 = vpop.f32.mrb[20].mxu1  ;;  %v583_v9 = vpop.f32.mrb[21].mxu0  ;;  %v1215_v12 = vmax.f32 %v581_v7, 0.0 }
 0x118   : > { %v666_v10 = vpop.f32.mrb[21].mxu1  ;;  %v585_v11 = vpop.f32.mrb[22].mxu0  ;;  %4502 = vmatmul.mubr.msk.bf16.gmra.mrb[108].mxu0 %vm1389_vm2, %v5151_v6  ;;  %v1217_v16 = vmax.f32 %v664_v8, 0.0  ;;  %v1216_v17 = vmax.f32 %v583_v9, 0.0 }
 0x119   : > { %v1235_v13 = vmax.f32 %v585_v11, 0.0  ;;  %v668_v14 = vpop.f32.mrb[22].mxu1  ;;  %4506 = vmatmul.mubr.msk.bf16.gmra.mrb[108].mxu1 %vm1389_vm2, %v5151_v6  ;;  %v587_v15 = vpop.f32.mrb[23].mxu0  ;;  %1613 = vmatprep.mubr.bf16.mxu0 %v6131_v0  ;;  %v1218_v21 = vmax.f32 %v666_v10, 0.0 }
 0x11a   : > { %v1237_v18 = vmax.f32 %v668_v14, 0.0  ;;  %v1236_v19 = vmax.f32 %v587_v15, 0.0  ;;  %v670_v20 = vpop.f32.mrb[23].mxu1  ;;  %1674 = vmatprep.mubr.bf16.mxu1 %v6131_v0 }
 0x11b   : > { %v1315_v22 = vpack.c.bf16 %v1235_v13, %v1215_v12  ;;  %v1238_v23 = vmax.f32 %v670_v20, 0.0 }
 0x11c   : > { %v1317_v24 = vpack.c.bf16 %v1237_v18, %v1217_v16  ;;  %v1316_v25 = vpack.c.bf16 %v1236_v19, %v1216_v17 }
 0x11d   : > { %v1318_v26 = vpack.c.bf16 %v1238_v23, %v1218_v21 }
 0x11e   : > { %v591_v27 = vpop.f32.mrb[24].mxu0  ;;  %1581 = vmatprep.subr.bf16.mxu0 %v1316_v25 }
 0x11f   : > { %v674_v28 = vpop.f32.mrb[24].mxu1  ;;  %1642 = vmatprep.subr.bf16.mxu1 %v1318_v26  ;;  %v593_v29 = vpop.f32.mrb[25].mxu0  ;;  %1582 = vmatpush1.bf16.msra.mxu0 %v1315_v22  ;;  %v1255_v32 = vmax.f32 %v591_v27, 0.0 }
 0x120   : > { %v676_v30 = vpop.f32.mrb[25].mxu1  ;;  %1643 = vmatpush1.bf16.msra.mxu1 %v1317_v24  ;;  %v595_v31 = vpop.f32.mrb[26].mxu0  ;;  %v1257_v36 = vmax.f32 %v674_v28, 0.0  ;;  %v1256_v37 = vmax.f32 %v593_v29, 0.0 }
 0x121   : > { %v1275_v33 = vmax.f32 %v595_v31, 0.0  ;;  %v678_v34 = vpop.f32.mrb[26].mxu1  ;;  %v597_v35 = vpop.f32.mrb[27].mxu0  ;;  %v1258_v42 = vmax.f32 %v676_v30, 0.0 }
 0x122   : > { %v1277_v38 = vmax.f32 %v678_v34, 0.0  ;;  %v1276_v39 = vmax.f32 %v597_v35, 0.0  ;;  %v680_v41 = vpop.f32.mrb[27].mxu1 }
 0x123   : > { %v1335_v45 = vpack.c.bf16 %v1275_v33, %v1255_v32  ;;  %v1278_v46 = vmax.f32 %v680_v41, 0.0 }
 0x124   : > { %v1337_v48 = vpack.c.bf16 %v1277_v38, %v1257_v36  ;;  %v1336_v49 = vpack.c.bf16 %v1276_v39, %v1256_v37 }
 0x125   : > { %v1338_v50 = vpack.c.bf16 %v1278_v46, %v1258_v42 }
 0x126   : > { %v601_v7 = vpop.f32.mrb[28].mxu0  ;;  %1583 = vmatprep.subr.bf16.mxu0 %v1336_v49 }
 0x127   : > { %v1295_v8 = vmax.f32 %v601_v7, 0.0  ;;  %v684_v9 = vpop.f32.mrb[28].mxu1  ;;  %1644 = vmatprep.subr.bf16.mxu1 %v1338_v50  ;;  %v603_v10 = vpop.f32.mrb[29].mxu0  ;;  %1584 = vmatpush1.bf16.msra.mxu0 %v1335_v45 }
 0x128   : > { %v1297_v11 = vmax.f32 %v684_v9, 0.0  ;;  %v1296_v12 = vmax.f32 %v603_v10, 0.0  ;;  %v686_v13 = vpop.f32.mrb[29].mxu1  ;;  %1645 = vmatpush1.bf16.msra.mxu1 %v1337_v48  ;;  %v5159_v14 = vpop.f32.mrb[30].mxu0 }
 0x129   : > { %v1355_v15 = vpack.c.bf16 %v1295_v8, %v1295_v8  ;;  %v1298_v16 = vmax.f32 %v686_v13, 0.0  ;;  %v5161_v17 = vpop.f32.mrb[30].mxu1  ;;  %v5163_v18 = vpop.f32.mrb[31].mxu0 }
 0x12a   : > { %v1357_v19 = vpack.c.bf16 %v1297_v11, %v1297_v11  ;;  %v1356_v20 = vpack.c.bf16 %v1296_v12, %v1296_v12  ;;  %v5165_v21 = vpop.f32.mrb[31].mxu1 }
 0x12b   : > { %v1412_v22 = vsel %vm320_vm0, %v1355_v15, 0  ;;  %v1358_v23 = vpack.c.bf16 %v1298_v16, %v1298_v16 }
 0x12c   : > { %v1418_v24 = vsel %vm320_vm0, %v1357_v19, 0  ;;  %4507 = vmatprep.subr.msk.bf16.mxu0 %vm320_vm0, %v1356_v20 }
 0x12d   : > { %4511 = vmatprep.subr.msk.bf16.mxu1 %vm320_vm0, %v1358_v23  ;;  %1586 = vmatpush1.bf16.msra.mxu0 %v1412_v22 }
 0x12e   : > { %1647 = vmatpush1.bf16.msra.mxu1 %v1418_v24  ;;  %v5171_v25 = vpop.f32.mrb[32].mxu0 }
 0x12f   : > { %v5173_v26 = vpop.f32.mrb[32].mxu1  ;;  %v5175_v27 = vpop.f32.mrb[33].mxu0 }
 0x130   : > { %v5177_v28 = vpop.f32.mrb[33].mxu1  ;;  %v5179_v29 = vpop.f32.mrb[34].mxu0  ;;  %4508 = vmatmul.mubr.msk.bf16.vlgmr.msra.gmra.mrb[112].mxu0 %vm1389_vm2, %v5096_v51 }
 0x131   : > { %v5183_v30 = vpop.f32.mrb[34].mxu1  ;;  %4512 = vmatmul.mubr.msk.bf16.vlgmr.msra.gmra.mrb[112].mxu1 %vm1389_vm2, %v5096_v51  ;;  %v5187_v31 = vpop.f32.mrb[35].mxu0  ;;  %1623 = vmatprep.mubr.bf16.mxu0 %v6131_v0 }
 0x132   : > { %v5190_v32 = vpop.f32.mrb[35].mxu1  ;;  %1684 = vmatprep.mubr.bf16.mxu1 %v6131_v0 }
 0x136   : > { %v5193_v33 = vpop.f32.mrb[36].mxu0 }
 0x137   : > { %v5195_v34 = vpop.f32.mrb[36].mxu1  ;;  %v5197_v35 = vpop.f32.mrb[37].mxu0 }
 0x138   : > { %v5199_v36 = vpop.f32.mrb[37].mxu1  ;;  %v5201_v37 = vpop.f32.mrb[38].mxu0  ;;  %4509 = vmatmul.mubr.msk.bf16.gmra.mrb[116].mxu0 %vm1389_vm2, %v5124_v60 }
 0x139   : > { %6133 = vst [vmem:[#allocation2_spill] sm:$0xff] %v5201_v37  ;;  %v5205_v38 = vpop.f32.mrb[38].mxu1  ;;  %4513 = vmatmul.mubr.msk.bf16.gmra.mrb[116].mxu1 %vm1389_vm2, %v5124_v60  ;;  %v5209_v39 = vpop.f32.mrb[39].mxu0  ;;  %1633 = vmatprep.mubr.bf16.mxu0 %v6131_v0 }
 0x13a   : > { %6134 = vst [vmem:[#allocation3_spill] sm:$0xff] %v5205_v38  ;;  %6135 = vst [vmem:[#allocation4_spill] sm:$0xff] %v5209_v39  ;;  %v5212_v41 = vpop.f32.mrb[39].mxu1  ;;  %1694 = vmatprep.mubr.bf16.mxu1 %v6131_v0 }
 0x13b   : > { %6136 = vst [vmem:[#allocation5_spill] sm:$0xff] %v5212_v41 }
 0x13e   : > { %v747_v42 = vpop.f32.mrb[40].mxu0 }
 0x13f   : > { %v830_v45 = vpop.f32.mrb[40].mxu1  ;;  %v749_v46 = vpop.f32.mrb[41].mxu0  ;;  %v1219_v50 = vmax.f32 %v747_v42, 0.0 }
 0x140   : > { %v832_v48 = vpop.f32.mrb[41].mxu1  ;;  %v751_v49 = vpop.f32.mrb[42].mxu0  ;;  %4510 = vmatmul.mubr.msk.bf16.gmra.mrb[120].mxu0 %vm1389_vm2, %v5151_v6  ;;  %v1221_v10 = vmax.f32 %v830_v45, 0.0  ;;  %v1220_v11 = vmax.f32 %v749_v46, 0.0 }
 0x141   : > { %v1239_v7 = vmax.f32 %v751_v49, 0.0  ;;  %v834_v8 = vpop.f32.mrb[42].mxu1  ;;  %4514 = vmatmul.mubr.msk.bf16.gmra.mrb[120].mxu1 %vm1389_vm2, %v5151_v6  ;;  %v753_v9 = vpop.f32.mrb[43].mxu0  ;;  %1735 = vmatprep.mubr.bf16.mxu0 %v6131_v0  ;;  %v1222_v16 = vmax.f32 %v832_v48, 0.0 }
 0x142   : > { %v1241_v12 = vmax.f32 %v834_v8, 0.0  ;;  %v1240_v13 = vmax.f32 %v753_v9, 0.0  ;;  %v836_v15 = vpop.f32.mrb[43].mxu1  ;;  %1796 = vmatprep.mubr.bf16.mxu1 %v6131_v0 }
 0x143   : > { %v1319_v19 = vpack.c.bf16 %v1239_v7, %v1219_v50  ;;  %v1242_v20 = vmax.f32 %v836_v15, 0.0 }
 0x144   : > { %v1321_v22 = vpack.c.bf16 %v1241_v12, %v1221_v10  ;;  %v1320_v23 = vpack.c.bf16 %v1240_v13, %v1220_v11 }
 0x145   : > { %v1322_v24 = vpack.c.bf16 %v1242_v20, %v1222_v16 }
 0x146   : > { %v757_v42 = vpop.f32.mrb[44].mxu0  ;;  %1703 = vmatprep.subr.bf16.mxu0 %v1320_v23 }
 0x147   : > { %v840_v49 = vpop.f32.mrb[44].mxu1  ;;  %1764 = vmatprep.subr.bf16.mxu1 %v1322_v24  ;;  %v759_v41 = vpop.f32.mrb[45].mxu0  ;;  %1704 = vmatpush1.bf16.msra.mxu0 %v1319_v19  ;;  %v1259_v46 = vmax.f32 %v757_v42, 0.0 }
 0x148   : > { %v842_v39 = vpop.f32.mrb[45].mxu1  ;;  %1765 = vmatpush1.bf16.msra.mxu1 %v1321_v22  ;;  %v761_v45 = vpop.f32.mrb[46].mxu0  ;;  %v1261_v0 = vmax.f32 %v840_v49, 0.0  ;;  %v1260_v48 = vmax.f32 %v759_v41, 0.0 }
 0x149   : > { %v1279_v8 = vmax.f32 %v761_v45, 0.0  ;;  %v844_v9 = vpop.f32.mrb[46].mxu1  ;;  %v763_v38 = vpop.f32.mrb[47].mxu0  ;;  %v1262_v11 = vmax.f32 %v842_v39, 0.0 }
 0x14a   : > { %v1281_v50 = vmax.f32 %v844_v9, 0.0  ;;  %v1280_v7 = vmax.f32 %v763_v38, 0.0  ;;  %v846_v10 = vpop.f32.mrb[47].mxu1 }
 0x14b   : > { %v1339_v12 = vpack.c.bf16 %v1279_v8, %v1259_v46  ;;  %v1282_v13 = vmax.f32 %v846_v10, 0.0 }
 0x14c   : > { %v1341_v15 = vpack.c.bf16 %v1281_v50, %v1261_v0  ;;  %v1340_v16 = vpack.c.bf16 %v1280_v7, %v1260_v48 }
 0x14d   : > { %v1342_v20 = vpack.c.bf16 %v1282_v13, %v1262_v11 }
 0x14e   : > { %v767_v23 = vpop.f32.mrb[48].mxu0  ;;  %1705 = vmatprep.subr.bf16.mxu0 %v1340_v16 }
 0x14f   : > { %v1299_v19 = vmax.f32 %v767_v23, 0.0  ;;  %v850_v22 = vpop.f32.mrb[48].mxu1  ;;  %1766 = vmatprep.subr.bf16.mxu1 %v1342_v20  ;;  %v769_v24 = vpop.f32.mrb[49].mxu0  ;;  %1706 = vmatpush1.bf16.msra.mxu0 %v1339_v12 }
 0x150   : > { %v1301_v42 = vmax.f32 %v850_v22, 0.0  ;;  %v1300_v45 = vmax.f32 %v769_v24, 0.0  ;;  %v852_v49 = vpop.f32.mrb[49].mxu1  ;;  %1767 = vmatpush1.bf16.msra.mxu1 %v1341_v15  ;;  %v5221_v41 = vpop.f32.mrb[50].mxu0 }
 0x151   : > { %6137 = vst [vmem:[#allocation6_spill] sm:$0xff] %v5221_v41  ;;  %v1359_v38 = vpack.c.bf16 %v1299_v19, %v1299_v19  ;;  %v1302_v39 = vmax.f32 %v852_v49, 0.0  ;;  %v5223_v46 = vpop.f32.mrb[50].mxu1  ;;  %v5225_v0 = vpop.f32.mrb[51].mxu0  ;;  %v6148_v19 = vmov 0  }
 0x152   : > { %6138 = vst [vmem:[#allocation7_spill] sm:$0xff] %v5223_v46  ;;  %6139 = vst [vmem:[#allocation8_spill] sm:$0xff] %v5225_v0  ;;  %v1361_v8 = vpack.c.bf16 %v1301_v42, %v1301_v42  ;;  %v1360_v9 = vpack.c.bf16 %v1300_v45, %v1300_v45  ;;  %v5227_v48 = vpop.f32.mrb[51].mxu1 }
 0x153   : > { %6140 = vst [vmem:[#allocation9_spill] sm:$0xff] %v5227_v48  ;;  %v1424_v50 = vsel %vm320_vm0, %v1359_v38, 0  ;;  %v1362_v7 = vpack.c.bf16 %v1302_v39, %v1302_v39 }
 0x154   : > { %v1430_v10 = vsel %vm320_vm0, %v1361_v8, 0  ;;  %4515 = vmatprep.subr.msk.bf16.mxu0 %vm320_vm0, %v1360_v9 }
 0x155   : > { %4519 = vmatprep.subr.msk.bf16.mxu1 %vm320_vm0, %v1362_v7  ;;  %1708 = vmatpush1.bf16.msra.mxu0 %v1424_v50 }
 0x156   : > { %1769 = vmatpush1.bf16.msra.mxu1 %v1430_v10  ;;  %v5233_v11 = vpop.f32.mrb[52].mxu0 }
 0x157   : > { %6141 = vst [vmem:[#allocation10_spill] sm:$0xff] %v5233_v11  ;;  %v5235_v12 = vpop.f32.mrb[52].mxu1  ;;  %v5237_v13 = vpop.f32.mrb[53].mxu0 }
 0x158   : > { %6142 = vst [vmem:[#allocation11_spill] sm:$0xff] %v5235_v12  ;;  %6143 = vst [vmem:[#allocation12_spill] sm:$0xff] %v5237_v13  ;;  %v5239_v15 = vpop.f32.mrb[53].mxu1  ;;  %v5241_v16 = vpop.f32.mrb[54].mxu0  ;;  %4516 = vmatmul.mubr.msk.bf16.vlgmr.msra.gmra.mrb[124].mxu0 %vm1389_vm2, %v5096_v51 }
 0x159   : > { %6144 = vst [vmem:[#allocation13_spill] sm:$0xff] %v5239_v15  ;;  %6145 = vst [vmem:[#allocation14_spill] sm:$0xff] %v5241_v16  ;;  %v5245_v20 = vpop.f32.mrb[54].mxu1  ;;  %4520 = vmatmul.mubr.msk.bf16.vlgmr.msra.gmra.mrb[124].mxu1 %vm1389_vm2, %v5096_v51  ;;  %v5249_v23 = vpop.f32.mrb[55].mxu0  ;;  %1745 = vmatprep.mubr.bf16.mxu0 %v6148_v19 }
 0x15a   : > { %6146 = vst [vmem:[#allocation15_spill] sm:$0xff] %v5245_v20  ;;  %6147 = vst [vmem:[#allocation16_spill] sm:$0xff] %v5249_v23  ;;  %v5252_v22 = vpop.f32.mrb[55].mxu1  ;;  %1806 = vmatprep.mubr.bf16.mxu1 %v6148_v19 }
 0x15b   : > { %6149 = vst [vmem:[#allocation17_spill] sm:$0xff] %v5252_v22 }
 0x15e   : > { %v5255_v24 = vpop.f32.mrb[56].mxu0 }
 0x15f   : > { %6150 = vst [vmem:[#allocation18_spill] sm:$0xff] %v5255_v24  ;;  %v5257_v42 = vpop.f32.mrb[56].mxu1  ;;  %v5259_v45 = vpop.f32.mrb[57].mxu0 }
 0x160   : > { %6151 = vst [vmem:[#allocation19_spill] sm:$0xff] %v5257_v42  ;;  %6152 = vst [vmem:[#allocation20_spill] sm:$0xff] %v5259_v45  ;;  %v5261_v49 = vpop.f32.mrb[57].mxu1  ;;  %v5263_v38 = vpop.f32.mrb[58].mxu0  ;;  %4517 = vmatmul.mubr.msk.bf16.gmra.mrb[128].mxu0 %vm1389_vm2, %v5124_v60 }
 0x161   : > { %6153 = vst [vmem:[#allocation21_spill] sm:$0xff] %v5261_v49  ;;  %6154 = vst [vmem:[#allocation22_spill] sm:$0xff] %v5263_v38  ;;  %v5267_v39 = vpop.f32.mrb[58].mxu1  ;;  %4521 = vmatmul.mubr.msk.bf16.gmra.mrb[128].mxu1 %vm1389_vm2, %v5124_v60  ;;  %v5271_v8 = vpop.f32.mrb[59].mxu0  ;;  %1755 = vmatprep.mubr.bf16.mxu0 %v6148_v19 }
 0x162   : > { %6155 = vst [vmem:[#allocation23_spill] sm:$0xff] %v5267_v39  ;;  %6156 = vst [vmem:[#allocation24_spill] sm:$0xff] %v5271_v8  ;;  %v5274_v9 = vpop.f32.mrb[59].mxu1  ;;  %1816 = vmatprep.mubr.bf16.mxu1 %v6148_v19 }
 0x163   : > { %6157 = vst [vmem:[#allocation25_spill] sm:$0xff] %v5274_v9 }
 0x166   : > { %v913_v50 = vpop.f32.mrb[60].mxu0 }
 0x167   : > { %v996_v7 = vpop.f32.mrb[60].mxu1  ;;  %v915_v10 = vpop.f32.mrb[61].mxu0  ;;  %v1223_v39 = vmax.f32 %v913_v50, 0.0 }
 0x168   : > { %v998_v38 = vpop.f32.mrb[61].mxu1  ;;  %v917_v49 = vpop.f32.mrb[62].mxu0  ;;  %4518 = vmatmul.mubr.msk.bf16.gmra.mrb[132].mxu0 %vm1389_vm2, %v5151_v6  ;;  %v1225_v9 = vmax.f32 %v996_v7, 0.0  ;;  %v1224_v24 = vmax.f32 %v915_v10, 0.0 }
 0x169   : > { %v1243_v45 = vmax.f32 %v917_v49, 0.0  ;;  %v1000_v42 = vpop.f32.mrb[62].mxu1  ;;  %4522 = vmatmul.mubr.msk.bf16.gmra.mrb[132].mxu1 %vm1389_vm2, %v5151_v6  ;;  %v919_v8 = vpop.f32.mrb[63].mxu0  ;;  %1857 = vmatprep.mubr.bf16.mxu0 %v6148_v19  ;;  %v1226_v16 = vmax.f32 %v998_v38, 0.0 }
 0x16a   : > { %v1245_v22 = vmax.f32 %v1000_v42, 0.0  ;;  %v1244_v23 = vmax.f32 %v919_v8, 0.0  ;;  %v1002_v20 = vpop.f32.mrb[63].mxu1  ;;  %1918 = vmatprep.mubr.bf16.mxu1 %v6148_v19 }
 0x16b   : > { %v1323_v15 = vpack.c.bf16 %v1243_v45, %v1223_v39  ;;  %v1246_v13 = vmax.f32 %v1002_v20, 0.0 }
 0x16c   : > { %v1325_v12 = vpack.c.bf16 %v1245_v22, %v1225_v9  ;;  %v1324_v50 = vpack.c.bf16 %v1244_v23, %v1224_v24 }
 0x16d   : > { %v1326_v49 = vpack.c.bf16 %v1246_v13, %v1226_v16 }
 0x16e   : > { %v923_v11 = vpop.f32.mrb[64].mxu0  ;;  %1825 = vmatprep.subr.bf16.mxu0 %v1324_v50 }
 0x16f   : > { %v1006_v48 = vpop.f32.mrb[64].mxu1  ;;  %1886 = vmatprep.subr.bf16.mxu1 %v1326_v49  ;;  %v925_v0 = vpop.f32.mrb[65].mxu0  ;;  %1826 = vmatpush1.bf16.msra.mxu0 %v1323_v15  ;;  %v1263_v42 = vmax.f32 %v923_v11, 0.0 }
 0x170   : > { %v1008_v46 = vpop.f32.mrb[65].mxu1  ;;  %1887 = vmatpush1.bf16.msra.mxu1 %v1325_v12  ;;  %v927_v7 = vpop.f32.mrb[66].mxu0  ;;  %v1265_v37 = vmax.f32 %v1006_v48, 0.0  ;;  %v1264_v38 = vmax.f32 %v925_v0, 0.0 }
 0x171   : > { %v1283_v8 = vmax.f32 %v927_v7, 0.0  ;;  %v1010_v10 = vpop.f32.mrb[66].mxu1  ;;  %v929_v41 = vpop.f32.mrb[67].mxu0  ;;  %v1266_v23 = vmax.f32 %v1008_v46, 0.0 }
 0x172   : > { %v1285_v45 = vmax.f32 %v1010_v10, 0.0  ;;  %v1284_v20 = vmax.f32 %v929_v41, 0.0  ;;  %v1012_v22 = vpop.f32.mrb[67].mxu1 }
 0x173   : > { %v1343_v13 = vpack.c.bf16 %v1283_v8, %v1263_v42  ;;  %v1286_v16 = vmax.f32 %v1012_v22, 0.0 }
 0x174   : > { %v1345_v24 = vpack.c.bf16 %v1285_v45, %v1265_v37  ;;  %v1344_v39 = vpack.c.bf16 %v1284_v20, %v1264_v38 }
 0x175   : > { %v1346_v9 = vpack.c.bf16 %v1286_v16, %v1266_v23 }
 0x176   : > { %v933_v50 = vpop.f32.mrb[68].mxu0  ;;  %1827 = vmatprep.subr.bf16.mxu0 %v1344_v39 }
 0x177   : > { %v1303_v15 = vmax.f32 %v933_v50, 0.0  ;;  %v1016_v12 = vpop.f32.mrb[68].mxu1  ;;  %1888 = vmatprep.subr.bf16.mxu1 %v1346_v9  ;;  %v935_v11 = vpop.f32.mrb[69].mxu0  ;;  %1828 = vmatpush1.bf16.msra.mxu0 %v1343_v13 }
 0x178   : > { %v1305_v49 = vmax.f32 %v1016_v12, 0.0  ;;  %v1304_v7 = vmax.f32 %v935_v11, 0.0  ;;  %v1018_v48 = vpop.f32.mrb[69].mxu1  ;;  %1889 = vmatpush1.bf16.msra.mxu1 %v1345_v24  ;;  %v5283_v0 = vpop.f32.mrb[70].mxu0 }
 0x179   : > { %6158 = vst [vmem:[#allocation26_spill] sm:$0xff] %v5283_v0  ;;  %v1363_v41 = vpack.c.bf16 %v1303_v15, %v1303_v15  ;;  %v1306_v46 = vmax.f32 %v1018_v48, 0.0  ;;  %v5285_v42 = vpop.f32.mrb[70].mxu1  ;;  %v5287_v37 = vpop.f32.mrb[71].mxu0 }
 0x17a   : > { %6159 = vst [vmem:[#allocation27_spill] sm:$0xff] %v5285_v42  ;;  %6160 = vst [vmem:[#allocation28_spill] sm:$0xff] %v5287_v37  ;;  %v1365_v8 = vpack.c.bf16 %v1305_v49, %v1305_v49  ;;  %v1364_v10 = vpack.c.bf16 %v1304_v7, %v1304_v7  ;;  %v5289_v38 = vpop.f32.mrb[71].mxu1 }
 0x17b   : > { %6161 = vst [vmem:[#allocation29_spill] sm:$0xff] %v5289_v38  ;;  %v1436_v45 = vsel %vm320_vm0, %v1363_v41, 0  ;;  %v1366_v20 = vpack.c.bf16 %v1306_v46, %v1306_v46 }
 0x17c   : > { %v1442_v22 = vsel %vm320_vm0, %v1365_v8, 0  ;;  %4523 = vmatprep.subr.msk.bf16.mxu0 %vm320_vm0, %v1364_v10 }
 0x17d   : > { %4527 = vmatprep.subr.msk.bf16.mxu1 %vm320_vm0, %v1366_v20  ;;  %1830 = vmatpush1.bf16.msra.mxu0 %v1436_v45 }
 0x17e   : > { %1891 = vmatpush1.bf16.msra.mxu1 %v1442_v22  ;;  %v5295_v23 = vpop.f32.mrb[72].mxu0 }
 0x17f   : > { %6162 = vst [vmem:[#allocation30_spill] sm:$0xff] %v5295_v23  ;;  %v5297_v13 = vpop.f32.mrb[72].mxu1  ;;  %v5299_v16 = vpop.f32.mrb[73].mxu0 }
 0x180   : > { %6163 = vst [vmem:[#allocation31_spill] sm:$0xff] %v5297_v13  ;;  %6164 = vst [vmem:[#allocation32_spill] sm:$0xff] %v5299_v16  ;;  %v5301_v24 = vpop.f32.mrb[73].mxu1  ;;  %v5303_v39 = vpop.f32.mrb[74].mxu0  ;;  %4524 = vmatmul.mubr.msk.bf16.vlgmr.msra.gmra.mrb[136].mxu0 %vm1389_vm2, %v5096_v51 }
 0x181   : > { %6165 = vst [vmem:[#allocation33_spill] sm:$0xff] %v5301_v24  ;;  %6166 = vst [vmem:[#allocation34_spill] sm:$0xff] %v5303_v39  ;;  %v5307_v9 = vpop.f32.mrb[74].mxu1  ;;  %4528 = vmatmul.mubr.msk.bf16.vlgmr.msra.gmra.mrb[136].mxu1 %vm1389_vm2, %v5096_v51  ;;  %v5311_v50 = vpop.f32.mrb[75].mxu0  ;;  %1867 = vmatprep.mubr.bf16.mxu0 %v6148_v19 }
 0x182   : > { %6167 = vst [vmem:[#allocation35_spill] sm:$0xff] %v5307_v9  ;;  %6168 = vst [vmem:[#allocation36_spill] sm:$0xff] %v5311_v50  ;;  %v5314_v15 = vpop.f32.mrb[75].mxu1  ;;  %1928 = vmatprep.mubr.bf16.mxu1 %v6148_v19 }
 0x183   : > { %6169 = vst [vmem:[#allocation37_spill] sm:$0xff] %v5314_v15 }
 0x186   : > { %v5317_v12 = vpop.f32.mrb[76].mxu0 }
 0x187   : > { %6170 = vst [vmem:[#allocation38_spill] sm:$0xff] %v5317_v12  ;;  %v5319_v11 = vpop.f32.mrb[76].mxu1  ;;  %v5321_v49 = vpop.f32.mrb[77].mxu0 }
 0x188   : > { %6171 = vst [vmem:[#allocation39_spill] sm:$0xff] %v5319_v11  ;;  %6172 = vst [vmem:[#allocation40_spill] sm:$0xff] %v5321_v49  ;;  %v5323_v7 = vpop.f32.mrb[77].mxu1  ;;  %v5325_v48 = vpop.f32.mrb[78].mxu0  ;;  %4525 = vmatmul.mubr.msk.bf16.gmra.mrb[140].mxu0 %vm1389_vm2, %v5124_v60 }
 0x189   : > { %6173 = vst [vmem:[#allocation41_spill] sm:$0xff] %v5323_v7  ;;  %6174 = vst [vmem:[#allocation42_spill] sm:$0xff] %v5325_v48  ;;  %v5329_v41 = vpop.f32.mrb[78].mxu1  ;;  %4529 = vmatmul.mubr.msk.bf16.gmra.mrb[140].mxu1 %vm1389_vm2, %v5124_v60  ;;  %v5333_v46 = vpop.f32.mrb[79].mxu0  ;;  %1877 = vmatprep.mubr.bf16.mxu0 %v6148_v19 }
 0x18a   : > { %6175 = vst [vmem:[#allocation43_spill] sm:$0xff] %v5329_v41  ;;  %6176 = vst [vmem:[#allocation44_spill] sm:$0xff] %v5333_v46  ;;  %v5336_v8 = vpop.f32.mrb[79].mxu1  ;;  %1938 = vmatprep.mubr.bf16.mxu1 %v6148_v19 }
 0x18b   : > { %6177 = vst [vmem:[#allocation45_spill] sm:$0xff] %v5336_v8 }
 0x18e   : > { %v1079_v10 = vpop.f32.mrb[80].mxu0 }
 0x18f   : > { %v1162_v45 = vpop.f32.mrb[80].mxu1  ;;  %v1081_v20 = vpop.f32.mrb[81].mxu0  ;;  %v1227_v41 = vmax.f32 %v1079_v10, 0.0 }
 0x190   : > { %v1164_v22 = vpop.f32.mrb[81].mxu1  ;;  %v1083_v48 = vpop.f32.mrb[82].mxu0  ;;  %4526 = vmatmul.mubr.msk.bf16.gmra.mrb[144].mxu0 %vm1389_vm2, %v5151_v6  ;;  %v1229_v8 = vmax.f32 %v1162_v45, 0.0  ;;  %v1228_v11 = vmax.f32 %v1081_v20, 0.0 }
 0x191   : > { %v1247_v7 = vmax.f32 %v1083_v48, 0.0  ;;  %v1166_v49 = vpop.f32.mrb[82].mxu1  ;;  %4530 = vmatmul.mubr.msk.bf16.gmra.mrb[144].mxu1 %vm1389_vm2, %v5151_v6  ;;  %v1085_v46 = vpop.f32.mrb[83].mxu0  ;;  %1979 = vmatprep.mubr.bf16.mxu0 %v6148_v19  ;;  %v1230_v9 = vmax.f32 %v1164_v22, 0.0 }
 0x192   : > { %v1249_v12 = vmax.f32 %v1166_v49, 0.0  ;;  %v1248_v15 = vmax.f32 %v1085_v46, 0.0  ;;  %v1168_v50 = vpop.f32.mrb[83].mxu1  ;;  %2040 = vmatprep.mubr.bf16.mxu1 %v6148_v19 }
 0x193   : > { %v1327_v39 = vpack.c.bf16 %v1247_v7, %v1227_v41  ;;  %v1250_v24 = vmax.f32 %v1168_v50, 0.0 }
 0x194   : > { %v1329_v16 = vpack.c.bf16 %v1249_v12, %v1229_v8  ;;  %v1328_v10 = vpack.c.bf16 %v1248_v15, %v1228_v11 }
 0x195   : > { %v1330_v48 = vpack.c.bf16 %v1250_v24, %v1230_v9 }
 0x196   : > { %v1089_v13 = vpop.f32.mrb[84].mxu0  ;;  %1947 = vmatprep.subr.bf16.mxu0 %v1328_v10 }
 0x197   : > { %v1172_v23 = vpop.f32.mrb[84].mxu1  ;;  %2008 = vmatprep.subr.bf16.mxu1 %v1330_v48  ;;  %v1091_v38 = vpop.f32.mrb[85].mxu0  ;;  %1948 = vmatpush1.bf16.msra.mxu0 %v1327_v39  ;;  %v1267_v49 = vmax.f32 %v1089_v13, 0.0 }
 0x198   : > { %v1174_v37 = vpop.f32.mrb[85].mxu1  ;;  %2009 = vmatpush1.bf16.msra.mxu1 %v1329_v16  ;;  %v1093_v45 = vpop.f32.mrb[86].mxu0  ;;  %v1269_v0 = vmax.f32 %v1172_v23, 0.0  ;;  %v1268_v22 = vmax.f32 %v1091_v38, 0.0 }
 0x199   : > { %v1287_v46 = vmax.f32 %v1093_v45, 0.0  ;;  %v1176_v20 = vpop.f32.mrb[86].mxu1  ;;  %v1095_v42 = vpop.f32.mrb[87].mxu0  ;;  %v1270_v15 = vmax.f32 %v1174_v37, 0.0 }
 0x19a   : > { %v1289_v7 = vmax.f32 %v1176_v20, 0.0  ;;  %v1288_v50 = vmax.f32 %v1095_v42, 0.0  ;;  %v1178_v12 = vpop.f32.mrb[87].mxu1 }
 0x19b   : > { %v1347_v24 = vpack.c.bf16 %v1287_v46, %v1267_v49  ;;  %v1290_v9 = vmax.f32 %v1178_v12, 0.0 }
 0x19c   : > { %v1349_v11 = vpack.c.bf16 %v1289_v7, %v1269_v0  ;;  %v1348_v41 = vpack.c.bf16 %v1288_v50, %v1268_v22 }
 0x19d   : > { %v1350_v8 = vpack.c.bf16 %v1290_v9, %v1270_v15 }
 0x19e   : > { %v1099_v10 = vpop.f32.mrb[88].mxu0  ;;  %1949 = vmatprep.subr.bf16.mxu0 %v1348_v41 }
 0x19f   : > { %v1307_v39 = vmax.f32 %v1099_v10, 0.0  ;;  %v1182_v16 = vpop.f32.mrb[88].mxu1  ;;  %2010 = vmatprep.subr.bf16.mxu1 %v1350_v8  ;;  %v1101_v13 = vpop.f32.mrb[89].mxu0  ;;  %1950 = vmatpush1.bf16.msra.mxu0 %v1347_v24 }
 0x1a0   : > { %v1309_v48 = vmax.f32 %v1182_v16, 0.0  ;;  %v1308_v45 = vmax.f32 %v1101_v13, 0.0  ;;  %v1184_v23 = vpop.f32.mrb[89].mxu1  ;;  %2011 = vmatpush1.bf16.msra.mxu1 %v1349_v11  ;;  %v5345_v38 = vpop.f32.mrb[90].mxu0 }
 0x1a1   : > { %6178 = vst [vmem:[#allocation46_spill] sm:$0xff] %v5345_v38  ;;  %v1367_v42 = vpack.c.bf16 %v1307_v39, %v1307_v39  ;;  %v1310_v37 = vmax.f32 %v1184_v23, 0.0  ;;  %v5347_v49 = vpop.f32.mrb[90].mxu1  ;;  %v5349_v0 = vpop.f32.mrb[91].mxu0 }
 0x1a2   : > { %6179 = vst [vmem:[#allocation47_spill] sm:$0xff] %v5347_v49  ;;  %6180 = vst [vmem:[#allocation48_spill] sm:$0xff] %v5349_v0  ;;  %v1369_v46 = vpack.c.bf16 %v1309_v48, %v1309_v48  ;;  %v1368_v20 = vpack.c.bf16 %v1308_v45, %v1308_v45  ;;  %v5351_v22 = vpop.f32.mrb[91].mxu1 }
 0x1a3   : > { %6181 = vst [vmem:[#allocation49_spill] sm:$0xff] %v5351_v22  ;;  %v1448_v7 = vsel %vm320_vm0, %v1367_v42, 0  ;;  %v1370_v50 = vpack.c.bf16 %v1310_v37, %v1310_v37 }
 0x1a4   : > { %v1454_v12 = vsel %vm320_vm0, %v1369_v46, 0  ;;  %4531 = vmatprep.subr.msk.bf16.mxu0 %vm320_vm0, %v1368_v20 }
 0x1a5   : > { %4535 = vmatprep.subr.msk.bf16.mxu1 %vm320_vm0, %v1370_v50  ;;  %1952 = vmatpush1.bf16.msra.mxu0 %v1448_v7 }
 0x1a6   : > { %2013 = vmatpush1.bf16.msra.mxu1 %v1454_v12  ;;  %v5357_v15 = vpop.f32.mrb[92].mxu0 }
 0x1a7   : > { %6182 = vst [vmem:[#allocation50_spill] sm:$0xff] %v5357_v15  ;;  %v5359_v24 = vpop.f32.mrb[92].mxu1  ;;  %v5361_v9 = vpop.f32.mrb[93].mxu0 }
 0x1a8   : > { %6183 = vst [vmem:[#allocation51_spill] sm:$0xff] %v5359_v24  ;;  %6184 = vst [vmem:[#allocation52_spill] sm:$0xff] %v5361_v9  ;;  %4532 = vmatmul.mubr.msk.bf16.vlgmr.msra.gmra.mrb[148].mxu0 %vm1389_vm2, %v5096_v51  ;;  %v5365_v11 = vpop.f32.mrb[93].mxu1  ;;  %v5367_v41 = vpop.f32.mrb[94].mxu0 }
 0x1a9   : > { %6185 = vst [vmem:[#allocation53_spill] sm:$0xff] %v5365_v11  ;;  %6186 = vst [vmem:[#allocation54_spill] sm:$0xff] %v5367_v41  ;;  %4536 = vmatmul.mubr.msk.bf16.vlgmr.msra.gmra.mrb[148].mxu1 %vm1389_vm2, %v5096_v51  ;;  %1989 = vmatprep.mubr.bf16.mxu0 %v6148_v19  ;;  %v5372_v8 = vpop.f32.mrb[94].mxu1  ;;  %v5374_v10 = vpop.f32.mrb[95].mxu0 }
 0x1aa   : > { %6187 = vst [vmem:[#allocation55_spill] sm:$0xff] %v5372_v8  ;;  %6188 = vst [vmem:[#allocation56_spill] sm:$0xff] %v5374_v10  ;;  %2050 = vmatprep.mubr.bf16.mxu1 %v6148_v19  ;;  %v5377_v39 = vpop.f32.mrb[95].mxu1 }
 0x1ab   : > { %6189 = vst [vmem:[#allocation57_spill] sm:$0xff] %v5377_v39 }
 0x1ae   : > { %v5379_v16 = vpop.f32.mrb[96].mxu0 }
 0x1af   : > { %6190 = vst [vmem:[#allocation58_spill] sm:$0xff] %v5379_v16  ;;  %v5381_v13 = vpop.f32.mrb[96].mxu1  ;;  %v5383_v48 = vpop.f32.mrb[97].mxu0 }
 0x1b0   : > { %6191 = vst [vmem:[#allocation59_spill] sm:$0xff] %v5381_v13  ;;  %6192 = vst [vmem:[#allocation60_spill] sm:$0xff] %v5383_v48  ;;  %4533 = vmatmul.mubr.msk.bf16.gmra.mrb[152].mxu0 %vm1389_vm2, %v5124_v60  ;;  %v5387_v51 = vpop.f32.mrb[97].mxu1  ;;  %v5389_v45 = vpop.f32.mrb[98].mxu0 }
 0x1b1   : > { %6193 = vst [vmem:[#allocation61_spill] sm:$0xff] %v5387_v51  ;;  %6194 = vst [vmem:[#allocation62_spill] sm:$0xff] %v5389_v45  ;;  %4537 = vmatmul.mubr.msk.bf16.gmra.mrb[152].mxu1 %vm1389_vm2, %v5124_v60  ;;  %1999 = vmatprep.mubr.bf16.mxu0 %v6148_v19  ;;  %v5394_v23 = vpop.f32.mrb[98].mxu1  ;;  %v5396_v42 = vpop.f32.mrb[99].mxu0 }
 0x1b2   : > { %6195 = vst [vmem:[#allocation63_spill] sm:$0xff] %v5394_v23  ;;  %6196 = vst [vmem:[#allocation64_spill] sm:$0xff] %v5396_v42  ;;  %2060 = vmatprep.mubr.bf16.mxu1 %v6148_v19  ;;  %v5399_v37 = vpop.f32.mrb[99].mxu1 }
 0x1b3   : > { %6197 = vst [vmem:[#allocation65_spill] sm:$0xff] %v5399_v37 }
 0x1b8   : > { %4534 = vmatmul.mubr.msk.bf16.gmra.mrb[156].mxu0 %vm1389_vm2, %v5151_v6 }
 0x1b9   : > { %4538 = vmatmul.mubr.msk.bf16.gmra.mrb[156].mxu1 %vm1389_vm2, %v5151_v6  ;;  %2351 = vmatprep.mubr.bf16.mxu0 %v6148_v19 }
 0x1ba   : > { %2414 = vmatprep.mubr.bf16.mxu1 %v6148_v19 }
 0x1db   : > { %v1493_v60 = vpop.f32.mrb[100].mxu0 }
 0x1dc   : > { %v2069_v46 = vmax.f32 %v1493_v60, 0.0  ;;  %v1554_v20 = vpop.f32.mrb[100].mxu1  ;;  %v1495_v7 = vpop.f32.mrb[101].mxu0 }
 0x1dd   : > { %v2071_v50 = vmax.f32 %v1554_v20, 0.0  ;;  %v2070_v12 = vmax.f32 %v1495_v7, 0.0  ;;  %v1556_v42 = vpop.f32.mrb[101].mxu1  ;;  %v1497_v23 = vpop.f32.mrb[102].mxu0 }
 0x1de   : > { %v2072_v45 = vmax.f32 %v1556_v42, 0.0  ;;  %v2089_v37 = vmax.f32 %v1497_v23, 0.0  ;;  %v1558_v51 = vpop.f32.mrb[102].mxu1  ;;  %v1499_v48 = vpop.f32.mrb[103].mxu0 }
 0x1df   : > { %v2091_v13 = vmax.f32 %v1558_v51, 0.0  ;;  %v2090_v16 = vmax.f32 %v1499_v48, 0.0  ;;  %v1560_v39 = vpop.f32.mrb[103].mxu1 }
 0x1e0   : > { %v2169_v6 = vpack.c.bf16 %v2089_v37, %v2069_v46  ;;  %v2092_v10 = vmax.f32 %v1560_v39, 0.0 }
 0x1e1   : > { %v2171_v8 = vpack.c.bf16 %v2091_v13, %v2071_v50  ;;  %v2170_v41 = vpack.c.bf16 %v2090_v16, %v2070_v12 }
 0x1e2   : > { %v2172_v11 = vpack.c.bf16 %v2092_v10, %v2072_v45 }
 0x1e3   : > { %v1503_v9 = vpop.f32.mrb[104].mxu0  ;;  %2319 = vmatprep.subr.bf16.mxu0 %v2170_v41 }
 0x1e4   : > { %v2109_v60 = vmax.f32 %v1503_v9, 0.0  ;;  %v1564_v24 = vpop.f32.mrb[104].mxu1  ;;  %v1505_v20 = vpop.f32.mrb[105].mxu0  ;;  %2382 = vmatprep.subr.bf16.mxu1 %v2172_v11  ;;  %2320 = vmatpush1.bf16.msra.mxu0 %v2169_v6 }
 0x1e5   : > { %v2111_v7 = vmax.f32 %v1564_v24, 0.0  ;;  %v2110_v42 = vmax.f32 %v1505_v20, 0.0  ;;  %v1566_v23 = vpop.f32.mrb[105].mxu1  ;;  %v1507_v15 = vpop.f32.mrb[106].mxu0  ;;  %2383 = vmatpush1.bf16.msra.mxu1 %v2171_v8 }
 0x1e6   : > { %v2112_v51 = vmax.f32 %v1566_v23, 0.0  ;;  %v2129_v48 = vmax.f32 %v1507_v15, 0.0  ;;  %v1568_v22 = vpop.f32.mrb[106].mxu1  ;;  %v1509_v37 = vpop.f32.mrb[107].mxu0 }
 0x1e7   : > { %v2131_v39 = vmax.f32 %v1568_v22, 0.0  ;;  %v2130_v13 = vmax.f32 %v1509_v37, 0.0  ;;  %v1570_v16 = vpop.f32.mrb[107].mxu1 }
 0x1e8   : > { %v2189_v10 = vpack.c.bf16 %v2129_v48, %v2109_v60  ;;  %v2132_v45 = vmax.f32 %v1570_v16, 0.0  ;;  %v5413_v16 = vld [vmem:[%s6128_s3] sm:$0xff]  }
 0x1e9   : > { %v2191_v41 = vpack.c.bf16 %v2131_v39, %v2111_v7  ;;  %v2190_v9 = vpack.c.bf16 %v2130_v13, %v2110_v42 }
 0x1ea   : > { %v2192_v46 = vpack.c.bf16 %v2132_v45, %v2112_v51  ;;  %v5436_v45 = vld [vmem:[%s6128_s3 + $0x10] sm:$0xff]  }
 0x1eb   : > { %v1513_v50 = vpop.f32.mrb[108].mxu0  ;;  %2321 = vmatprep.subr.bf16.mxu0 %v2190_v9 }
 0x1ec   : > { %v2149_v11 = vmax.f32 %v1513_v50, 0.0  ;;  %v1574_v24 = vpop.f32.mrb[108].mxu1  ;;  %v1515_v12 = vpop.f32.mrb[109].mxu0  ;;  %2384 = vmatprep.subr.bf16.mxu1 %v2192_v46  ;;  %2322 = vmatpush1.bf16.msra.mxu0 %v2189_v10  ;;  %v5425_v10 = vld [vmem:[%s6128_s3 + $0x8] sm:$0xff]  }
 0x1ed   : > { %v2151_v8 = vmax.f32 %v1574_v24, 0.0  ;;  %v2150_v6 = vmax.f32 %v1515_v12, 0.0  ;;  %v1576_v15 = vpop.f32.mrb[109].mxu1  ;;  %2385 = vmatpush1.bf16.msra.mxu1 %v2191_v41  ;;  %v1517_v20 = vpop.f32.mrb[110].mxu0 }
 0x1ee   : > { %v2209_v22 = vpack.c.bf16 %v2149_v11, %v2149_v11  ;;  %v2152_v23 = vmax.f32 %v1576_v15, 0.0  ;;  %v1578_v37 = vpop.f32.mrb[110].mxu1  ;;  %v1518_v60 = vpop.f32.mrb[111].mxu0 }
 0x1ef   : > { %v2211_v48 = vpack.c.bf16 %v2151_v8, %v2151_v8  ;;  %v2210_v7 = vpack.c.bf16 %v2150_v6, %v2150_v6  ;;  %v1579_v42 = vpop.f32.mrb[111].mxu1 }
 0x1f0   : > { %v2260_v51 = vsel %vm320_vm0, %v2209_v22, 0  ;;  %v2212_v39 = vpack.c.bf16 %v2152_v23, %v2152_v23 }
 0x1f1   : > { %v2266_v13 = vsel %vm320_vm0, %v2211_v48, 0  ;;  %4542 = vmatprep.subr.msk.bf16.mxu0 %vm320_vm0, %v2210_v7 }
 0x1f2   : > { %4546 = vmatprep.subr.msk.bf16.mxu1 %vm320_vm0, %v2212_v39  ;;  %2324 = vmatpush1.bf16.msra.mxu0 %v2260_v51 }
 0x1f3   : > { %2387 = vmatpush1.bf16.msra.mxu1 %v2266_v13 }
 0x1f5   : > { %4543 = vmatmul.mubr.msk.bf16.vlgmr.msra.gmra.mrb[160].mxu0 %vm1389_vm2, %v5413_v16 }
 0x1f6   : > { %4547 = vmatmul.mubr.msk.bf16.vlgmr.msra.gmra.mrb[160].mxu1 %vm1389_vm2, %v5413_v16  ;;  %2361 = vmatprep.mubr.bf16.mxu0 %v6148_v19 }
 0x1f7   : > { %2424 = vmatprep.mubr.bf16.mxu1 %v6148_v19 }
 0x1fd   : > { %4544 = vmatmul.mubr.msk.bf16.gmra.mrb[164].mxu0 %vm1389_vm2, %v5425_v10 }
 0x1fe   : > { %4548 = vmatmul.mubr.msk.bf16.gmra.mrb[164].mxu1 %vm1389_vm2, %v5425_v10  ;;  %2371 = vmatprep.mubr.bf16.mxu0 %v6148_v19 }
 0x1ff   : > { %2434 = vmatprep.mubr.bf16.mxu1 %v6148_v19 }
 0x203   : > { %v1615_v41 = vpop.f32.mrb[112].mxu0 }
 0x204   : > { %v2073_v9 = vmax.f32 %v1615_v41, 0.0  ;;  %v1676_v46 = vpop.f32.mrb[112].mxu1  ;;  %v1617_v50 = vpop.f32.mrb[113].mxu0 }
 0x205   : > { %4545 = vmatmul.mubr.msk.bf16.gmra.mrb[168].mxu0 %vm1389_vm2, %v5436_v45  ;;  %v2075_v11 = vmax.f32 %v1676_v46, 0.0  ;;  %v2074_v24 = vmax.f32 %v1617_v50, 0.0  ;;  %v1678_v12 = vpop.f32.mrb[113].mxu1  ;;  %v1619_v8 = vpop.f32.mrb[114].mxu0 }
 0x206   : > { %4549 = vmatmul.mubr.msk.bf16.gmra.mrb[168].mxu1 %vm1389_vm2, %v5436_v45  ;;  %v2076_v6 = vmax.f32 %v1678_v12, 0.0  ;;  %v2093_v15 = vmax.f32 %v1619_v8, 0.0  ;;  %v1680_v20 = vpop.f32.mrb[114].mxu1  ;;  %v1621_v22 = vpop.f32.mrb[115].mxu0  ;;  %2477 = vmatprep.mubr.bf16.mxu0 %v6148_v19 }
 0x207   : > { %v2095_v23 = vmax.f32 %v1680_v20, 0.0  ;;  %v2094_v37 = vmax.f32 %v1621_v22, 0.0  ;;  %v1682_v60 = vpop.f32.mrb[115].mxu1  ;;  %2540 = vmatprep.mubr.bf16.mxu1 %v6148_v19 }
 0x208   : > { %v2173_v48 = vpack.c.bf16 %v2093_v15, %v2073_v9  ;;  %v2096_v7 = vmax.f32 %v1682_v60, 0.0 }
 0x209   : > { %v2175_v42 = vpack.c.bf16 %v2095_v23, %v2075_v11  ;;  %v2174_v51 = vpack.c.bf16 %v2094_v37, %v2074_v24 }
 0x20a   : > { %v2176_v39 = vpack.c.bf16 %v2096_v7, %v2076_v6 }
 0x20b   : > { %v1625_v13 = vpop.f32.mrb[116].mxu0  ;;  %2445 = vmatprep.subr.bf16.mxu0 %v2174_v51 }
 0x20c   : > { %v2113_v41 = vmax.f32 %v1625_v13, 0.0  ;;  %v1686_v46 = vpop.f32.mrb[116].mxu1  ;;  %v1627_v50 = vpop.f32.mrb[117].mxu0  ;;  %2508 = vmatprep.subr.bf16.mxu1 %v2176_v39  ;;  %2446 = vmatpush1.bf16.msra.mxu0 %v2173_v48 }
 0x20d   : > { %v2115_v12 = vmax.f32 %v1686_v46, 0.0  ;;  %v2114_v8 = vmax.f32 %v1627_v50, 0.0  ;;  %v1688_v0 = vpop.f32.mrb[117].mxu1  ;;  %v1629_v20 = vpop.f32.mrb[118].mxu0  ;;  %2509 = vmatpush1.bf16.msra.mxu1 %v2175_v42 }
 0x20e   : > { %v2116_v22 = vmax.f32 %v1688_v0, 0.0  ;;  %v2133_v49 = vmax.f32 %v1629_v20, 0.0  ;;  %v1690_v38 = vpop.f32.mrb[118].mxu1  ;;  %v1631_v9 = vpop.f32.mrb[119].mxu0 }
 0x20f   : > { %v2135_v15 = vmax.f32 %v1690_v38, 0.0  ;;  %v2134_v11 = vmax.f32 %v1631_v9, 0.0  ;;  %v1692_v24 = vpop.f32.mrb[119].mxu1 }
 0x210   : > { %v2193_v6 = vpack.c.bf16 %v2133_v49, %v2113_v41  ;;  %v2136_v23 = vmax.f32 %v1692_v24, 0.0 }
 0x211   : > { %v2195_v37 = vpack.c.bf16 %v2135_v15, %v2115_v12  ;;  %v2194_v60 = vpack.c.bf16 %v2134_v11, %v2114_v8 }
 0x212   : > { %v2196_v7 = vpack.c.bf16 %v2136_v23, %v2116_v22 }
 0x213   : > { %v1635_v51 = vpop.f32.mrb[120].mxu0  ;;  %2447 = vmatprep.subr.bf16.mxu0 %v2194_v60 }
 0x214   : > { %v2153_v48 = vmax.f32 %v1635_v51, 0.0  ;;  %v1696_v39 = vpop.f32.mrb[120].mxu1  ;;  %v1637_v13 = vpop.f32.mrb[121].mxu0  ;;  %2510 = vmatprep.subr.bf16.mxu1 %v2196_v7  ;;  %2448 = vmatpush1.bf16.msra.mxu0 %v2193_v6 }
 0x215   : > { %v2155_v42 = vmax.f32 %v1696_v39, 0.0  ;;  %v2154_v0 = vmax.f32 %v1637_v13, 0.0  ;;  %v1698_v46 = vpop.f32.mrb[121].mxu1  ;;  %2511 = vmatpush1.bf16.msra.mxu1 %v2195_v37  ;;  %v1639_v50 = vpop.f32.mrb[122].mxu0 }
 0x216   : > { %v2213_v38 = vpack.c.bf16 %v2153_v48, %v2153_v48  ;;  %v2156_v20 = vmax.f32 %v1698_v46, 0.0  ;;  %v1700_v9 = vpop.f32.mrb[122].mxu1  ;;  %v1640_v49 = vpop.f32.mrb[123].mxu0 }
 0x217   : > { %v2215_v41 = vpack.c.bf16 %v2155_v42, %v2155_v42  ;;  %v2214_v12 = vpack.c.bf16 %v2154_v0, %v2154_v0  ;;  %v1701_v8 = vpop.f32.mrb[123].mxu1 }
 0x218   : > { %v2272_v22 = vsel %vm320_vm0, %v2213_v38, 0  ;;  %v2216_v15 = vpack.c.bf16 %v2156_v20, %v2156_v20 }
 0x219   : > { %v2278_v11 = vsel %vm320_vm0, %v2215_v41, 0  ;;  %4550 = vmatprep.subr.msk.bf16.mxu0 %vm320_vm0, %v2214_v12 }
 0x21a   : > { %4554 = vmatprep.subr.msk.bf16.mxu1 %vm320_vm0, %v2216_v15  ;;  %2450 = vmatpush1.bf16.msra.mxu0 %v2272_v22 }
 0x21b   : > { %2513 = vmatpush1.bf16.msra.mxu1 %v2278_v11 }
 0x21d   : > { %4551 = vmatmul.mubr.msk.bf16.vlgmr.msra.gmra.mrb[172].mxu0 %vm1389_vm2, %v5413_v16 }
 0x21e   : > { %4555 = vmatmul.mubr.msk.bf16.vlgmr.msra.gmra.mrb[172].mxu1 %vm1389_vm2, %v5413_v16  ;;  %2487 = vmatprep.mubr.bf16.mxu0 %v6148_v19 }
 0x21f   : > { %2550 = vmatprep.mubr.bf16.mxu1 %v6148_v19 }
 0x225   : > { %4552 = vmatmul.mubr.msk.bf16.gmra.mrb[176].mxu0 %vm1389_vm2, %v5425_v10 }
 0x226   : > { %4556 = vmatmul.mubr.msk.bf16.gmra.mrb[176].mxu1 %vm1389_vm2, %v5425_v10  ;;  %2497 = vmatprep.mubr.bf16.mxu0 %v6148_v19 }
 0x227   : > { %2560 = vmatprep.mubr.bf16.mxu1 %v6148_v19 }
 0x22b   : > { %v1737_v24 = vpop.f32.mrb[124].mxu0 }
 0x22c   : > { %v2077_v6 = vmax.f32 %v1737_v24, 0.0  ;;  %v1798_v23 = vpop.f32.mrb[124].mxu1  ;;  %v1739_v37 = vpop.f32.mrb[125].mxu0 }
 0x22d   : > { %4553 = vmatmul.mubr.msk.bf16.gmra.mrb[180].mxu0 %vm1389_vm2, %v5436_v45  ;;  %v2079_v60 = vmax.f32 %v1798_v23, 0.0  ;;  %v2078_v7 = vmax.f32 %v1739_v37, 0.0  ;;  %v1800_v51 = vpop.f32.mrb[125].mxu1  ;;  %v1741_v48 = vpop.f32.mrb[126].mxu0 }
 0x22e   : > { %4557 = vmatmul.mubr.msk.bf16.gmra.mrb[180].mxu1 %vm1389_vm2, %v5436_v45  ;;  %v2080_v39 = vmax.f32 %v1800_v51, 0.0  ;;  %v2097_v13 = vmax.f32 %v1741_v48, 0.0  ;;  %v1802_v42 = vpop.f32.mrb[126].mxu1  ;;  %v1743_v0 = vpop.f32.mrb[127].mxu0  ;;  %2603 = vmatprep.mubr.bf16.mxu0 %v6148_v19 }
 0x22f   : > { %v2099_v46 = vmax.f32 %v1802_v42, 0.0  ;;  %v2098_v50 = vmax.f32 %v1743_v0, 0.0  ;;  %v1804_v38 = vpop.f32.mrb[127].mxu1  ;;  %2666 = vmatprep.mubr.bf16.mxu1 %v6148_v19 }
 0x230   : > { %v2177_v20 = vpack.c.bf16 %v2097_v13, %v2077_v6  ;;  %v2100_v9 = vmax.f32 %v1804_v38, 0.0 }
 0x231   : > { %v2179_v49 = vpack.c.bf16 %v2099_v46, %v2079_v60  ;;  %v2178_v41 = vpack.c.bf16 %v2098_v50, %v2078_v7 }
 0x232   : > { %v2180_v12 = vpack.c.bf16 %v2100_v9, %v2080_v39 }
 0x233   : > { %v1747_v8 = vpop.f32.mrb[128].mxu0  ;;  %2571 = vmatprep.subr.bf16.mxu0 %v2178_v41 }
 0x234   : > { %v2117_v22 = vmax.f32 %v1747_v8, 0.0  ;;  %v1808_v15 = vpop.f32.mrb[128].mxu1  ;;  %v1749_v11 = vpop.f32.mrb[129].mxu0  ;;  %2634 = vmatprep.subr.bf16.mxu1 %v2180_v12  ;;  %2572 = vmatpush1.bf16.msra.mxu0 %v2177_v20 }
 0x235   : > { %v2119_v24 = vmax.f32 %v1808_v15, 0.0  ;;  %v2118_v23 = vmax.f32 %v1749_v11, 0.0  ;;  %v1810_v37 = vpop.f32.mrb[129].mxu1  ;;  %v1751_v51 = vpop.f32.mrb[130].mxu0  ;;  %2635 = vmatpush1.bf16.msra.mxu1 %v2179_v49 }
 0x236   : > { %v2120_v48 = vmax.f32 %v1810_v37, 0.0  ;;  %v2137_v42 = vmax.f32 %v1751_v51, 0.0  ;;  %v1812_v0 = vpop.f32.mrb[130].mxu1  ;;  %v1753_v6 = vpop.f32.mrb[131].mxu0 }
 0x237   : > { %v2139_v13 = vmax.f32 %v1812_v0, 0.0  ;;  %v2138_v60 = vmax.f32 %v1753_v6, 0.0  ;;  %v1814_v7 = vpop.f32.mrb[131].mxu1 }
 0x238   : > { %v2197_v39 = vpack.c.bf16 %v2137_v42, %v2117_v22  ;;  %v2140_v46 = vmax.f32 %v1814_v7, 0.0 }
 0x239   : > { %v2199_v50 = vpack.c.bf16 %v2139_v13, %v2119_v24  ;;  %v2198_v38 = vpack.c.bf16 %v2138_v60, %v2118_v23 }
 0x23a   : > { %v2200_v9 = vpack.c.bf16 %v2140_v46, %v2120_v48 }
 0x23b   : > { %v1757_v41 = vpop.f32.mrb[132].mxu0  ;;  %2573 = vmatprep.subr.bf16.mxu0 %v2198_v38 }
 0x23c   : > { %v2157_v20 = vmax.f32 %v1757_v41, 0.0  ;;  %v1818_v12 = vpop.f32.mrb[132].mxu1  ;;  %v1759_v8 = vpop.f32.mrb[133].mxu0  ;;  %2636 = vmatprep.subr.bf16.mxu1 %v2200_v9  ;;  %2574 = vmatpush1.bf16.msra.mxu0 %v2197_v39 }
 0x23d   : > { %v2159_v49 = vmax.f32 %v1818_v12, 0.0  ;;  %v2158_v15 = vmax.f32 %v1759_v8, 0.0  ;;  %v1820_v11 = vpop.f32.mrb[133].mxu1  ;;  %2637 = vmatpush1.bf16.msra.mxu1 %v2199_v50  ;;  %v1761_v37 = vpop.f32.mrb[134].mxu0 }
 0x23e   : > { %v2217_v51 = vpack.c.bf16 %v2157_v20, %v2157_v20  ;;  %v2160_v0 = vmax.f32 %v1820_v11, 0.0  ;;  %v1822_v6 = vpop.f32.mrb[134].mxu1  ;;  %v1762_v22 = vpop.f32.mrb[135].mxu0 }
 0x23f   : > { %v2219_v42 = vpack.c.bf16 %v2159_v49, %v2159_v49  ;;  %v2218_v24 = vpack.c.bf16 %v2158_v15, %v2158_v15  ;;  %v1823_v23 = vpop.f32.mrb[135].mxu1 }
 0x240   : > { %v2284_v48 = vsel %vm320_vm0, %v2217_v51, 0  ;;  %v2220_v13 = vpack.c.bf16 %v2160_v0, %v2160_v0 }
 0x241   : > { %v2290_v60 = vsel %vm320_vm0, %v2219_v42, 0  ;;  %4558 = vmatprep.subr.msk.bf16.mxu0 %vm320_vm0, %v2218_v24 }
 0x242   : > { %4562 = vmatprep.subr.msk.bf16.mxu1 %vm320_vm0, %v2220_v13  ;;  %2576 = vmatpush1.bf16.msra.mxu0 %v2284_v48 }
 0x243   : > { %2639 = vmatpush1.bf16.msra.mxu1 %v2290_v60 }
 0x245   : > { %4559 = vmatmul.mubr.msk.bf16.vlgmr.msra.gmra.mrb[184].mxu0 %vm1389_vm2, %v5413_v16 }
 0x246   : > { %4563 = vmatmul.mubr.msk.bf16.vlgmr.msra.gmra.mrb[184].mxu1 %vm1389_vm2, %v5413_v16  ;;  %2613 = vmatprep.mubr.bf16.mxu0 %v6148_v19 }
 0x247   : > { %2676 = vmatprep.mubr.bf16.mxu1 %v6148_v19 }
 0x24d   : > { %4560 = vmatmul.mubr.msk.bf16.gmra.mrb[188].mxu0 %vm1389_vm2, %v5425_v10 }
 0x24e   : > { %4564 = vmatmul.mubr.msk.bf16.gmra.mrb[188].mxu1 %vm1389_vm2, %v5425_v10  ;;  %2623 = vmatprep.mubr.bf16.mxu0 %v6148_v19 }
 0x24f   : > { %2686 = vmatprep.mubr.bf16.mxu1 %v6148_v19 }
 0x253   : > { %v1859_v7 = vpop.f32.mrb[136].mxu0 }
 0x254   : > { %v2081_v39 = vmax.f32 %v1859_v7, 0.0  ;;  %v1920_v46 = vpop.f32.mrb[136].mxu1  ;;  %v1861_v50 = vpop.f32.mrb[137].mxu0 }
 0x255   : > { %4561 = vmatmul.mubr.msk.bf16.gmra.mrb[192].mxu0 %vm1389_vm2, %v5436_v45  ;;  %v2083_v38 = vmax.f32 %v1920_v46, 0.0  ;;  %v2082_v9 = vmax.f32 %v1861_v50, 0.0  ;;  %v1922_v41 = vpop.f32.mrb[137].mxu1  ;;  %v1863_v20 = vpop.f32.mrb[138].mxu0 }
 0x256   : > { %4565 = vmatmul.mubr.msk.bf16.gmra.mrb[192].mxu1 %vm1389_vm2, %v5436_v45  ;;  %v2084_v12 = vmax.f32 %v1922_v41, 0.0  ;;  %v2101_v8 = vmax.f32 %v1863_v20, 0.0  ;;  %v1924_v49 = vpop.f32.mrb[138].mxu1  ;;  %v1865_v15 = vpop.f32.mrb[139].mxu0  ;;  %2729 = vmatprep.mubr.bf16.mxu0 %v6148_v19 }
 0x257   : > { %v2103_v11 = vmax.f32 %v1924_v49, 0.0  ;;  %v2102_v37 = vmax.f32 %v1865_v15, 0.0  ;;  %v1926_v51 = vpop.f32.mrb[139].mxu1  ;;  %2792 = vmatprep.mubr.bf16.mxu1 %v6148_v19 }
 0x258   : > { %v2181_v0 = vpack.c.bf16 %v2101_v8, %v2081_v39  ;;  %v2104_v6 = vmax.f32 %v1926_v51, 0.0 }
 0x259   : > { %v2183_v22 = vpack.c.bf16 %v2103_v11, %v2083_v38  ;;  %v2182_v42 = vpack.c.bf16 %v2102_v37, %v2082_v9 }
 0x25a   : > { %v2184_v24 = vpack.c.bf16 %v2104_v6, %v2084_v12 }
 0x25b   : > { %v1869_v23 = vpop.f32.mrb[140].mxu0  ;;  %2697 = vmatprep.subr.bf16.mxu0 %v2182_v42 }
 0x25c   : > { %v2121_v48 = vmax.f32 %v1869_v23, 0.0  ;;  %v1930_v13 = vpop.f32.mrb[140].mxu1  ;;  %v1871_v60 = vpop.f32.mrb[141].mxu0  ;;  %2760 = vmatprep.subr.bf16.mxu1 %v2184_v24  ;;  %2698 = vmatpush1.bf16.msra.mxu0 %v2181_v0 }
 0x25d   : > { %v2123_v7 = vmax.f32 %v1930_v13, 0.0  ;;  %v2122_v46 = vmax.f32 %v1871_v60, 0.0  ;;  %v1932_v50 = vpop.f32.mrb[141].mxu1  ;;  %v1873_v41 = vpop.f32.mrb[142].mxu0  ;;  %2761 = vmatpush1.bf16.msra.mxu1 %v2183_v22 }
 0x25e   : > { %v2124_v20 = vmax.f32 %v1932_v50, 0.0  ;;  %v2141_v49 = vmax.f32 %v1873_v41, 0.0  ;;  %v1934_v15 = vpop.f32.mrb[142].mxu1  ;;  %v1875_v39 = vpop.f32.mrb[143].mxu0 }
 0x25f   : > { %v2143_v8 = vmax.f32 %v1934_v15, 0.0  ;;  %v2142_v38 = vmax.f32 %v1875_v39, 0.0  ;;  %v1936_v9 = vpop.f32.mrb[143].mxu1 }
 0x260   : > { %v2201_v12 = vpack.c.bf16 %v2141_v49, %v2121_v48  ;;  %v2144_v11 = vmax.f32 %v1936_v9, 0.0 }
 0x261   : > { %v2203_v37 = vpack.c.bf16 %v2143_v8, %v2123_v7  ;;  %v2202_v51 = vpack.c.bf16 %v2142_v38, %v2122_v46 }
 0x262   : > { %v2204_v6 = vpack.c.bf16 %v2144_v11, %v2124_v20 }
 0x263   : > { %v1879_v42 = vpop.f32.mrb[144].mxu0  ;;  %2699 = vmatprep.subr.bf16.mxu0 %v2202_v51 }
 0x264   : > { %v2161_v0 = vmax.f32 %v1879_v42, 0.0  ;;  %v1940_v24 = vpop.f32.mrb[144].mxu1  ;;  %v1881_v23 = vpop.f32.mrb[145].mxu0  ;;  %2762 = vmatprep.subr.bf16.mxu1 %v2204_v6  ;;  %2700 = vmatpush1.bf16.msra.mxu0 %v2201_v12 }
 0x265   : > { %v2163_v22 = vmax.f32 %v1940_v24, 0.0  ;;  %v2162_v13 = vmax.f32 %v1881_v23, 0.0  ;;  %v1942_v60 = vpop.f32.mrb[145].mxu1  ;;  %2763 = vmatpush1.bf16.msra.mxu1 %v2203_v37  ;;  %v1883_v50 = vpop.f32.mrb[146].mxu0 }
 0x266   : > { %v2221_v41 = vpack.c.bf16 %v2161_v0, %v2161_v0  ;;  %v2164_v15 = vmax.f32 %v1942_v60, 0.0  ;;  %v1944_v39 = vpop.f32.mrb[146].mxu1  ;;  %v1884_v48 = vpop.f32.mrb[147].mxu0 }
 0x267   : > { %v2223_v49 = vpack.c.bf16 %v2163_v22, %v2163_v22  ;;  %v2222_v7 = vpack.c.bf16 %v2162_v13, %v2162_v13  ;;  %v1945_v46 = vpop.f32.mrb[147].mxu1 }
 0x268   : > { %v2296_v20 = vsel %vm320_vm0, %v2221_v41, 0  ;;  %v2224_v8 = vpack.c.bf16 %v2164_v15, %v2164_v15 }
 0x269   : > { %v2302_v38 = vsel %vm320_vm0, %v2223_v49, 0  ;;  %4566 = vmatprep.subr.msk.bf16.mxu0 %vm320_vm0, %v2222_v7 }
 0x26a   : > { %4570 = vmatprep.subr.msk.bf16.mxu1 %vm320_vm0, %v2224_v8  ;;  %2702 = vmatpush1.bf16.msra.mxu0 %v2296_v20 }
 0x26b   : > { %2765 = vmatpush1.bf16.msra.mxu1 %v2302_v38 }
 0x26d   : > { %4567 = vmatmul.mubr.msk.bf16.vlgmr.msra.gmra.mrb[196].mxu0 %vm1389_vm2, %v5413_v16 }
 0x26e   : > { %4571 = vmatmul.mubr.msk.bf16.vlgmr.msra.gmra.mrb[196].mxu1 %vm1389_vm2, %v5413_v16  ;;  %2739 = vmatprep.mubr.bf16.mxu0 %v6148_v19 }
 0x26f   : > { %2802 = vmatprep.mubr.bf16.mxu1 %v6148_v19 }
 0x275   : > { %4568 = vmatmul.mubr.msk.bf16.gmra.mrb[200].mxu0 %vm1389_vm2, %v5425_v10 }
 0x276   : > { %4572 = vmatmul.mubr.msk.bf16.gmra.mrb[200].mxu1 %vm1389_vm2, %v5425_v10  ;;  %2749 = vmatprep.mubr.bf16.mxu0 %v6148_v19 }
 0x277   : > { %2812 = vmatprep.mubr.bf16.mxu1 %v6148_v19 }
 0x27b   : > { %v1981_v9 = vpop.f32.mrb[148].mxu0 }
 0x27c   : > { %v2042_v12 = vpop.f32.mrb[148].mxu1  ;;  %v1983_v11 = vpop.f32.mrb[149].mxu0  ;;  %v2085_v6 = vmax.f32 %v1981_v9, 0.0 }
 0x27d   : > { %v2044_v37 = vpop.f32.mrb[149].mxu1  ;;  %v1985_v51 = vpop.f32.mrb[150].mxu0  ;;  %4569 = vmatmul.mubr.msk.bf16.gmra.mrb[204].mxu0 %vm1389_vm2, %v5436_v45  ;;  %v2087_v23 = vmax.f32 %v2042_v12, 0.0  ;;  %v2086_v22 = vmax.f32 %v1983_v11, 0.0 }
 0x27e   : > { %v2105_v42 = vmax.f32 %v1985_v51, 0.0  ;;  %v2046_v0 = vpop.f32.mrb[150].mxu1  ;;  %4573 = vmatmul.mubr.msk.bf16.gmra.mrb[204].mxu1 %vm1389_vm2, %v5436_v45  ;;  %v1987_v24 = vpop.f32.mrb[151].mxu0  ;;  %2855 = vmatprep.mubr.bf16.mxu0 %v6148_v19  ;;  %v2088_v41 = vmax.f32 %v2044_v37, 0.0 }
 0x27f   : > { %v2107_v13 = vmax.f32 %v2046_v0, 0.0  ;;  %v2106_v60 = vmax.f32 %v1987_v24, 0.0  ;;  %v2048_v50 = vpop.f32.mrb[151].mxu1  ;;  %2918 = vmatprep.mubr.bf16.mxu1 %v6148_v19 }
 0x280   : > { %v2185_v15 = vpack.c.bf16 %v2105_v42, %v2085_v6  ;;  %v2108_v39 = vmax.f32 %v2048_v50, 0.0 }
 0x281   : > { %v2187_v48 = vpack.c.bf16 %v2107_v13, %v2087_v23  ;;  %v2186_v49 = vpack.c.bf16 %v2106_v60, %v2086_v22 }
 0x282   : > { %v2188_v7 = vpack.c.bf16 %v2108_v39, %v2088_v41 }
 0x283   : > { %v1991_v46 = vpop.f32.mrb[152].mxu0  ;;  %2823 = vmatprep.subr.bf16.mxu0 %v2186_v49 }
 0x284   : > { %v2052_v20 = vpop.f32.mrb[152].mxu1  ;;  %2886 = vmatprep.subr.bf16.mxu1 %v2188_v7  ;;  %v1993_v8 = vpop.f32.mrb[153].mxu0  ;;  %2824 = vmatpush1.bf16.msra.mxu0 %v2185_v15  ;;  %v2125_v12 = vmax.f32 %v1991_v46, 0.0 }
 0x285   : > { %v2054_v38 = vpop.f32.mrb[153].mxu1  ;;  %2887 = vmatpush1.bf16.msra.mxu1 %v2187_v48  ;;  %v1995_v9 = vpop.f32.mrb[154].mxu0  ;;  %v2127_v24 = vmax.f32 %v2052_v20, 0.0  ;;  %v2126_v37 = vmax.f32 %v1993_v8, 0.0 }
 0x286   : > { %v2145_v11 = vmax.f32 %v1995_v9, 0.0  ;;  %v2056_v51 = vpop.f32.mrb[154].mxu1  ;;  %v1997_v0 = vpop.f32.mrb[155].mxu0  ;;  %v2128_v22 = vmax.f32 %v2054_v38, 0.0 }
 0x287   : > { %v2147_v6 = vmax.f32 %v2056_v51, 0.0  ;;  %v2146_v42 = vmax.f32 %v1997_v0, 0.0  ;;  %v2058_v23 = vpop.f32.mrb[155].mxu1 }
 0x288   : > { %v2205_v13 = vpack.c.bf16 %v2145_v11, %v2125_v12  ;;  %v2148_v60 = vmax.f32 %v2058_v23, 0.0 }
 0x289   : > { %v2207_v50 = vpack.c.bf16 %v2147_v6, %v2127_v24  ;;  %v2206_v41 = vpack.c.bf16 %v2146_v42, %v2126_v37 }
 0x28a   : > { %v2208_v39 = vpack.c.bf16 %v2148_v60, %v2128_v22 }
 0x28b   : > { %v2001_v49 = vpop.f32.mrb[156].mxu0  ;;  %2825 = vmatprep.subr.bf16.mxu0 %v2206_v41 }
 0x28c   : > { %v2165_v15 = vmax.f32 %v2001_v49, 0.0  ;;  %v2062_v48 = vpop.f32.mrb[156].mxu1  ;;  %2888 = vmatprep.subr.bf16.mxu1 %v2208_v39  ;;  %v2003_v7 = vpop.f32.mrb[157].mxu0  ;;  %2826 = vmatpush1.bf16.msra.mxu0 %v2205_v13 }
 0x28d   : > { %v2167_v46 = vmax.f32 %v2062_v48, 0.0  ;;  %v2166_v9 = vmax.f32 %v2003_v7, 0.0  ;;  %v2064_v20 = vpop.f32.mrb[157].mxu1  ;;  %2889 = vmatpush1.bf16.msra.mxu1 %v2207_v50  ;;  %v2005_v8 = vpop.f32.mrb[158].mxu0 }
 0x28e   : > { %v2225_v51 = vpack.c.bf16 %v2165_v15, %v2165_v15  ;;  %v2168_v0 = vmax.f32 %v2064_v20, 0.0  ;;  %v2066_v38 = vpop.f32.mrb[158].mxu1  ;;  %v2006_v12 = vpop.f32.mrb[159].mxu0 }
 0x28f   : > { %v2227_v11 = vpack.c.bf16 %v2167_v46, %v2167_v46  ;;  %v2226_v24 = vpack.c.bf16 %v2166_v9, %v2166_v9  ;;  %v2067_v37 = vpop.f32.mrb[159].mxu1 }
 0x290   : > { %v2308_v6 = vsel %vm320_vm0, %v2225_v51, 0  ;;  %v2228_v42 = vpack.c.bf16 %v2168_v0, %v2168_v0 }
 0x291   : > { %v2314_v23 = vsel %vm320_vm0, %v2227_v11, 0  ;;  %4574 = vmatprep.subr.msk.bf16.mxu0 %vm320_vm0, %v2226_v24 }
 0x292   : > { %4578 = vmatprep.subr.msk.bf16.mxu1 %vm320_vm0, %v2228_v42  ;;  %2828 = vmatpush1.bf16.msra.mxu0 %v2308_v6 }
 0x293   : > { %2891 = vmatpush1.bf16.msra.mxu1 %v2314_v23 }
 0x295   : > { %4575 = vmatmul.mubr.msk.bf16.vlgmr.msra.gmra.mrb[208].mxu0 %vm1389_vm2, %v5413_v16 }
 0x296   : > { %4579 = vmatmul.mubr.msk.bf16.vlgmr.msra.gmra.mrb[208].mxu1 %vm1389_vm2, %v5413_v16  ;;  %2865 = vmatprep.mubr.bf16.mxu0 %v6148_v19 }
 0x297   : > { %2928 = vmatprep.mubr.bf16.mxu1 %v6148_v19 }
 0x29d   : > { %4576 = vmatmul.mubr.msk.bf16.gmra.mrb[212].mxu0 %vm1389_vm2, %v5425_v10 }
 0x29e   : > { %4580 = vmatmul.mubr.msk.bf16.gmra.mrb[212].mxu1 %vm1389_vm2, %v5425_v10  ;;  %2875 = vmatprep.mubr.bf16.mxu0 %v6148_v19 }
 0x29f   : > { %2938 = vmatprep.mubr.bf16.mxu1 %v6148_v19 }
 0x2a5   : > { %4577 = vmatmul.mubr.msk.bf16.gmra.mrb[216].mxu0 %vm1389_vm2, %v5436_v45 }
 0x2a6   : > { %4581 = vmatmul.mubr.msk.bf16.gmra.mrb[216].mxu1 %vm1389_vm2, %v5436_v45  ;;  %3305 = vmatprep.mubr.bf16.mxu0 %v6148_v19 }
 0x2a7   : > { %3346 = vmatprep.mubr.bf16.mxu1 %v6148_v19 }
 0x2c8   : > { %v2353_v16 = vpop.f32.mrb[160].mxu0 }
 0x2c9   : > { %v2949_v22 = vadd.f32 %v2353_v16, %v5082_v40  ;;  %v2416_v13 = vpop.f32.mrb[160].mxu1  ;;  %v2355_v60 = vpop.f32.mrb[161].mxu0 }
 0x2ca   : > { %v2951_v10 = vadd.f32 %v2416_v13, %v5084_v43  ;;  %v2950_v50 = vadd.f32 %v2355_v60, %v5086_v44  ;;  %v2418_v41 = vpop.f32.mrb[161].mxu1  ;;  %v2357_v39 = vpop.f32.mrb[162].mxu0 }
 0x2cb   : > { %v2952_v49 = vadd.f32 %v2418_v41, %v5088_v47  ;;  %v2969_v15 = vadd.f32 %v2357_v39, %v5099_v52  ;;  %v2420_v45 = vpop.f32.mrb[162].mxu1  ;;  %v2359_v48 = vpop.f32.mrb[163].mxu0  ;;  %v3049_v40 = vmax.f32 %v2949_v22, 0.0 }
 0x2cc   : > { %v2971_v7 = vadd.f32 %v2420_v45, %v5101_v53  ;;  %v2970_v46 = vadd.f32 %v2359_v48, %v5103_v54  ;;  %v2422_v9 = vpop.f32.mrb[163].mxu1  ;;  %v3051_v43 = vmax.f32 %v2951_v10, 0.0  ;;  %v3050_v51 = vmax.f32 %v2950_v50, 0.0 }
 0x2cd   : > { %v3069_v20 = vmax.f32 %v2969_v15, 0.0  ;;  %v2972_v8 = vadd.f32 %v2422_v9, %v5105_v55  ;;  %v3052_v38 = vmax.f32 %v2952_v49, 0.0 }
 0x2ce   : > { %v3071_v44 = vmax.f32 %v2971_v7, 0.0  ;;  %v3070_v0 = vmax.f32 %v2970_v46, 0.0 }
 0x2cf   : > { %v3149_v12 = vpack.c.bf16 %v3069_v20, %v3049_v40  ;;  %v3072_v47 = vmax.f32 %v2972_v8, 0.0 }
 0x2d0   : > { %v3151_v11 = vpack.c.bf16 %v3071_v44, %v3051_v43  ;;  %v3150_v52 = vpack.c.bf16 %v3070_v0, %v3050_v51  ;;  %v2363_v24 = vpop.f32.mrb[164].mxu0 }
 0x2d1   : > { %v3152_v37 = vpack.c.bf16 %v3072_v47, %v3052_v38  ;;  %v2989_v53 = vadd.f32 %v2363_v24, %v5107_v56  ;;  %v2426_v6 = vpop.f32.mrb[164].mxu1  ;;  %v2365_v54 = vpop.f32.mrb[165].mxu0 }
 0x2d2   : > { %v2991_v42 = vadd.f32 %v2426_v6, %v5111_v57  ;;  %v2990_v23 = vadd.f32 %v2365_v54, %v5115_v58  ;;  %v2428_v55 = vpop.f32.mrb[165].mxu1  ;;  %v2367_v16 = vpop.f32.mrb[166].mxu0  ;;  %3273 = vmatprep.subr.bf16.mxu0 %v3150_v52 }
 0x2d3   : > { %v2992_v22 = vadd.f32 %v2428_v55, %v5118_v59  ;;  %v3009_v13 = vadd.f32 %v2367_v16, %v5126_v61  ;;  %v2430_v60 = vpop.f32.mrb[166].mxu1  ;;  %3314 = vmatprep.subr.bf16.mxu1 %v3152_v37  ;;  %v2369_v10 = vpop.f32.mrb[167].mxu0  ;;  %3274 = vmatpush1.bf16.msra.mxu0 %v3149_v12  ;;  %v3089_v57 = vmax.f32 %v2989_v53, 0.0 }
 0x2d4   : > { %v3011_v50 = vadd.f32 %v2430_v60, %v5128_v62  ;;  %v3010_v56 = vadd.f32 %v2369_v10, %v5130_v63  ;;  %v2432_v41 = vpop.f32.mrb[167].mxu1  ;;  %3315 = vmatpush1.bf16.msra.mxu1 %v3151_v11  ;;  %v3091_v49 = vmax.f32 %v2991_v42, 0.0  ;;  %v3090_v15 = vmax.f32 %v2990_v23, 0.0  ;;  %v5571_v10 = vld [vmem:[%s6129_s4] sm:$0xf] }
 0x2d5   : > { %v3109_v39 = vmax.f32 %v3009_v13, 0.0  ;;  %v3012_v58 = vadd.f32 %v2432_v41, %v5132_v1  ;;  %v3092_v48 = vmax.f32 %v2992_v22, 0.0 }
 0x2d6   : > { %v3111_v45 = vmax.f32 %v3011_v50, 0.0  ;;  %v3110_v59 = vmax.f32 %v3010_v56, 0.0 }
 0x2d7   : > { %v3169_v61 = vpack.c.bf16 %v3109_v39, %v3089_v57  ;;  %v3112_v7 = vmax.f32 %v3012_v58, 0.0  ;;  %v4240_v39 = vlaneseq  ;;  %v4818_v58 = vmov 1966171168  }
 0x2d8   : > { %v3171_v46 = vpack.c.bf16 %v3111_v45, %v3091_v49  ;;  %v3170_v9 = vpack.c.bf16 %v3110_v59, %v3090_v15  ;;  %v2373_v40 = vpop.f32.mrb[168].mxu0  ;;  %v4238_v49 = vunpack.c.l.s4 %v4818_v58 }
 0x2d9   : > { %v3172_v20 = vpack.c.bf16 %v3112_v7, %v3092_v48  ;;  %v3029_v62 = vadd.f32 %v2373_v40, %v5134_v2  ;;  %v2436_v63 = vpop.f32.mrb[168].mxu1  ;;  %v2375_v8 = vpop.f32.mrb[169].mxu0  ;;  %v4241_v7 = vshrl.u32 %v4240_v39, 7 }
 0x2da   : > { %v3031_v43 = vadd.f32 %v2436_v63, %v5138_v3  ;;  %v3030_v51 = vadd.f32 %v2375_v8, %v5142_v4  ;;  %v2438_v1 = vpop.f32.mrb[169].mxu1  ;;  %3275 = vmatprep.subr.bf16.mxu0 %v3170_v9  ;;  %v5551_v44 = vpop.f32.mrb[170].mxu0 }
 0x2db   : > { %v3129_v0 = vmax.f32 %v3029_v62, 0.0  ;;  %v3032_v38 = vadd.f32 %v2438_v1, %v5145_v5  ;;  %3316 = vmatprep.subr.bf16.mxu1 %v3172_v20  ;;  %3276 = vmatpush1.bf16.msra.mxu0 %v3169_v61  ;;  %v5554_v12 = vpop.f32.mrb[170].mxu1  ;;  %v5556_v47 = vpop.f32.mrb[171].mxu0  ;;  %v3913_v3 = vand.u32 2147483647, %v5551_v44  ;;  %v4239_v20 = vunpack.c.0.s8 %v4238_v49 }
 0x2dc   : > { %v3131_v2 = vmax.f32 %v3031_v43, 0.0  ;;  %v3130_v11 = vmax.f32 %v3030_v51, 0.0  ;;  %3317 = vmatpush1.bf16.msra.mxu1 %v3171_v46  ;;  %v5559_v52 = vpop.f32.mrb[171].mxu1  ;;  %v3915_v37 = vand.u32 2147483647, %v5554_v12  ;;  %v3853_v46 = vmax.f32 %v5551_v44, 0.0 }
 0x2dd   : > { %v3189_v4 = vpack.c.bf16 %v3129_v0, %v3129_v0  ;;  %v3132_v24 = vmax.f32 %v3032_v38, 0.0  ;;  %v3933_v5 = vsub.f32 0.0, %v3913_v3  ;;  %v3914_v22 = vand.u32 2147483647, %v5556_v47 }
 0x2de   : > { %v3191_v53 = vpack.c.bf16 %v3131_v2, %v3131_v2  ;;  %v3190_v6 = vpack.c.bf16 %v3130_v11, %v3130_v11  ;;  %v3935_v23 = vsub.f32 0.0, %v3915_v37  ;;  %v3916_v60 = vand.u32 2147483647, %v5559_v52 }
 0x2df   : > { %v3192_v54 = vpack.c.bf16 %v3132_v24, %v3132_v24  ;;  %v3214_v42 = vsel %vm320_vm0, %v3189_v4, 0  ;;  %v3953_v16 = vmul.f32 1.442695, %v3933_v5  ;;  %v3934_v50 = vsub.f32 0.0, %v3914_v22 }
 0x2e0   : > { %4582 = vmatprep.subr.msk.bf16.mxu0 %vm320_vm0, %v3190_v6  ;;  %v3220_v55 = vsel %vm320_vm0, %v3191_v53, 0  ;;  %v3957_v13 = vmul.f32 1.442695, %v3935_v23  ;;  %v3936_v56 = vsub.f32 0.0, %v3916_v60  ;;  %v3855_v62 = vmax.f32 %v5554_v12, 0.0 }
 0x2e1   : > { %4584 = vmatprep.subr.msk.bf16.mxu1 %vm320_vm0, %v3192_v54  ;;  %3278 = vmatpush1.bf16.msra.mxu0 %v3214_v42  ;;  %4648 = vpow2.f32 %v3953_v16  ;;  %v3955_v41 = vmul.f32 1.442695, %v3934_v50  ;;  %v3854_v8 = vmax.f32 %v5556_v47, 0.0  ;;  %v3856_v0 = vmax.f32 %v5559_v52, 0.0 }
 0x2e2   : > { %3319 = vmatpush1.bf16.msra.mxu1 %v3220_v55  ;;  %4650 = vpow2.f32 %v3957_v13  ;;  %v3959_v57 = vmul.f32 1.442695, %v3936_v56  ;;  %v5588_v6 = vsub.s32 %v4239_v20, %v4241_v7  ;;  %vm3873_vm5 = vcmp.ne.f32.partialorder %v5551_v44, %v5551_v44 }
 0x2e3   : > { %4652 = vpow2.f32 %v3955_v41  ;;  %vm3875_vm6 = vcmp.ne.f32.partialorder %v5554_v12, %v5554_v12  ;;  %vm3874_vm9 = vcmp.ne.f32.partialorder %v5556_v47, %v5556_v47  ;;  %vm3876_vm10 = vcmp.ne.f32.partialorder %v5559_v52, %v5559_v52 }
 0x2e4   : > { %4583 = vmatmul.mubr.msk.bf16.vlgmr.msra.gmra.mrb[220].mxu0 %vm1389_vm2, %v5571_v10  ;;  %4654 = vpow2.f32 %v3959_v57 }
 0x2e5   : > { %4585 = vmatmul.mubr.msk.bf16.vlgmr.msra.gmra.mrb[220].mxu1 %vm1389_vm2, %v5571_v10  ;;  %3387 = vmatprep.mubr.bf16.mxu0 %v6148_v19 }
 0x2e6   : > { %3428 = vmatprep.mubr.bf16.mxu1 %v6148_v19 }
 0x2eb   : > { %v4649_v15 = vpop.eup %4648 }
 0x2ec   : > { %v4651_v45 = vpop.eup %4650  ;;  %v3993_v59 = vadd.f32 1.0, %v4649_v15  ;;  %v3996_v48 = vmul.f32 -0.5, %v4649_v15  ;;  %v3999_v61 = vand.u32 2147483647, %v4649_v15 }
 0x2ed   : > { %v4011_v9 = vadd.f32 1.0, %v4651_v45  ;;  %v4014_v40 = vmul.f32 -0.5, %v4651_v45  ;;  %v4017_v63 = vand.u32 2147483647, %v4651_v45  ;;  %v4653_v43 = vpop.eup %4652 }
 0x2ee   : > { %4656 = vlog2.f32 %v3993_v59  ;;  %v3997_v51 = vadd.f32 1.0, %v3996_v48  ;;  %v4655_v2 = vpop.eup %4654  ;;  %vm5584_vm3 = vcmp.lt.f32.partialorder %v3999_v61, 0.0004427343  ;;  %v4002_v3 = vadd.f32 1.0, %v4653_v43 }
 0x2ef   : > { %4658 = vlog2.f32 %v4011_v9  ;;  %v4015_v1 = vadd.f32 1.0, %v4014_v40  ;;  %v4005_v4 = vmul.f32 -0.5, %v4653_v43  ;;  %v4008_v24 = vand.u32 2147483647, %v4653_v43 }
 0x2f0   : > { %v2479_v38 = vpop.f32.mrb[172].mxu0  ;;  %v4020_v5 = vadd.f32 1.0, %v4655_v2  ;;  %v4023_v54 = vmul.f32 -0.5, %v4655_v2  ;;  %v4026_v42 = vand.u32 2147483647, %v4655_v2  ;;  %4660 = vlog2.f32 %v4002_v3 }
 0x2f1   : > { %v2542_v37 = vpop.f32.mrb[172].mxu1  ;;  %v2481_v53 = vpop.f32.mrb[173].mxu0  ;;  %vm5590_vm4 = vcmp.lt.f32.partialorder %v4017_v63, 0.0004427343  ;;  %v4006_v22 = vadd.f32 1.0, %v4005_v4  ;;  %v2953_v13 = vadd.f32 %v2479_v38, %v5159_v14  ;;  %v3998_v56 = vmul.f32 %v4649_v15, %v3997_v51  ;;  %v6207_v15 = vld [vmem:[#allocation3_spill] sm:$0xff] }
 0x2f2   : > { %v2544_v23 = vpop.f32.mrb[173].mxu1  ;;  %v2483_v55 = vpop.f32.mrb[174].mxu0  ;;  %4662 = vlog2.f32 %v4020_v5  ;;  %v4024_v41 = vadd.f32 1.0, %v4023_v54  ;;  %v2955_v57 = vadd.f32 %v2542_v37, %v5161_v17  ;;  %v4016_v49 = vmul.f32 %v4651_v45, %v4015_v1 }
 0x2f3   : > { %v2546_v60 = vpop.f32.mrb[174].mxu1  ;;  %v2485_v50 = vpop.f32.mrb[175].mxu0  ;;  %vm5600_vm7 = vcmp.lt.f32.partialorder %v4008_v24, 0.0004427343  ;;  %v2954_v14 = vadd.f32 %v2481_v53, %v5163_v18  ;;  %v2956_v48 = vadd.f32 %v2544_v23, %v5165_v21  ;;  %v5606_v61 = vmul.f32 %v4653_v43, %v4006_v22 }
 0x2f4   : > { %v2548_v58 = vpop.f32.mrb[175].mxu1  ;;  %vm5608_vm8 = vcmp.lt.f32.partialorder %v4026_v42, 0.0004427343  ;;  %v2973_v17 = vadd.f32 %v2483_v55, %v5171_v25  ;;  %v2975_v7 = vadd.f32 %v2546_v60, %v5173_v26  ;;  %v5614_v9 = vmul.f32 %v4655_v2, %v4024_v41 }
 0x2f5   : > { %v3053_v45 = vmax.f32 %v2953_v13, 0.0  ;;  %v2974_v40 = vadd.f32 %v2485_v50, %v5175_v27  ;;  %v2976_v20 = vadd.f32 %v2548_v58, %v5177_v28  ;;  %v3055_v18 = vmax.f32 %v2955_v57, 0.0 }
 0x2f6   : > { %v3054_v21 = vmax.f32 %v2954_v14, 0.0  ;;  %v3073_v63 = vmax.f32 %v2973_v17, 0.0  ;;  %v3075_v43 = vmax.f32 %v2975_v7, 0.0  ;;  %v3056_v25 = vmax.f32 %v2956_v48, 0.0 }
 0x2f7   : > { %v3074_v26 = vmax.f32 %v2974_v40, 0.0  ;;  %v3076_v38 = vmax.f32 %v2976_v20, 0.0 }
 0x2f8   : > { %v2489_v51 = vpop.f32.mrb[176].mxu0  ;;  %v4657_v1 = vpop.eup %4656  ;;  %v3153_v24 = vpack.c.bf16 %v3073_v63, %v3053_v45  ;;  %v3155_v37 = vpack.c.bf16 %v3075_v43, %v3055_v18 }
 0x2f9   : > { %v2993_v2 = vadd.f32 %v2489_v51, %v5179_v29  ;;  %v2552_v27 = vpop.f32.mrb[176].mxu1  ;;  %v2491_v3 = vpop.f32.mrb[177].mxu0  ;;  %v3995_v4 = vmul.f32 0.6931472, %v4657_v1  ;;  %v3154_v23 = vpack.c.bf16 %v3074_v26, %v3054_v21  ;;  %v3156_v55 = vpack.c.bf16 %v3076_v38, %v3056_v25  ;;  %v6208_v38 = vld [vmem:[#allocation4_spill] sm:$0xff] }
 0x2fa   : > { %v4659_v28 = vpop.eup %4658  ;;  %v2995_v53 = vadd.f32 %v2552_v27, %v5183_v30  ;;  %v2554_v5 = vpop.f32.mrb[177].mxu1  ;;  %v2994_v41 = vadd.f32 %v2491_v3, %v5187_v31  ;;  %v6209_v27 = vld [vmem:[#allocation5_spill] sm:$0xff] }
 0x2fb   : > { %v2493_v54 = vpop.f32.mrb[178].mxu0  ;;  %v4013_v42 = vmul.f32 0.6931472, %v4659_v28  ;;  %v3093_v22 = vmax.f32 %v2993_v2, 0.0  ;;  %v2556_v13 = vpop.f32.mrb[178].mxu1  ;;  %v4001_v50 = vsel %vm5584_vm3, %v3998_v56, %v3995_v4  ;;  %v2996_v57 = vadd.f32 %v2554_v5, %v5190_v32  ;;  %3355 = vmatprep.subr.bf16.mxu0 %v3154_v23  ;;  %3396 = vmatprep.subr.bf16.mxu1 %v3156_v55 }
 0x2fc   : > { %v2495_v60 = vpop.f32.mrb[179].mxu0  ;;  %v3095_v29 = vmax.f32 %v2995_v53, 0.0  ;;  %v2558_v58 = vpop.f32.mrb[179].mxu1  ;;  %v4173_v30 = vadd.f32 %v4001_v50, %v3853_v46  ;;  %v3013_v17 = vadd.f32 %v2493_v54, %v5193_v33  ;;  %v3015_v7 = vadd.f32 %v2556_v13, %v5195_v34  ;;  %3356 = vmatpush1.bf16.msra.mxu0 %v3153_v24  ;;  %3397 = vmatpush1.bf16.msra.mxu1 %v3155_v37 }
 0x2fd   : > { %v4661_v14 = vpop.eup %4660  ;;  %v4019_v48 = vsel %vm5590_vm4, %v4016_v49, %v4013_v42  ;;  %v3094_v45 = vmax.f32 %v2994_v41, 0.0  ;;  %v3096_v32 = vmax.f32 %v2996_v57, 0.0  ;;  %v3014_v40 = vadd.f32 %v2495_v60, %v5197_v35  ;;  %v6206_v35 = vld [vmem:[#allocation2_spill] sm:$0xff] }
 0x2fe   : > { %v4663_v11 = vpop.eup %4662  ;;  %v4175_v56 = vadd.f32 %v4019_v48, %v3855_v62  ;;  %v4004_v31 = vmul.f32 0.6931472, %v4661_v14  ;;  %v4193_v46 = vsel %vm3873_vm5, %v5551_v44, %v4173_v30  ;;  %v3113_v49 = vmax.f32 %v3013_v17, 0.0 }
 0x2ff   : > { %v4022_v16 = vmul.f32 0.6931472, %v4663_v11  ;;  %v3115_v33 = vmax.f32 %v3015_v7, 0.0  ;;  %v3016_v20 = vadd.f32 %v2558_v58, %v5199_v36 }
 0x300   : > { %v4195_v34 = vsel %vm3875_vm6, %v5554_v12, %v4175_v56  ;;  %v4010_v62 = vsel %vm5600_vm7, %v5606_v61, %v4004_v31  ;;  %v2499_v18 = vpop.f32.mrb[180].mxu0  ;;  %v3173_v63 = vpack.c.bf16 %v3113_v49, %v3093_v22  ;;  %v3114_v61 = vmax.f32 %v3014_v40, 0.0 }
 0x301   : > { %v4174_v44 = vadd.f32 %v4010_v62, %v3854_v8  ;;  %v4028_v21 = vsel %vm5608_vm8, %v5614_v9, %v4022_v16  ;;  %v3175_v43 = vpack.c.bf16 %v3115_v33, %v3095_v29  ;;  %v2562_v51 = vpop.f32.mrb[180].mxu1  ;;  %v2501_v12 = vpop.f32.mrb[181].mxu0  ;;  %v3116_v1 = vmax.f32 %v3016_v20, 0.0 }
 0x302   : > { %v4176_v59 = vadd.f32 %v4028_v21, %v3856_v0  ;;  %v3033_v25 = vadd.f32 %v2499_v18, %v6206_v35  ;;  %v2564_v36 = vpop.f32.mrb[181].mxu1  ;;  %v5657_v26 = vpop.f32.mrb[182].mxu0  ;;  %v3035_v9 = vadd.f32 %v2562_v51, %v6207_v15  ;;  %v3034_v2 = vadd.f32 %v2501_v12, %v6208_v38  ;;  %v6210_v21 = vld [vmem:[#allocation6_spill] sm:$0xff]  ;;  %v6211_v35 = vld [vmem:[#allocation7_spill] sm:$0xff] }
 0x303   : > { %v4194_v8 = vsel %vm3874_vm9, %v5556_v47, %v4174_v44  ;;  %v3036_v3 = vadd.f32 %v2564_v36, %v6209_v27  ;;  %v5666_v28 = vpop.f32.mrb[182].mxu1  ;;  %v5668_v0 = vpop.f32.mrb[183].mxu0  ;;  %v3174_v37 = vpack.c.bf16 %v3114_v61, %v3094_v45  ;;  %v3176_v53 = vpack.c.bf16 %v3116_v1, %v3096_v32 }
 0x304   : > { %v4233_v4 = vcombine.low %v4193_v46, %v4194_v8  ;;  %v4196_v24 = vsel %vm3876_vm10, %v5559_v52, %v4176_v59  ;;  %v5674_v5 = vpop.f32.mrb[183].mxu1  ;;  %v3133_v54 = vmax.f32 %v3033_v25, 0.0  ;;  %v3135_v42 = vmax.f32 %v3035_v9, 0.0 }
 0x305   : > { %v4234_v47 = vcombine.low %v4195_v34, %v4196_v24  ;;  %v3134_v23 = vmax.f32 %v3034_v2, 0.0  ;;  %v3136_v22 = vmax.f32 %v3036_v3, 0.0  ;;  %3357 = vmatprep.subr.bf16.mxu0 %v3174_v37  ;;  %3398 = vmatprep.subr.bf16.mxu1 %v3176_v53  ;;  %v3917_v41 = vand.u32 2147483647, %v5657_v26 }
 0x306   : > { %v5677_v55 = vrot.slane %v4233_v4, %v5588_v6  ;;  %v3193_v60 = vpack.c.bf16 %v3133_v54, %v3133_v54  ;;  %3358 = vmatpush1.bf16.msra.mxu0 %v3173_v63  ;;  %v3195_v52 = vpack.c.bf16 %v3135_v42, %v3135_v42  ;;  %3399 = vmatpush1.bf16.msra.mxu1 %v3175_v43  ;;  %v3919_v58 = vand.u32 2147483647, %v5666_v28 }
 0x307   : > { %v5680_v13 = vrot.slane %v4234_v47, %v5588_v6  ;;  %v3194_v50 = vpack.c.bf16 %v3134_v23, %v3134_v23  ;;  %v3196_v29 = vpack.c.bf16 %v3136_v22, %v3136_v22  ;;  %v3937_v14 = vsub.f32 0.0, %v3917_v41 }
 0x308   : > { %v3918_v30 = vand.u32 2147483647, %v5668_v0  ;;  %v3939_v48 = vsub.f32 0.0, %v3919_v58  ;;  %v3920_v17 = vand.u32 2147483647, %v5674_v5  ;;  %v3226_v7 = vsel %vm320_vm0, %v3193_v60, 0 }
 0x309   : > { %v4265_v57 = vcombine.low %v5677_v55, %v5680_v13  ;;  %4586 = vmatprep.subr.msk.bf16.mxu0 %vm320_vm0, %v3194_v50  ;;  %4588 = vmatprep.subr.msk.bf16.mxu1 %vm320_vm0, %v3196_v29  ;;  %v3961_v11 = vmul.f32 1.442695, %v3937_v14  ;;  %v3232_v31 = vsel %vm320_vm0, %v3195_v52, 0  ;;  %v3857_v33 = vmax.f32 %v5657_v26, 0.0 }
 0x30a   : > { %v3938_v56 = vsub.f32 0.0, %v3918_v30  ;;  %3360 = vmatpush1.bf16.msra.mxu0 %v3226_v7  ;;  %v3965_v45 = vmul.f32 1.442695, %v3939_v48  ;;  %v3940_v32 = vsub.f32 0.0, %v3920_v17  ;;  %3401 = vmatpush1.bf16.msra.mxu1 %v3232_v31  ;;  %v3859_v34 = vmax.f32 %v5666_v28, 0.0  ;;  %v6218_v17 = vld [vmem:[#allocation8_spill] sm:$0xff] }
 0x30b   : > { %4664 = vpow2.f32 %v3961_v11  ;;  %v3858_v38 = vmax.f32 %v5668_v0, 0.0  ;;  %v3860_v37 = vmax.f32 %v5674_v5, 0.0  ;;  %vm3877_vm14 = vcmp.ne.f32.partialorder %v5657_v26, %v5657_v26  ;;  %v6221_v31 = vld [vmem:[#allocation9_spill] sm:$0xff] }
 0x30c   : > { %v3963_v46 = vmul.f32 1.442695, %v3938_v56  ;;  %4666 = vpow2.f32 %v3965_v45  ;;  %v3967_v16 = vmul.f32 1.442695, %v3940_v32  ;;  %vm3879_vm15 = vcmp.ne.f32.partialorder %v5666_v28, %v5666_v28  ;;  %v6222_v32 = vld [vmem:[#allocation10_spill] sm:$0xff]  ;;  %v6236_v56 = vld [vmem:[#allocation24_spill] sm:$0xff] }
 0x30d   : > { %4587 = vmatmul.mubr.msk.bf16.vlgmr.msra.gmra.mrb[224].mxu0 %vm1389_vm2, %v5571_v10  ;;  %4589 = vmatmul.mubr.msk.bf16.vlgmr.msra.gmra.mrb[224].mxu1 %vm1389_vm2, %v5571_v10  ;;  %vm3878_vm3 = vcmp.ne.f32.partialorder %v5668_v0, %v5668_v0  ;;  %vm3880_vm4 = vcmp.ne.f32.partialorder %v5674_v5, %v5674_v5 }
 0x30e   : > { %4668 = vpow2.f32 %v3963_v46  ;;  %3469 = vmatprep.mubr.bf16.mxu0 %v6148_v19  ;;  %3510 = vmatprep.mubr.bf16.mxu1 %v6148_v19 }
 0x30f   : > { %4670 = vpow2.f32 %v3967_v16  ;;  %v6223_v16 = vld [vmem:[#allocation11_spill] sm:$0xff] }
 0x315   : > { %v4665_v49 = vpop.eup %4664 }
 0x316   : > { %v4667_v40 = vpop.eup %4666  ;;  %v4029_v20 = vadd.f32 1.0, %v4665_v49  ;;  %v4032_v18 = vmul.f32 -0.5, %v4665_v49  ;;  %v4035_v44 = vand.u32 2147483647, %v4665_v49 }
 0x317   : > { %v4047_v59 = vadd.f32 1.0, %v4667_v40  ;;  %v4050_v61 = vmul.f32 -0.5, %v4667_v40  ;;  %v4053_v1 = vand.u32 2147483647, %v4667_v40 }
 0x318   : > { %v2605_v62 = vpop.f32.mrb[184].mxu0  ;;  %v4669_v12 = vpop.eup %4668  ;;  %4672 = vlog2.f32 %v4029_v20  ;;  %v4033_v9 = vadd.f32 1.0, %v4032_v18  ;;  %vm5708_vm11 = vcmp.lt.f32.partialorder %v4035_v44, 0.0004427343 }
 0x319   : > { %v5701_v63 = vadd.f32 %v2605_v62, %v6210_v21  ;;  %v2668_v43 = vpop.f32.mrb[184].mxu1  ;;  %v2607_v51 = vpop.f32.mrb[185].mxu0  ;;  %v4038_v2 = vadd.f32 1.0, %v4669_v12  ;;  %4674 = vlog2.f32 %v4047_v59  ;;  %v4051_v4 = vadd.f32 1.0, %v4050_v61  ;;  %v6224_v62 = vld [vmem:[#allocation12_spill] sm:$0xff] }
 0x31a   : > { %v5704_v25 = vadd.f32 %v2668_v43, %v6211_v35  ;;  %v2670_v36 = vpop.f32.mrb[185].mxu1  ;;  %v2609_v8 = vpop.f32.mrb[186].mxu0  ;;  %v4041_v24 = vmul.f32 -0.5, %v4669_v12  ;;  %v4044_v54 = vand.u32 2147483647, %v4669_v12  ;;  %v5712_v23 = vmul.f32 %v4665_v49, %v4033_v9 }
 0x31b   : > { %v4671_v15 = vpop.eup %4670  ;;  %v2672_v27 = vpop.f32.mrb[186].mxu1  ;;  %4676 = vlog2.f32 %v4038_v2  ;;  %vm5714_vm12 = vcmp.lt.f32.partialorder %v4053_v1, 0.0004427343  ;;  %v5718_v29 = vmul.f32 %v4667_v40, %v4051_v4  ;;  %v3057_v58 = vmax.f32 %v5701_v63, 0.0  ;;  %v6225_v63 = vld [vmem:[#allocation13_spill] sm:$0xff]  ;;  %v6228_v4 = vld [vmem:[#allocation16_spill] sm:$0xff] }
 0x31c   : > { %v2611_v3 = vpop.f32.mrb[187].mxu0  ;;  %v2674_v53 = vpop.f32.mrb[187].mxu1  ;;  %v4056_v42 = vadd.f32 1.0, %v4671_v15  ;;  %v4042_v60 = vadd.f32 1.0, %v4041_v24  ;;  %v4059_v50 = vmul.f32 -0.5, %v4671_v15  ;;  %v3059_v48 = vmax.f32 %v5704_v25, 0.0 }
 0x31d   : > { %v4062_v52 = vand.u32 2147483647, %v4671_v15  ;;  %vm5720_vm13 = vcmp.lt.f32.partialorder %v4044_v54, 0.0004427343  ;;  %v2958_v7 = vadd.f32 %v2607_v51, %v6218_v17  ;;  %v2960_v45 = vadd.f32 %v2670_v36, %v6221_v31  ;;  %v6226_v51 = vld [vmem:[#allocation14_spill] sm:$0xff] }
 0x31e   : > { %4678 = vlog2.f32 %v4056_v42  ;;  %v5727_v14 = vmul.f32 %v4669_v12, %v4042_v60  ;;  %v4060_v30 = vadd.f32 1.0, %v4059_v50  ;;  %v2977_v46 = vadd.f32 %v2609_v8, %v6222_v32 }
 0x31f   : > { %vm5733_vm1 = vcmp.lt.f32.partialorder %v4062_v52, 0.0004427343  ;;  %v2979_v49 = vadd.f32 %v2672_v27, %v6223_v16  ;;  %v2978_v40 = vadd.f32 %v2611_v3, %v6224_v62  ;;  %v3058_v21 = vmax.f32 %v2958_v7, 0.0  ;;  %v6229_v52 = vld [vmem:[#allocation17_spill] sm:$0xff] }
 0x320   : > { %v2615_v11 = vpop.f32.mrb[188].mxu0  ;;  %v5743_v44 = vmul.f32 %v4671_v15, %v4060_v30  ;;  %v2980_v43 = vadd.f32 %v2674_v53, %v6225_v63  ;;  %v3060_v1 = vmax.f32 %v2960_v45, 0.0  ;;  %v3077_v35 = vmax.f32 %v2977_v46, 0.0  ;;  %v6227_v15 = vld [vmem:[#allocation15_spill] sm:$0xff]  ;;  %v6233_v63 = vld [vmem:[#allocation21_spill] sm:$0xff] }
 0x321   : > { %v2678_v20 = vpop.f32.mrb[188].mxu1  ;;  %v2617_v18 = vpop.f32.mrb[189].mxu0  ;;  %v2997_v12 = vadd.f32 %v2615_v11, %v6226_v51  ;;  %v3079_v25 = vmax.f32 %v2979_v49, 0.0  ;;  %v3078_v36 = vmax.f32 %v2978_v40, 0.0  ;;  %v6230_v49 = vld [vmem:[#allocation18_spill] sm:$0xff]  ;;  %v6231_v40 = vld [vmem:[#allocation19_spill] sm:$0xff] }
 0x322   : > { %v2680_v59 = vpop.f32.mrb[189].mxu1  ;;  %v2619_v61 = vpop.f32.mrb[190].mxu0  ;;  %v3080_v2 = vmax.f32 %v2980_v43, 0.0  ;;  %v2999_v3 = vadd.f32 %v2678_v20, %v6227_v15  ;;  %v2998_v24 = vadd.f32 %v2617_v18, %v6228_v4  ;;  %v3157_v42 = vpack.c.bf16 %v3077_v35, %v3057_v58  ;;  %v6232_v18 = vld [vmem:[#allocation20_spill] sm:$0xff] }
 0x323   : > { %v2682_v8 = vpop.f32.mrb[190].mxu1  ;;  %v2621_v9 = vpop.f32.mrb[191].mxu0  ;;  %v3097_v27 = vmax.f32 %v2997_v12, 0.0  ;;  %v3159_v60 = vpack.c.bf16 %v3079_v25, %v3059_v48  ;;  %v3158_v50 = vpack.c.bf16 %v3078_v36, %v3058_v21  ;;  %v3000_v30 = vadd.f32 %v2680_v59, %v6229_v52 }
 0x324   : > { %v2684_v53 = vpop.f32.mrb[191].mxu1  ;;  %v4673_v54 = vpop.eup %4672  ;;  %v3160_v11 = vpack.c.bf16 %v3080_v2, %v3060_v1  ;;  %v3099_v31 = vmax.f32 %v2999_v3, 0.0  ;;  %v3098_v45 = vmax.f32 %v2998_v24, 0.0  ;;  %v3017_v62 = vadd.f32 %v2619_v61, %v6230_v49 }
 0x325   : > { %v4675_v17 = vpop.eup %4674  ;;  %v4031_v7 = vmul.f32 0.6931472, %v4673_v54  ;;  %v3100_v16 = vmax.f32 %v3000_v30, 0.0  ;;  %v3019_v20 = vadd.f32 %v2682_v8, %v6231_v40  ;;  %3437 = vmatprep.subr.bf16.mxu0 %v3158_v50  ;;  %v3018_v21 = vadd.f32 %v2621_v9, %v6232_v18  ;;  %v6234_v54 = vld [vmem:[#allocation22_spill] sm:$0xff]  ;;  %v6237_v30 = vld [vmem:[#allocation25_spill] sm:$0xff] }
 0x326   : > { %v4677_v32 = vpop.eup %4676  ;;  %v4049_v46 = vmul.f32 0.6931472, %v4675_v17  ;;  %3478 = vmatprep.subr.bf16.mxu1 %v3160_v11  ;;  %v3020_v43 = vadd.f32 %v2684_v53, %v6233_v63  ;;  %3438 = vmatpush1.bf16.msra.mxu0 %v3157_v42  ;;  %v3117_v1 = vmax.f32 %v3017_v62, 0.0 }
 0x327   : > { %v4037_v58 = vsel %vm5708_vm11, %v5712_v23, %v4031_v7  ;;  %v4040_v48 = vmul.f32 0.6931472, %v4677_v32  ;;  %v3119_v35 = vmax.f32 %v3019_v20, 0.0  ;;  %3479 = vmatpush1.bf16.msra.mxu1 %v3159_v60  ;;  %v3118_v9 = vmax.f32 %v3018_v21, 0.0  ;;  %v6235_v60 = vld [vmem:[#allocation23_spill] sm:$0xff] }
 0x328   : > { %v2625_v51 = vpop.f32.mrb[192].mxu0  ;;  %v4679_v12 = vpop.eup %4678  ;;  %v4177_v59 = vadd.f32 %v4037_v58, %v3857_v33  ;;  %v4055_v61 = vsel %vm5714_vm12, %v5718_v29, %v4049_v46  ;;  %v3177_v15 = vpack.c.bf16 %v3117_v1, %v3097_v27  ;;  %v4273_v21 = vrot.slane %v4265_v57, %v5588_v6 }
 0x329   : > { %v2688_v47 = vpop.f32.mrb[192].mxu1  ;;  %v2627_v23 = vpop.f32.mrb[193].mxu0  ;;  %v4179_v25 = vadd.f32 %v4055_v61, %v3859_v34  ;;  %v4046_v36 = vsel %vm5720_vm13, %v5727_v14, %v4040_v48  ;;  %v4058_v8 = vmul.f32 0.6931472, %v4679_v12  ;;  %v3179_v3 = vpack.c.bf16 %v3119_v35, %v3099_v31 }
 0x32a   : > { %v2690_v2 = vpop.f32.mrb[193].mxu1  ;;  %v5769_v33 = vpop.f32.mrb[194].mxu0  ;;  %v4197_v22 = vsel %vm3877_vm14, %v5657_v26, %v4177_v59  ;;  %v4178_v29 = vadd.f32 %v4046_v36, %v3858_v38  ;;  %v3178_v24 = vpack.c.bf16 %v3118_v9, %v3098_v45  ;;  %v3120_v26 = vmax.f32 %v3020_v43, 0.0 }
 0x32b   : > { %v5777_v34 = vpop.f32.mrb[194].mxu1  ;;  %v5779_v4 = vpop.f32.mrb[195].mxu0  ;;  %v4199_v41 = vsel %vm3879_vm15, %v5666_v28, %v4179_v25  ;;  %v4064_v14 = vsel %vm5733_vm1, %v5743_v44, %v4058_v8  ;;  %v3037_v42 = vadd.f32 %v2625_v51, %v6234_v54  ;;  %v3039_v28 = vadd.f32 %v2688_v47, %v6235_v60 }
 0x32c   : > { %v5788_v53 = vpop.f32.mrb[195].mxu1  ;;  %v4198_v38 = vsel %vm3878_vm3, %v5668_v0, %v4178_v29  ;;  %v4180_v27 = vadd.f32 %v4064_v14, %v3860_v37  ;;  %v3180_v52 = vpack.c.bf16 %v3120_v26, %v3100_v16  ;;  %v3038_v44 = vadd.f32 %v2627_v23, %v6236_v56  ;;  %3439 = vmatprep.subr.bf16.mxu0 %v3178_v24  ;;  %v6239_v14 = vld [vmem:[#allocation27_spill] sm:$0xff] }
 0x32d   : > { %v4235_v50 = vcombine.low %v4197_v22, %v4198_v38  ;;  %v3040_v17 = vadd.f32 %v2690_v2, %v6237_v30  ;;  %v3137_v0 = vmax.f32 %v3037_v42, 0.0  ;;  %v3139_v11 = vmax.f32 %v3039_v28, 0.0  ;;  %3440 = vmatpush1.bf16.msra.mxu0 %v3177_v15  ;;  %v6238_v2 = vld [vmem:[#allocation26_spill] sm:$0xff]  ;;  %v6240_v42 = vld [vmem:[#allocation28_spill] sm:$0xff]  ;;  %v6241_v28 = vld [vmem:[#allocation29_spill] sm:$0xff] }
 0x32e   : > { %v4200_v7 = vsel %vm3880_vm4, %v5674_v5, %v4180_v27  ;;  %v3138_v45 = vmax.f32 %v3038_v44, 0.0  ;;  %3480 = vmatprep.subr.bf16.mxu1 %v3180_v52  ;;  %v3921_v16 = vand.u32 2147483647, %v5769_v33  ;;  %v3923_v58 = vand.u32 2147483647, %v5777_v34  ;;  %v6242_v52 = vld [vmem:[#allocation30_spill] sm:$0xff] }
 0x32f   : > { %v4257_v37 = vrot.slane %v4235_v50, %v5588_v6  ;;  %v4236_v31 = vcombine.low %v4199_v41, %v4200_v7  ;;  %v3140_v32 = vmax.f32 %v3040_v17, 0.0  ;;  %v3197_v46 = vpack.c.bf16 %v3137_v0, %v3137_v0  ;;  %3481 = vmatpush1.bf16.msra.mxu1 %v3179_v3 }
 0x330   : > { %v3199_v62 = vpack.c.bf16 %v3139_v11, %v3139_v11  ;;  %v3198_v40 = vpack.c.bf16 %v3138_v45, %v3138_v45  ;;  %v3941_v5 = vsub.f32 0.0, %v3921_v16  ;;  %v3922_v18 = vand.u32 2147483647, %v5779_v4 }
 0x331   : > { %v4264_v49 = vrot.slane %v4236_v31, %v5588_v6  ;;  %v3200_v20 = vpack.c.bf16 %v3140_v32, %v3140_v32  ;;  %v3943_v43 = vsub.f32 0.0, %v3923_v58  ;;  %v3924_v51 = vand.u32 2147483647, %v5788_v53 }
 0x332   : > { %4590 = vmatprep.subr.msk.bf16.mxu0 %vm320_vm0, %v3198_v40  ;;  %v3969_v63 = vmul.f32 1.442695, %v3941_v5  ;;  %v3942_v59 = vsub.f32 0.0, %v3922_v18  ;;  %v3238_v61 = vsel %vm320_vm0, %v3197_v46, 0  ;;  %v3244_v1 = vsel %vm320_vm0, %v3199_v62, 0 }
 0x333   : > { %v4266_v48 = vcombine.low %v4257_v37, %v4264_v49  ;;  %4592 = vmatprep.subr.msk.bf16.mxu1 %vm320_vm0, %v3200_v20  ;;  %v3973_v55 = vmul.f32 1.442695, %v3943_v43  ;;  %v3944_v13 = vsub.f32 0.0, %v3924_v51  ;;  %3442 = vmatpush1.bf16.msra.mxu0 %v3238_v61  ;;  %v3861_v36 = vmax.f32 %v5769_v33, 0.0 }
 0x334   : > { %4680 = vpow2.f32 %v3969_v63  ;;  %3483 = vmatpush1.bf16.msra.mxu1 %v3244_v1  ;;  %v3971_v35 = vmul.f32 1.442695, %v3942_v59  ;;  %v3863_v8 = vmax.f32 %v5777_v34, 0.0  ;;  %v3862_v9 = vmax.f32 %v5779_v4, 0.0 }
 0x335   : > { %v4280_v12 = vrot.slane %v4266_v48, %v5588_v6  ;;  %4682 = vpow2.f32 %v3973_v55  ;;  %v3975_v47 = vmul.f32 1.442695, %v3944_v13  ;;  %v3864_v54 = vmax.f32 %v5788_v53, 0.0 }
 0x336   : > { %4684 = vpow2.f32 %v3971_v35  ;;  %4591 = vmatmul.mubr.msk.bf16.vlgmr.msra.gmra.mrb[228].mxu0 %vm1389_vm2, %v5571_v10  ;;  %vm3881_vm9 = vcmp.ne.f32.partialorder %v5769_v33, %v5769_v33  ;;  %vm3883_vm10 = vcmp.ne.f32.partialorder %v5777_v34, %v5777_v34  ;;  %vm3882_vm11 = vcmp.ne.f32.partialorder %v5779_v4, %v5779_v4 }
 0x337   : > { %v4281_v57 = vcombine.low %v4273_v21, %v4280_v12  ;;  %4593 = vmatmul.mubr.msk.bf16.vlgmr.msra.gmra.mrb[228].mxu1 %vm1389_vm2, %v5571_v10  ;;  %4686 = vpow2.f32 %v3975_v47  ;;  %3551 = vmatprep.mubr.bf16.mxu0 %v6148_v19  ;;  %vm3884_vm12 = vcmp.ne.f32.partialorder %v5788_v53, %v5788_v53  ;;  %v6263_v12 = vld [vmem:[#allocation43_spill] sm:$0xff] }
 0x338   : > { %3592 = vmatprep.mubr.bf16.mxu1 %v6148_v19 }
 0x339   : > { %4622 = vst [vmem:[%s5823_s28 + $0x3] ss:$4 sm:$0xff] %v4281_v57  ;;  %v6264_v57 = vld [vmem:[#allocation44_spill] sm:$0xff] }
 0x33e   : > { %v4681_v25 = vpop.eup %4680 }
 0x33f   : > { %v4065_v3 = vadd.f32 1.0, %v4681_v25  ;;  %v4068_v41 = vmul.f32 -0.5, %v4681_v25  ;;  %v4071_v10 = vand.u32 2147483647, %v4681_v25  ;;  %v4683_v27 = vpop.eup %4682 }
 0x340   : > { %v2731_v23 = vpop.f32.mrb[196].mxu0  ;;  %v4685_v17 = vpop.eup %4684  ;;  %v4083_v0 = vadd.f32 1.0, %v4683_v27  ;;  %v4086_v45 = vmul.f32 -0.5, %v4683_v27  ;;  %v4089_v32 = vand.u32 2147483647, %v4683_v27 }
 0x341   : > { %v2961_v22 = vadd.f32 %v2731_v23, %v6238_v2  ;;  %v2794_v29 = vpop.f32.mrb[196].mxu1  ;;  %v2733_v15 = vpop.f32.mrb[197].mxu0  ;;  %4688 = vlog2.f32 %v4065_v3  ;;  %v4069_v7 = vadd.f32 1.0, %v4068_v41  ;;  %v4074_v46 = vadd.f32 1.0, %v4685_v17  ;;  %v6254_v41 = vld [vmem:[#allocation34_spill] sm:$0xff] }
 0x342   : > { %v5837_v24 = vadd.f32 %v2794_v29, %v6239_v14  ;;  %v2796_v26 = vpop.f32.mrb[197].mxu1  ;;  %v2735_v38 = vpop.f32.mrb[198].mxu0  ;;  %v5841_v60 = vadd.f32 %v2733_v15, %v6240_v42  ;;  %v4077_v16 = vmul.f32 -0.5, %v4685_v17  ;;  %vm5847_vm5 = vcmp.lt.f32.partialorder %v4071_v10, 0.0004427343  ;;  %v6253_v15 = vld [vmem:[#allocation33_spill] sm:$0xff] }
 0x343   : > { %v5844_v50 = vadd.f32 %v2796_v26, %v6241_v28  ;;  %v2981_v56 = vadd.f32 %v2735_v38, %v6242_v52  ;;  %v2798_v44 = vpop.f32.mrb[198].mxu1  ;;  %v2737_v30 = vpop.f32.mrb[199].mxu0  ;;  %v3061_v11 = vmax.f32 %v2961_v22, 0.0  ;;  %4690 = vlog2.f32 %v4083_v0  ;;  %v6252_v22 = vld [vmem:[#allocation32_spill] sm:$0xff] }
 0x344   : > { %v2800_v37 = vpop.f32.mrb[199].mxu1  ;;  %v4687_v31 = vpop.eup %4686  ;;  %v4080_v62 = vand.u32 2147483647, %v4685_v17  ;;  %v5851_v20 = vmul.f32 %v4681_v25, %v4069_v7  ;;  %v4087_v5 = vadd.f32 1.0, %v4086_v45  ;;  %4692 = vlog2.f32 %v4074_v46  ;;  %v6251_v25 = vld [vmem:[#allocation31_spill] sm:$0xff]  ;;  %v6258_v45 = vld [vmem:[#allocation38_spill] sm:$0xff] }
 0x345   : > { %v4092_v40 = vadd.f32 1.0, %v4687_v31  ;;  %v4078_v58 = vadd.f32 1.0, %v4077_v16  ;;  %vm5853_vm6 = vcmp.lt.f32.partialorder %v4089_v32, 0.0004427343  ;;  %v4095_v18 = vmul.f32 -0.5, %v4687_v31 }
 0x346   : > { %v4098_v21 = vand.u32 2147483647, %v4687_v31  ;;  %v5857_v43 = vmul.f32 %v4683_v27, %v4087_v5  ;;  %vm5861_vm7 = vcmp.lt.f32.partialorder %v4080_v62, 0.0004427343  ;;  %v3063_v59 = vmax.f32 %v5837_v24, 0.0  ;;  %v6255_v27 = vld [vmem:[#allocation35_spill] sm:$0xff] }
 0x347   : > { %4694 = vlog2.f32 %v4092_v40  ;;  %v5859_v51 = vmul.f32 %v4685_v17, %v4078_v58  ;;  %v3062_v61 = vmax.f32 %v5841_v60, 0.0  ;;  %v4096_v13 = vadd.f32 1.0, %v4095_v18  ;;  %v6256_v60 = vld [vmem:[#allocation36_spill] sm:$0xff] }
 0x348   : > { %v2741_v63 = vpop.f32.mrb[200].mxu0  ;;  %vm5867_vm8 = vcmp.lt.f32.partialorder %v4098_v21, 0.0004427343  ;;  %v3064_v35 = vmax.f32 %v5844_v50, 0.0  ;;  %v3081_v47 = vmax.f32 %v2981_v56, 0.0  ;;  %v2983_v2 = vadd.f32 %v2798_v44, %v6251_v25  ;;  %v6259_v21 = vld [vmem:[#allocation39_spill] sm:$0xff] }
 0x349   : > { %v2804_v1 = vpop.f32.mrb[200].mxu1  ;;  %v2743_v55 = vpop.f32.mrb[201].mxu0  ;;  %v2982_v29 = vadd.f32 %v2737_v30, %v6252_v22  ;;  %v2984_v3 = vadd.f32 %v2800_v37, %v6253_v15  ;;  %v3001_v10 = vadd.f32 %v2741_v63, %v6254_v41  ;;  %v5878_v26 = vmul.f32 %v4687_v31, %v4096_v13 }
 0x34a   : > { %v2806_v23 = vpop.f32.mrb[201].mxu1  ;;  %v2745_v14 = vpop.f32.mrb[202].mxu0  ;;  %v3161_v38 = vpack.c.bf16 %v3081_v47, %v3061_v11  ;;  %v3003_v42 = vadd.f32 %v2804_v1, %v6255_v27  ;;  %v3002_v28 = vadd.f32 %v2743_v55, %v6256_v60  ;;  %v3083_v56 = vmax.f32 %v2983_v2, 0.0  ;;  %v6257_v11 = vld [vmem:[#allocation37_spill] sm:$0xff]  ;;  %v6260_v1 = vld [vmem:[#allocation40_spill] sm:$0xff] }
 0x34b   : > { %v2808_v24 = vpop.f32.mrb[202].mxu1  ;;  %v2747_v50 = vpop.f32.mrb[203].mxu0  ;;  %v3082_v44 = vmax.f32 %v2982_v29, 0.0  ;;  %v3084_v30 = vmax.f32 %v2984_v3, 0.0  ;;  %v3101_v17 = vmax.f32 %v3001_v10, 0.0  ;;  %v3004_v31 = vadd.f32 %v2806_v23, %v6257_v11  ;;  %v6261_v2 = vld [vmem:[#allocation41_spill] sm:$0xff] }
 0x34c   : > { %v2810_v52 = vpop.f32.mrb[203].mxu1  ;;  %v4689_v7 = vpop.eup %4688  ;;  %v3103_v0 = vmax.f32 %v3003_v42, 0.0  ;;  %v3102_v37 = vmax.f32 %v3002_v28, 0.0  ;;  %v3021_v32 = vadd.f32 %v2745_v14, %v6258_v45  ;;  %v3163_v16 = vpack.c.bf16 %v3083_v56, %v3063_v59 }
 0x34d   : > { %v4067_v46 = vmul.f32 0.6931472, %v4689_v7  ;;  %v3162_v62 = vpack.c.bf16 %v3082_v44, %v3062_v61  ;;  %v3164_v40 = vpack.c.bf16 %v3084_v30, %v3064_v35  ;;  %v4691_v5 = vpop.eup %4690  ;;  %v3104_v58 = vmax.f32 %v3004_v31, 0.0  ;;  %v6262_v61 = vld [vmem:[#allocation42_spill] sm:$0xff] }
 0x34e   : > { %v3121_v18 = vmax.f32 %v3021_v32, 0.0  ;;  %v3023_v63 = vadd.f32 %v2808_v24, %v6259_v21  ;;  %v3022_v55 = vadd.f32 %v2747_v50, %v6260_v1  ;;  %v4693_v47 = vpop.eup %4692  ;;  %v4085_v25 = vmul.f32 0.6931472, %v4691_v5 }
 0x34f   : > { %v4073_v23 = vsel %vm5847_vm5, %v5851_v20, %v4067_v46  ;;  %3519 = vmatprep.subr.bf16.mxu0 %v3162_v62  ;;  %3560 = vmatprep.subr.bf16.mxu1 %v3164_v40  ;;  %v3024_v59 = vadd.f32 %v2810_v52, %v6261_v2  ;;  %v4076_v41 = vmul.f32 0.6931472, %v4693_v47 }
 0x350   : > { %v2751_v13 = vpop.f32.mrb[204].mxu0  ;;  %v4181_v3 = vadd.f32 %v4073_v23, %v3861_v36  ;;  %v3181_v10 = vpack.c.bf16 %v3121_v18, %v3101_v17  ;;  %v3123_v14 = vmax.f32 %v3023_v63, 0.0  ;;  %3520 = vmatpush1.bf16.msra.mxu0 %v3161_v38  ;;  %3561 = vmatpush1.bf16.msra.mxu1 %v3163_v16  ;;  %v4091_v24 = vsel %vm5853_vm6, %v5857_v43, %v4085_v25 }
 0x351   : > { %v3041_v35 = vadd.f32 %v2751_v13, %v6262_v61  ;;  %v2814_v22 = vpop.f32.mrb[204].mxu1  ;;  %v2753_v29 = vpop.f32.mrb[205].mxu0  ;;  %v3122_v42 = vmax.f32 %v3022_v55, 0.0  ;;  %v3124_v60 = vmax.f32 %v3024_v59, 0.0  ;;  %v4183_v38 = vadd.f32 %v4091_v24, %v3863_v8 }
 0x352   : > { %v4695_v15 = vpop.eup %4694  ;;  %v2816_v49 = vpop.f32.mrb[205].mxu1  ;;  %v4201_v36 = vsel %vm3881_vm9, %v5769_v33, %v4181_v3  ;;  %v4082_v48 = vsel %vm5861_vm7, %v5859_v51, %v4076_v41  ;;  %v3183_v43 = vpack.c.bf16 %v3123_v14, %v3103_v0  ;;  %v3043_v7 = vadd.f32 %v2814_v22, %v6263_v12  ;;  %v6265_v0 = vld [vmem:[#allocation45_spill] sm:$0xff]  ;;  %v5960_v22 = vld [vmem:[%s6129_s4] sm:$0xf] }
 0x353   : > { %v5899_v20 = vpop.f32.mrb[206].mxu0  ;;  %v4094_v27 = vmul.f32 0.6931472, %v4695_v15  ;;  %v5904_v28 = vpop.f32.mrb[206].mxu1  ;;  %v4182_v56 = vadd.f32 %v4082_v48, %v3862_v9  ;;  %v3182_v30 = vpack.c.bf16 %v3122_v42, %v3102_v37  ;;  %v3184_v17 = vpack.c.bf16 %v3124_v60, %v3104_v58  ;;  %v6266_v3 = vld [vmem:[#allocation46_spill] sm:$0xff]  ;;  %v6267_v42 = vld [vmem:[#allocation47_spill] sm:$0xff] }
 0x354   : > { %v5906_v50 = vpop.f32.mrb[207].mxu0  ;;  %v5917_v52 = vpop.f32.mrb[207].mxu1  ;;  %v4203_v33 = vsel %vm3883_vm10, %v5777_v34, %v4183_v38  ;;  %v3141_v51 = vmax.f32 %v3041_v35, 0.0  ;;  %v3044_v37 = vadd.f32 %v2816_v49, %v6265_v0  ;;  %v3925_v16 = vand.u32 2147483647, %v5899_v20  ;;  %v6269_v12 = vld [vmem:[#allocation49_spill] sm:$0xff] }
 0x355   : > { %v4100_v44 = vsel %vm5867_vm8, %v5878_v26, %v4094_v27  ;;  %v4202_v9 = vsel %vm3882_vm11, %v5779_v4, %v4182_v56  ;;  %v3042_v26 = vadd.f32 %v2753_v29, %v6264_v57  ;;  %3521 = vmatprep.subr.bf16.mxu0 %v3182_v30  ;;  %3562 = vmatprep.subr.bf16.mxu1 %v3184_v17  ;;  %v3926_v63 = vand.u32 2147483647, %v5906_v50 }
 0x356   : > { %v4184_v8 = vadd.f32 %v4100_v44, %v3864_v54  ;;  %v4282_v11 = vcombine.low %v4201_v36, %v4202_v9  ;;  %v3143_v54 = vmax.f32 %v3043_v7, 0.0  ;;  %3522 = vmatpush1.bf16.msra.mxu0 %v3181_v10  ;;  %3563 = vmatpush1.bf16.msra.mxu1 %v3183_v43  ;;  %v3144_v32 = vmax.f32 %v3044_v37, 0.0  ;;  %v6268_v36 = vld [vmem:[#allocation48_spill] sm:$0xff]  ;;  %v6270_v9 = vld [vmem:[#allocation50_spill] sm:$0xff] }
 0x357   : > { %v3142_v45 = vmax.f32 %v3042_v26, 0.0  ;;  %v3201_v46 = vpack.c.bf16 %v3141_v51, %v3141_v51  ;;  %v3945_v18 = vsub.f32 0.0, %v3925_v16  ;;  %v3928_v13 = vand.u32 2147483647, %v5917_v52 }
 0x358   : > { %v4204_v34 = vsel %vm3884_vm12, %v5788_v53, %v4184_v8  ;;  %v5942_v4 = vrot.slane %v4282_v11, %v5588_v6  ;;  %v3203_v40 = vpack.c.bf16 %v3143_v54, %v3143_v54  ;;  %v3204_v58 = vpack.c.bf16 %v3144_v32, %v3144_v32 }
 0x359   : > { %v4283_v31 = vcombine.low %v4203_v33, %v4204_v34  ;;  %v3202_v5 = vpack.c.bf16 %v3142_v45, %v3142_v45  ;;  %v3927_v53 = vand.u32 2147483647, %v5904_v28  ;;  %v3977_v1 = vmul.f32 1.442695, %v3945_v18 }
 0x35a   : > { %4596 = vmatprep.subr.msk.bf16.mxu1 %vm320_vm0, %v3204_v58  ;;  %v3250_v47 = vsel %vm320_vm0, %v3201_v46, 0  ;;  %v3946_v23 = vsub.f32 0.0, %v3926_v63  ;;  %v3256_v25 = vsel %vm320_vm0, %v3203_v40, 0  ;;  %v3948_v59 = vsub.f32 0.0, %v3928_v13 }
 0x35b   : > { %v5946_v62 = vrot.slane %v4283_v31, %v5588_v6  ;;  %4594 = vmatprep.subr.msk.bf16.mxu0 %vm320_vm0, %v3202_v5  ;;  %v3947_v55 = vsub.f32 0.0, %v3927_v53  ;;  %4696 = vpow2.f32 %v3977_v1  ;;  %3565 = vmatpush1.bf16.msra.mxu1 %v3256_v25  ;;  %v3865_v15 = vmax.f32 %v5899_v20, 0.0 }
 0x35c   : > { %3524 = vmatpush1.bf16.msra.mxu0 %v3250_v47  ;;  %v3979_v61 = vmul.f32 1.442695, %v3946_v23  ;;  %v3983_v35 = vmul.f32 1.442695, %v3948_v59  ;;  %v3867_v24 = vmax.f32 %v5904_v28, 0.0  ;;  %v3866_v27 = vmax.f32 %v5906_v50, 0.0 }
 0x35d   : > { %v4314_v21 = vcombine.low %v5942_v4, %v5946_v62  ;;  %v3981_v2 = vmul.f32 1.442695, %v3947_v55  ;;  %v3868_v30 = vmax.f32 %v5917_v52, 0.0  ;;  %vm3885_vm3 = vcmp.ne.f32.partialorder %v5899_v20, %v5899_v20  ;;  %v6292_v59 = vld [vmem:[#allocation64_spill] sm:$0xff] }
 0x35e   : > { %4597 = vmatmul.mubr.msk.bf16.vlgmr.msra.gmra.mrb[232].mxu1 %vm1389_vm2, %v5960_v22  ;;  %vm3887_vm4 = vcmp.ne.f32.partialorder %v5904_v28, %v5904_v28  ;;  %vm3886_vm5 = vcmp.ne.f32.partialorder %v5906_v50, %v5906_v50  ;;  %vm3888_vm6 = vcmp.ne.f32.partialorder %v5917_v52, %v5917_v52 }
 0x35f   : > { %4698 = vpow2.f32 %v3981_v2  ;;  %4595 = vmatmul.mubr.msk.bf16.vlgmr.msra.gmra.mrb[232].mxu0 %vm1389_vm2, %v5960_v22  ;;  %3674 = vmatprep.mubr.bf16.mxu1 %v6148_v19 }
 0x360   : > { %4700 = vpow2.f32 %v3979_v61  ;;  %3633 = vmatprep.mubr.bf16.mxu0 %v6148_v19 }
 0x361   : > { %4702 = vpow2.f32 %v3983_v35 }
 0x365   : > { %v4697_v49 = vpop.eup %4696 }
 0x366   : > { %v4101_v43 = vadd.f32 1.0, %v4697_v49  ;;  %v4104_v56 = vmul.f32 -0.5, %v4697_v49  ;;  %v4107_v44 = vand.u32 2147483647, %v4697_v49 }
 0x368   : > { %v2857_v29 = vpop.f32.mrb[208].mxu0  ;;  %4704 = vlog2.f32 %v4101_v43  ;;  %v4105_v11 = vadd.f32 1.0, %v4104_v56  ;;  %vm5985_vm13 = vcmp.lt.f32.partialorder %v4107_v44, 0.0004427343  ;;  %v6282_v56 = vld [vmem:[#allocation54_spill] sm:$0xff] }
 0x369   : > { %v2965_v41 = vadd.f32 %v2857_v29, %v6266_v3  ;;  %v2920_v10 = vpop.f32.mrb[208].mxu1  ;;  %v2859_v14 = vpop.f32.mrb[209].mxu0 }
 0x36a   : > { %v5973_v60 = vadd.f32 %v2920_v10, %v6267_v42  ;;  %v5976_v38 = vadd.f32 %v2859_v14, %v6268_v36  ;;  %v2922_v48 = vpop.f32.mrb[209].mxu1  ;;  %v2861_v19 = vpop.f32.mrb[210].mxu0  ;;  %v5989_v18 = vmul.f32 %v4697_v49, %v4105_v11  ;;  %v6279_v14 = vld [vmem:[#allocation51_spill] sm:$0xff]  ;;  %v6280_v42 = vld [vmem:[#allocation52_spill] sm:$0xff]  ;;  %v6293_v10 = vld [vmem:[#allocation65_spill] sm:$0xff] }
 0x36b   : > { %v2924_v17 = vpop.f32.mrb[210].mxu1  ;;  %v4699_v33 = vpop.eup %4698  ;;  %v3065_v8 = vmax.f32 %v2965_v41, 0.0  ;;  %v5981_v7 = vadd.f32 %v2922_v48, %v6269_v12  ;;  %v2985_v57 = vadd.f32 %v2861_v19, %v6270_v9  ;;  %v6281_v19 = vld [vmem:[#allocation53_spill] sm:$0xff] }
 0x36c   : > { %v3067_v51 = vmax.f32 %v5973_v60, 0.0  ;;  %v2863_v26 = vpop.f32.mrb[211].mxu0  ;;  %v2926_v0 = vpop.f32.mrb[211].mxu1  ;;  %v4119_v34 = vadd.f32 1.0, %v4699_v33  ;;  %v3066_v54 = vmax.f32 %v5976_v38, 0.0  ;;  %v4122_v45 = vmul.f32 -0.5, %v4699_v33 }
 0x36d   : > { %v4701_v37 = vpop.eup %4700  ;;  %v4125_v32 = vand.u32 2147483647, %v4699_v33  ;;  %v3068_v61 = vmax.f32 %v5981_v7, 0.0  ;;  %v3085_v35 = vmax.f32 %v2985_v57, 0.0  ;;  %v2987_v49 = vadd.f32 %v2924_v17, %v6279_v14  ;;  %v6284_v17 = vld [vmem:[#allocation56_spill] sm:$0xff] }
 0x36e   : > { %v4703_v31 = vpop.eup %4702  ;;  %v4110_v46 = vadd.f32 1.0, %v4701_v37  ;;  %v4113_v16 = vmul.f32 -0.5, %v4701_v37  ;;  %4706 = vlog2.f32 %v4119_v34  ;;  %v4116_v5 = vand.u32 2147483647, %v4701_v37  ;;  %v6288_v14 = vld [vmem:[#allocation60_spill] sm:$0xff] }
 0x36f   : > { %v4128_v58 = vadd.f32 1.0, %v4703_v31  ;;  %v4123_v53 = vadd.f32 1.0, %v4122_v45  ;;  %vm5991_vm14 = vcmp.lt.f32.partialorder %v4125_v32, 0.0004427343  ;;  %v4131_v13 = vmul.f32 -0.5, %v4703_v31 }
 0x370   : > { %4708 = vlog2.f32 %v4110_v46  ;;  %v4114_v63 = vadd.f32 1.0, %v4113_v16  ;;  %v2867_v1 = vpop.f32.mrb[212].mxu0  ;;  %v4134_v47 = vand.u32 2147483647, %v4703_v31  ;;  %vm5999_vm15 = vcmp.lt.f32.partialorder %v4116_v5, 0.0004427343 }
 0x371   : > { %4710 = vlog2.f32 %v4128_v58  ;;  %v2930_v23 = vpop.f32.mrb[212].mxu1  ;;  %v5995_v25 = vmul.f32 %v4699_v33, %v4123_v53  ;;  %v2869_v29 = vpop.f32.mrb[213].mxu0  ;;  %v4132_v41 = vadd.f32 1.0, %v4131_v13  ;;  %v2986_v60 = vadd.f32 %v2863_v26, %v6280_v42  ;;  %v6283_v33 = vld [vmem:[#allocation55_spill] sm:$0xff] }
 0x372   : > { %v5997_v2 = vmul.f32 %v4701_v37, %v4114_v63  ;;  %v2932_v3 = vpop.f32.mrb[213].mxu1  ;;  %vm6004_vm1 = vcmp.lt.f32.partialorder %v4134_v47, 0.0004427343  ;;  %v2871_v36 = vpop.f32.mrb[214].mxu0  ;;  %v3165_v48 = vpack.c.bf16 %v3085_v35, %v3065_v8  ;;  %v2988_v43 = vadd.f32 %v2926_v0, %v6281_v19  ;;  %v6285_v8 = vld [vmem:[#allocation57_spill] sm:$0xff]  ;;  %v6287_v47 = vld [vmem:[#allocation59_spill] sm:$0xff] }
 0x373   : > { %v2934_v38 = vpop.f32.mrb[214].mxu1  ;;  %v3005_v44 = vadd.f32 %v2867_v1, %v6282_v56  ;;  %v3007_v12 = vadd.f32 %v2930_v23, %v6283_v33  ;;  %v2873_v7 = vpop.f32.mrb[215].mxu0  ;;  %v4133_v57 = vmul.f32 %v4703_v31, %v4132_v41  ;;  %v3087_v37 = vmax.f32 %v2987_v49, 0.0  ;;  %v6286_v31 = vld [vmem:[#allocation58_spill] sm:$0xff]  ;;  %v6289_v49 = vld [vmem:[#allocation61_spill] sm:$0xff] }
 0x374   : > { %v2936_v9 = vpop.f32.mrb[215].mxu1  ;;  %v3086_v11 = vmax.f32 %v2986_v60, 0.0  ;;  %v3006_v34 = vadd.f32 %v2869_v29, %v6284_v17  ;;  %v3088_v26 = vmax.f32 %v2988_v43, 0.0  ;;  %v3008_v46 = vadd.f32 %v2932_v3, %v6285_v8  ;;  %v4705_v0 = vpop.eup %4704  ;;  %v6290_v60 = vld [vmem:[#allocation62_spill] sm:$0xff] }
 0x375   : > { %v3105_v45 = vmax.f32 %v3005_v44, 0.0  ;;  %v3107_v32 = vmax.f32 %v3007_v12, 0.0  ;;  %v3167_v16 = vpack.c.bf16 %v3087_v37, %v3067_v51  ;;  %v3025_v53 = vadd.f32 %v2871_v36, %v6286_v31 }
 0x376   : > { %v3166_v5 = vpack.c.bf16 %v3086_v11, %v3066_v54  ;;  %v3106_v58 = vmax.f32 %v3006_v34, 0.0  ;;  %v4103_v63 = vmul.f32 0.6931472, %v4705_v0  ;;  %v3168_v1 = vpack.c.bf16 %v3088_v26, %v3068_v61 }
 0x377   : > { %v3108_v13 = vmax.f32 %v3008_v46, 0.0  ;;  %v3027_v23 = vadd.f32 %v2934_v38, %v6287_v47  ;;  %v3125_v41 = vmax.f32 %v3025_v53, 0.0  ;;  %v3026_v3 = vadd.f32 %v2873_v7, %v6288_v14  ;;  %v6291_v38 = vld [vmem:[#allocation63_spill] sm:$0xff] }
 0x378   : > { %v2877_v35 = vpop.f32.mrb[216].mxu0  ;;  %v4707_v29 = vpop.eup %4706  ;;  %3601 = vmatprep.subr.bf16.mxu0 %v3166_v5  ;;  %v3028_v42 = vadd.f32 %v2936_v9, %v6289_v49  ;;  %v4109_v61 = vsel %vm5985_vm13, %v5989_v18, %v4103_v63  ;;  %3642 = vmatprep.subr.bf16.mxu1 %v3168_v1  ;;  %vm4364_vm13 = vcmp.lt.s32.totalorder %v4240_v39, 512 }
 0x379   : > { %v3045_v19 = vadd.f32 %v2877_v35, %v6290_v60  ;;  %v2940_v51 = vpop.f32.mrb[216].mxu1  ;;  %v2879_v54 = vpop.f32.mrb[217].mxu0  ;;  %v4121_v36 = vmul.f32 0.6931472, %v4707_v29  ;;  %v3127_v56 = vmax.f32 %v3027_v23, 0.0  ;;  %3602 = vmatpush1.bf16.msra.mxu0 %v3165_v48  ;;  %v4185_v9 = vadd.f32 %v4109_v61, %v3865_v15  ;;  %3643 = vmatpush1.bf16.msra.mxu1 %v3167_v16 }
 0x37a   : > { %v4709_v43 = vpop.eup %4708  ;;  %v3047_v44 = vadd.f32 %v2940_v51, %v6291_v38  ;;  %v2942_v33 = vpop.f32.mrb[217].mxu1  ;;  %v3185_v11 = vpack.c.bf16 %v3125_v41, %v3105_v45  ;;  %v3126_v17 = vmax.f32 %v3026_v3, 0.0  ;;  %v3128_v8 = vmax.f32 %v3028_v42, 0.0 }
 0x37b   : > { %v6030_v12 = vpop.f32.mrb[218].mxu0  ;;  %v4711_v7 = vpop.eup %4710  ;;  %v4112_v37 = vmul.f32 0.6931472, %v4709_v43  ;;  %v4127_v18 = vsel %vm5991_vm14, %v5995_v25, %v4121_v36  ;;  %v3187_v26 = vpack.c.bf16 %v3127_v56, %v3107_v32  ;;  %v4205_v15 = vsel %vm3885_vm3, %v5899_v20, %v4185_v9 }
 0x37c   : > { %v6034_v34 = vpop.f32.mrb[218].mxu1  ;;  %v6036_v40 = vpop.f32.mrb[219].mxu0  ;;  %v4130_v48 = vmul.f32 0.6931472, %v4711_v7  ;;  %v4187_v45 = vadd.f32 %v4127_v18, %v3867_v24  ;;  %v3186_v16 = vpack.c.bf16 %v3126_v17, %v3106_v58  ;;  %v3188_v32 = vpack.c.bf16 %v3128_v8, %v3108_v13 }
 0x37d   : > { %v6041_v46 = vpop.f32.mrb[219].mxu1  ;;  %v4118_v0 = vsel %vm5999_vm15, %v5997_v2, %v4112_v37  ;;  %v3145_v5 = vmax.f32 %v3045_v19, 0.0  ;;  %v3147_v31 = vmax.f32 %v3047_v44, 0.0  ;;  %v3046_v2 = vadd.f32 %v2879_v54, %v6292_v59 }
 0x37e   : > { %v4186_v55 = vadd.f32 %v4118_v0, %v3866_v27  ;;  %v4136_v25 = vsel %vm6004_vm1, %v4133_v57, %v4130_v48  ;;  %v4207_v20 = vsel %vm3887_vm4, %v5904_v28, %v4187_v45  ;;  %3603 = vmatprep.subr.bf16.mxu0 %v3186_v16  ;;  %v3048_v57 = vadd.f32 %v2942_v33, %v6293_v10 }
 0x37f   : > { %v4188_v24 = vadd.f32 %v4136_v25, %v3868_v30  ;;  %3644 = vmatprep.subr.bf16.mxu1 %v3188_v32  ;;  %3604 = vmatpush1.bf16.msra.mxu0 %v3185_v11  ;;  %v3146_v30 = vmax.f32 %v3046_v2, 0.0  ;;  %v3929_v1 = vand.u32 2147483647, %v6030_v12  ;;  %v3205_v47 = vpack.c.bf16 %v3145_v5, %v3145_v5 }
 0x380   : > { %v4206_v27 = vsel %vm3886_vm5, %v5906_v50, %v4186_v55  ;;  %3645 = vmatpush1.bf16.msra.mxu1 %v3187_v26  ;;  %v3148_v63 = vmax.f32 %v3048_v57, 0.0  ;;  %v3207_v50 = vpack.c.bf16 %v3147_v31, %v3147_v31  ;;  %v3931_v14 = vand.u32 2147483647, %v6034_v34 }
 0x381   : > { %v4284_v28 = vcombine.low %v4205_v15, %v4206_v27  ;;  %v4208_v58 = vsel %vm3888_vm6, %v5917_v52, %v4188_v24  ;;  %v3206_v23 = vpack.c.bf16 %v3146_v30, %v3146_v30  ;;  %v3949_v41 = vsub.f32 0.0, %v3929_v1 }
 0x382   : > { %v4285_v53 = vcombine.low %v4207_v20, %v4208_v58  ;;  %v3208_v29 = vpack.c.bf16 %v3148_v63, %v3148_v63  ;;  %v3930_v3 = vand.u32 2147483647, %v6036_v40  ;;  %v3951_v42 = vsub.f32 0.0, %v3931_v14 }
 0x383   : > { %v4306_v13 = vrot.slane %v4284_v28, %v5588_v6  ;;  %4598 = vmatprep.subr.msk.bf16.mxu0 %vm320_vm0, %v3206_v23  ;;  %v3985_v49 = vmul.f32 1.442695, %v3949_v41  ;;  %v3932_v19 = vand.u32 2147483647, %v6041_v46  ;;  %v3262_v51 = vsel %vm320_vm0, %v3205_v47, 0 }
 0x384   : > { %v4313_v35 = vrot.slane %v4285_v53, %v5588_v6  ;;  %4600 = vmatprep.subr.msk.bf16.mxu1 %vm320_vm0, %v3208_v29  ;;  %v3950_v60 = vsub.f32 0.0, %v3930_v3  ;;  %v3268_v54 = vsel %vm320_vm0, %v3207_v50, 0  ;;  %v4322_v43 = vrot.slane %v4314_v21, %v5588_v6  ;;  %3606 = vmatpush1.bf16.msra.mxu0 %v3262_v51 }
 0x385   : > { %4712 = vpow2.f32 %v3985_v49  ;;  %v3989_v36 = vmul.f32 1.442695, %v3951_v42  ;;  %3647 = vmatpush1.bf16.msra.mxu1 %v3268_v54  ;;  %v3952_v38 = vsub.f32 0.0, %v3932_v19  ;;  %v3869_v24 = vmax.f32 %v6030_v12, 0.0 }
 0x386   : > { %v4315_v52 = vcombine.low %v4306_v13, %v4313_v35  ;;  %v3987_v56 = vmul.f32 1.442695, %v3950_v60  ;;  %v3871_v31 = vmax.f32 %v6034_v34, 0.0  ;;  %v3870_v1 = vmax.f32 %v6036_v40, 0.0 }
 0x387   : > { %4714 = vpow2.f32 %v3989_v36  ;;  %v3991_v33 = vmul.f32 1.442695, %v3952_v38  ;;  %4599 = vmatmul.mubr.msk.bf16.vlgmr.msra.gmra.mrb[236].mxu0 %vm1389_vm2, %v5960_v22  ;;  %vm3889_vm8 = vcmp.ne.f32.partialorder %v6030_v12, %v6030_v12  ;;  %vm3890_vm9 = vcmp.ne.f32.partialorder %v6036_v40, %v6036_v40 }
 0x388   : > { %v4329_v61 = vrot.slane %v4315_v52, %v5588_v6  ;;  %4716 = vpow2.f32 %v3987_v56  ;;  %4601 = vmatmul.mubr.msk.bf16.vlgmr.msra.gmra.mrb[236].mxu1 %vm1389_vm2, %v5960_v22  ;;  %v3872_v14 = vmax.f32 %v6041_v46, 0.0  ;;  %vm3891_vm11 = vcmp.ne.f32.partialorder %v6034_v34, %v6034_v34 }
 0x389   : > { %4718 = vpow2.f32 %v3991_v33  ;;  %vm3892_vm12 = vcmp.ne.f32.partialorder %v6041_v46, %v6041_v46 }
 0x38a   : > { %v4330_v44 = vcombine.low %v4322_v43, %v4329_v61 }
 0x38c   : > { %4623 = vst [vmem:[%s5823_s28 + $0x23] ss:$4 sm:$0xff] %v4330_v44 }
 0x38f   : > { %v4713_v4 = vpop.eup %4712 }
 0x390   : > { %v4137_v62 = vadd.f32 1.0, %v4713_v4  ;;  %v4140_v17 = vmul.f32 -0.5, %v4713_v4  ;;  %v4143_v15 = vand.u32 2147483647, %v4713_v4 }
 0x391   : > { %v4715_v21 = vpop.eup %4714 }
 0x392   : > { %v4717_v7 = vpop.eup %4716  ;;  %4720 = vlog2.f32 %v4137_v62  ;;  %v4155_v9 = vadd.f32 1.0, %v4715_v21  ;;  %v4158_v48 = vmul.f32 -0.5, %v4715_v21  ;;  %v4141_v8 = vadd.f32 1.0, %v4140_v17 }
 0x393   : > { %v4146_v37 = vadd.f32 1.0, %v4717_v7  ;;  %v4719_v11 = vpop.eup %4718  ;;  %v4149_v26 = vmul.f32 -0.5, %v4717_v7  ;;  %v4161_v22 = vand.u32 2147483647, %v4715_v21  ;;  %v4152_v5 = vand.u32 2147483647, %v4717_v7 }
 0x394   : > { %4722 = vlog2.f32 %v4155_v9  ;;  %v4164_v18 = vadd.f32 1.0, %v4719_v11  ;;  %v4159_v45 = vadd.f32 1.0, %v4158_v48  ;;  %v4167_v0 = vmul.f32 -0.5, %v4719_v11 }
 0x395   : > { %4724 = vlog2.f32 %v4146_v37  ;;  %v4150_v55 = vadd.f32 1.0, %v4149_v26  ;;  %v4142_v32 = vmul.f32 %v4713_v4, %v4141_v8  ;;  %vm4144_vm0 = vcmp.lt.f32.partialorder %v4143_v15, 0.0004427343 }
 0x396   : > { %4726 = vlog2.f32 %v4164_v18  ;;  %vm4162_vm2 = vcmp.lt.f32.partialorder %v4161_v22, 0.0004427343  ;;  %v4160_v10 = vmul.f32 %v4715_v21, %v4159_v45  ;;  %v4168_v57 = vadd.f32 1.0, %v4167_v0 }
 0x397   : > { %v4151_v30 = vmul.f32 %v4717_v7, %v4150_v55  ;;  %v4170_v53 = vand.u32 2147483647, %v4719_v11  ;;  %vm4153_vm7 = vcmp.lt.f32.partialorder %v4152_v5, 0.0004427343 }
 0x398   : > { %v4169_v41 = vmul.f32 %v4719_v11, %v4168_v57 }
 0x399   : > { %vm4171_vm10 = vcmp.lt.f32.partialorder %v4170_v53, 0.0004427343 }
 0x39c   : > { %v4721_v16 = vpop.eup %4720 }
 0x39d   : > { %v4139_v25 = vmul.f32 0.6931472, %v4721_v16 }
 0x39e   : > { %v4723_v20 = vpop.eup %4722 }
 0x39f   : > { %v4725_v59 = vpop.eup %4724  ;;  %v4145_v2 = vsel %vm4144_vm0, %v4142_v32, %v4139_v25  ;;  %v4157_v27 = vmul.f32 0.6931472, %v4723_v20 }
 0x3a0   : > { %v4189_v28 = vadd.f32 %v4145_v2, %v3869_v24  ;;  %v4148_v58 = vmul.f32 0.6931472, %v4725_v59  ;;  %v4727_v13 = vpop.eup %4726 }
 0x3a1   : > { %v4163_v63 = vsel %vm4162_vm2, %v4160_v10, %v4157_v27  ;;  %v4166_v29 = vmul.f32 0.6931472, %v4727_v13 }
 0x3a2   : > { %v4191_v47 = vadd.f32 %v4163_v63, %v3871_v31  ;;  %v4154_v50 = vsel %vm4153_vm7, %v4151_v30, %v4148_v58  ;;  %v4209_v23 = vsel %vm3889_vm8, %v6030_v12, %v4189_v28 }
 0x3a3   : > { %v4190_v35 = vadd.f32 %v4154_v50, %v3870_v1  ;;  %v4172_v52 = vsel %vm4171_vm10, %v4169_v41, %v4166_v29 }
 0x3a4   : > { %v4211_v49 = vsel %vm3891_vm11, %v6034_v34, %v4191_v47  ;;  %v4192_v12 = vadd.f32 %v4172_v52, %v3872_v14 }
 0x3a5   : > { %v4210_v3 = vsel %vm3890_vm9, %v6036_v40, %v4190_v35 }
 0x3a6   : > { %v4331_v42 = vcombine.low %v4209_v23, %v4210_v3  ;;  %v4212_v60 = vsel %vm3892_vm12, %v6041_v46, %v4192_v12 }
 0x3a7   : > { %v4332_v51 = vcombine.low %v4211_v49, %v4212_v60 }
 0x3a8   : > { %v4339_v19 = vrot.slane %v4331_v42, %v5588_v6 }
 0x3a9   : > { %v4346_v54 = vrot.slane %v4332_v51, %v5588_v6 }
 0x3ab   : > { %v4347_v43 = vcombine.low %v4339_v19, %v4346_v54 }
 0x3ad   : > { %v4354_v40 = vrot.slane %v4347_v43, %v5588_v6 }
 0x3af   : > { %4624 = vst.msk [vmem:[%s5823_s28 + $0x43] ss:$4 sm:$0xf] %vm4364_vm13, %v4354_v40 }
 0x3b7   : > { %v3307_v61 = vpop.f32.mrb[220].mxu0 }
 0x3b8   : > { %v4602_v34 = vmul.f32 -1.442695, %v3307_v61  ;;  %v3348_v36 = vpop.f32.mrb[220].mxu1  ;;  %v3309_v56 = vpop.f32.mrb[221].mxu0 }
 0x3b9   : > { %v4604_v38 = vmul.f32 -1.442695, %v3348_v36  ;;  %v4603_v44 = vmul.f32 -1.442695, %v3309_v56  ;;  %v3350_v33 = vpop.f32.mrb[221].mxu1  ;;  %v3311_v4 = vpop.f32.mrb[222].mxu0 }
 0x3ba   : > { %4728 = vpow2.f32 %v4602_v34  ;;  %v4605_v46 = vmul.f32 -1.442695, %v3350_v33  ;;  %v3352_v62 = vpop.f32.mrb[222].mxu1  ;;  %v3312_v21 = vpop.f32.mrb[223].mxu0 }
 0x3bb   : > { %4730 = vpow2.f32 %v4604_v38  ;;  %v3353_v7 = vpop.f32.mrb[223].mxu1 }
 0x3bc   : > { %4732 = vpow2.f32 %v4603_v44 }
 0x3bd   : > { %4734 = vpow2.f32 %v4605_v46 }
 0x3c4   : > { %v4729_v39 = vpop.eup %4728 }
 0x3c5   : > { %v4731_v9 = vpop.eup %4730  ;;  %v3743_v6 = vadd.f32 1.0, %v4729_v39 }
 0x3c6   : > { %v4733_v37 = vpop.eup %4732  ;;  %v3745_v11 = vadd.f32 1.0, %v4731_v9 }
 0x3c7   : > { %v4735_v17 = vpop.eup %4734  ;;  %4736 = vrcp.f32 %v3743_v6  ;;  %v3744_v18 = vadd.f32 1.0, %v4733_v37 }
 0x3c8   : > { %4738 = vrcp.f32 %v3745_v11  ;;  %v3746_v48 = vadd.f32 1.0, %v4735_v17 }
 0x3c9   : > { %4740 = vrcp.f32 %v3744_v18 }
 0x3ca   : > { %4742 = vrcp.f32 %v3746_v48 }
 0x3d1   : > { %v4737_v26 = vpop.eup %4736 }
 0x3d2   : > { %v4739_v8 = vpop.eup %4738 }
 0x3d3   : > { %v4741_v15 = vpop.eup %4740 }
 0x3d4   : > { %v4743_v22 = vpop.eup %4742  ;;  %v3823_v45 = vcombine.low %v4737_v26, %v4741_v15 }
 0x3d5   : > { %v3824_v0 = vcombine.low %v4739_v8, %v4743_v22 }
 0x3d6   : > { %3843 = vst [vmem:[%s5823_s28] sm:$0x77] %v3823_v45 }
 0x3d7   : > { %3844 = vst [vmem:[%s5823_s28 + $0x8] sm:$0x77] %v3824_v0 }
 0x3e0   : > { %v3389_v16 = vpop.f32.mrb[224].mxu0  ;;  %v3430_v25 = vpop.f32.mrb[224].mxu1 }
 0x3e1   : > { %v4606_v55 = vmul.f32 -1.442695, %v3389_v16  ;;  %v3391_v32 = vpop.f32.mrb[225].mxu0  ;;  %v4608_v5 = vmul.f32 -1.442695, %v3430_v25  ;;  %v3432_v24 = vpop.f32.mrb[225].mxu1 }
 0x3e2   : > { %v4607_v20 = vmul.f32 -1.442695, %v3391_v32  ;;  %v3393_v31 = vpop.f32.mrb[226].mxu0  ;;  %v4609_v59 = vmul.f32 -1.442695, %v3432_v24  ;;  %v3434_v2 = vpop.f32.mrb[226].mxu1 }
 0x3e3   : > { %4744 = vpow2.f32 %v4606_v55  ;;  %v3394_v27 = vpop.f32.mrb[227].mxu0  ;;  %v3435_v10 = vpop.f32.mrb[227].mxu1 }
 0x3e4   : > { %4746 = vpow2.f32 %v4608_v5 }
 0x3e5   : > { %4748 = vpow2.f32 %v4607_v20 }
 0x3e6   : > { %4750 = vpow2.f32 %v4609_v59 }
 0x3ed   : > { %v4745_v57 = vpop.eup %4744 }
 0x3ee   : > { %v4747_v28 = vpop.eup %4746  ;;  %v3747_v58 = vadd.f32 1.0, %v4745_v57 }
 0x3ef   : > { %v4749_v30 = vpop.eup %4748  ;;  %v3749_v53 = vadd.f32 1.0, %v4747_v28 }
 0x3f0   : > { %v4751_v63 = vpop.eup %4750  ;;  %4752 = vrcp.f32 %v3747_v58  ;;  %v3748_v1 = vadd.f32 1.0, %v4749_v30 }
 0x3f1   : > { %4754 = vrcp.f32 %v3749_v53  ;;  %v3750_v13 = vadd.f32 1.0, %v4751_v63 }
 0x3f2   : > { %4756 = vrcp.f32 %v3748_v1 }
 0x3f3   : > { %4758 = vrcp.f32 %v3750_v13 }
 0x3fa   : > { %v4753_v47 = vpop.eup %4752 }
 0x3fb   : > { %v4755_v50 = vpop.eup %4754 }
 0x3fc   : > { %v4757_v23 = vpop.eup %4756 }
 0x3fd   : > { %v4759_v35 = vpop.eup %4758  ;;  %v3825_v29 = vcombine.low %v4753_v47, %v4757_v23 }
 0x3fe   : > { %v3826_v41 = vcombine.low %v4755_v50, %v4759_v35 }
 0x3ff   : > { %3845 = vst [vmem:[%s5823_s28 + $0x10] sm:$0x77] %v3825_v29 }
 0x400   : > { %3846 = vst [vmem:[%s5823_s28 + $0x18] sm:$0x77] %v3826_v41 }
 0x409   : > { %v3471_v14 = vpop.f32.mrb[228].mxu0 }
 0x40a   : > { %v3512_v3 = vpop.f32.mrb[228].mxu1  ;;  %v4610_v52 = vmul.f32 -1.442695, %v3471_v14  ;;  %v3473_v42 = vpop.f32.mrb[229].mxu0 }
 0x40b   : > { %v4612_v49 = vmul.f32 -1.442695, %v3512_v3  ;;  %v3514_v12 = vpop.f32.mrb[229].mxu1  ;;  %v4611_v60 = vmul.f32 -1.442695, %v3473_v42  ;;  %v3475_v51 = vpop.f32.mrb[230].mxu0 }
 0x40c   : > { %v4613_v19 = vmul.f32 -1.442695, %v3514_v12  ;;  %v3516_v54 = vpop.f32.mrb[230].mxu1  ;;  %4760 = vpow2.f32 %v4610_v52  ;;  %v3476_v43 = vpop.f32.mrb[231].mxu0 }
 0x40d   : > { %v3517_v40 = vpop.f32.mrb[231].mxu1  ;;  %4762 = vpow2.f32 %v4612_v49 }
 0x40e   : > { %4764 = vpow2.f32 %v4611_v60 }
 0x40f   : > { %4766 = vpow2.f32 %v4613_v19 }
 0x416   : > { %v4761_v61 = vpop.eup %4760 }
 0x417   : > { %v4763_v34 = vpop.eup %4762  ;;  %v3751_v36 = vadd.f32 1.0, %v4761_v61 }
 0x418   : > { %v4765_v56 = vpop.eup %4764  ;;  %v3753_v38 = vadd.f32 1.0, %v4763_v34 }
 0x419   : > { %v4767_v44 = vpop.eup %4766  ;;  %4768 = vrcp.f32 %v3751_v36  ;;  %v3752_v33 = vadd.f32 1.0, %v4765_v56 }
 0x41a   : > { %4770 = vrcp.f32 %v3753_v38  ;;  %v3754_v4 = vadd.f32 1.0, %v4767_v44 }
 0x41b   : > { %4772 = vrcp.f32 %v3752_v33 }
 0x41c   : > { %4774 = vrcp.f32 %v3754_v4 }
 0x423   : > { %v4769_v46 = vpop.eup %4768 }
 0x424   : > { %v4771_v62 = vpop.eup %4770 }
 0x425   : > { %v4773_v21 = vpop.eup %4772 }
 0x426   : > { %v4775_v7 = vpop.eup %4774  ;;  %v3827_v39 = vcombine.low %v4769_v46, %v4773_v21 }
 0x427   : > { %v3828_v9 = vcombine.low %v4771_v62, %v4775_v7 }
 0x428   : > { %3847 = vst [vmem:[%s5823_s28 + $0x20] sm:$0x77] %v3827_v39 }
 0x429   : > { %3848 = vst [vmem:[%s5823_s28 + $0x28] sm:$0x77] %v3828_v9 }
 0x431   : > { %v3594_v11 = vpop.f32.mrb[232].mxu1 }
 0x432   : > { %v3553_v6 = vpop.f32.mrb[232].mxu0  ;;  %v4616_v18 = vmul.f32 -1.442695, %v3594_v11  ;;  %v3596_v26 = vpop.f32.mrb[233].mxu1 }
 0x433   : > { %v4614_v37 = vmul.f32 -1.442695, %v3553_v6  ;;  %v3555_v17 = vpop.f32.mrb[233].mxu0  ;;  %v4617_v15 = vmul.f32 -1.442695, %v3596_v26  ;;  %v3598_v22 = vpop.f32.mrb[234].mxu1 }
 0x434   : > { %v4615_v48 = vmul.f32 -1.442695, %v3555_v17  ;;  %v3557_v8 = vpop.f32.mrb[234].mxu0  ;;  %v3599_v0 = vpop.f32.mrb[235].mxu1 }
 0x435   : > { %4776 = vpow2.f32 %v4614_v37  ;;  %v3558_v45 = vpop.f32.mrb[235].mxu0 }
 0x436   : > { %4778 = vpow2.f32 %v4616_v18 }
 0x437   : > { %4780 = vpow2.f32 %v4615_v48 }
 0x438   : > { %4782 = vpow2.f32 %v4617_v15 }
 0x43f   : > { %v4777_v16 = vpop.eup %4776 }
 0x440   : > { %v4779_v55 = vpop.eup %4778  ;;  %v3755_v25 = vadd.f32 1.0, %v4777_v16 }
 0x441   : > { %v4781_v32 = vpop.eup %4780  ;;  %v3757_v5 = vadd.f32 1.0, %v4779_v55 }
 0x442   : > { %v4783_v20 = vpop.eup %4782  ;;  %4784 = vrcp.f32 %v3755_v25  ;;  %v3756_v24 = vadd.f32 1.0, %v4781_v32 }
 0x443   : > { %4786 = vrcp.f32 %v3757_v5  ;;  %v3758_v31 = vadd.f32 1.0, %v4783_v20 }
 0x444   : > { %4788 = vrcp.f32 %v3756_v24 }
 0x445   : > { %4790 = vrcp.f32 %v3758_v31 }
 0x44c   : > { %v4785_v59 = vpop.eup %4784 }
 0x44d   : > { %v4787_v2 = vpop.eup %4786 }
 0x44e   : > { %v4789_v27 = vpop.eup %4788 }
 0x44f   : > { %v4791_v10 = vpop.eup %4790  ;;  %v3829_v57 = vcombine.low %v4785_v59, %v4789_v27 }
 0x450   : > { %v3830_v28 = vcombine.low %v4787_v2, %v4791_v10 }
 0x451   : > { %3849 = vst [vmem:[%s5823_s28 + $0x30] sm:$0x77] %v3829_v57 }
 0x452   : > { %3850 = vst [vmem:[%s5823_s28 + $0x38] sm:$0x77] %v3830_v28 }
 0x45a   : > { %v3635_v58 = vpop.f32.mrb[236].mxu0 }
 0x45b   : > { %v3676_v30 = vpop.f32.mrb[236].mxu1  ;;  %v4618_v53 = vmul.f32 -1.442695, %v3635_v58  ;;  %v3637_v1 = vpop.f32.mrb[237].mxu0 }
 0x45c   : > { %v4620_v63 = vmul.f32 -1.442695, %v3676_v30  ;;  %v3678_v13 = vpop.f32.mrb[237].mxu1  ;;  %v4619_v47 = vmul.f32 -1.442695, %v3637_v1  ;;  %v3639_v23 = vpop.f32.mrb[238].mxu0 }
 0x45d   : > { %v4621_v50 = vmul.f32 -1.442695, %v3678_v13  ;;  %v3680_v35 = vpop.f32.mrb[238].mxu1  ;;  %4792 = vpow2.f32 %v4618_v53  ;;  %v3640_v29 = vpop.f32.mrb[239].mxu0 }
 0x45e   : > { %v3681_v41 = vpop.f32.mrb[239].mxu1  ;;  %4794 = vpow2.f32 %v4620_v63 }
 0x45f   : > { %4796 = vpow2.f32 %v4619_v47 }
 0x460   : > { %4798 = vpow2.f32 %v4621_v50 }
 0x467   : > { %v4793_v14 = vpop.eup %4792 }
 0x468   : > { %v4795_v3 = vpop.eup %4794  ;;  %v3759_v52 = vadd.f32 1.0, %v4793_v14 }
 0x469   : > { %v4797_v49 = vpop.eup %4796  ;;  %v3761_v42 = vadd.f32 1.0, %v4795_v3 }
 0x46a   : > { %v4799_v12 = vpop.eup %4798  ;;  %4800 = vrcp.f32 %v3759_v52  ;;  %v3760_v60 = vadd.f32 1.0, %v4797_v49 }
 0x46b   : > { %4802 = vrcp.f32 %v3761_v42  ;;  %v3762_v19 = vadd.f32 1.0, %v4799_v12 }
 0x46c   : > { %4804 = vrcp.f32 %v3760_v60 }
 0x46d   : > { %4806 = vrcp.f32 %v3762_v19 }
 0x474   : > { %v4801_v51 = vpop.eup %4800 }
 0x475   : > { %v4803_v54 = vpop.eup %4802 }
 0x476   : > { %v4805_v43 = vpop.eup %4804 }
 0x477   : > { %v4807_v40 = vpop.eup %4806  ;;  %v3831_v61 = vcombine.low %v4801_v51, %v4805_v43 }
 0x478   : > { %v3832_v34 = vcombine.low %v4803_v54, %v4807_v40 }
 0x479   : > { %3851 = vst [vmem:[%s5823_s28 + $0x40] sm:$0x77] %v3831_v61 }
 0x47a   : > { %3852 = vst [vmem:[%s5823_s28 + $0x48] sm:$0x77] %v3832_v34 }
 0x47b PF: > { %s15_s18 = sadd.s32 1, %s4815_s18  }
 0x47c   : > { %p12_p4 = scmp.ge.s32.totalorder %s15_s18, 4  }
 0x47e   :  { %14 = sbr.rel (!%p12_p4) target bundleno = 1 (0x1), region = 73 }

</bundles_post_ra>
